<compile_context>
chip_gen: v5e
topology: v5e:2x2
jax: 0.10.0
libtpu: 0.0.40
codegen_flags: <defaults>
</compile_context>

<pallas_src>
import jax
import jax.numpy as jnp
from jax.experimental import pallas as pl
from jax.experimental.pallas import tpu as pltpu


# ----------------------------------------------------------------------------
# Kernel factory (closes over static shape/chunk info)
# ----------------------------------------------------------------------------
def _make_kernel(H_pad, tt, T_total, ragged):
    G = 4 * H_pad

    def kernel(xproj_ref,                 # (tt, B, 4H) f32  precomputed x@Wih0 + b0
               whh0_ref,                  # (H, 4H)   bf16   layer-0 recurrent weights
               w1_ref,                    # (2H, 4H)  bf16   stacked [Wih1; Whh1]
               b1_ref,                    # (1, 4H)   f32
               scale_ref, shift_ref,      # (1, H)    f32    folded BatchNorm
               fcw_ref, fcb_ref,          # (H, O) bf16, (1, O) f32
               out_ref,                   # (B, O)    f32
               h01_ref,                   # (B, 2H)   bf16   [h0 | h1] matmul operands
               c0_ref, h1_ref, c1_ref):   # (B, H)    f32    carried state
        B = xproj_ref.shape[1]

        # Zero the recurrent state on the first time chunk.
        @pl.when(pl.program_id(0) == 0)
        def _():
            h01_ref[...] = jnp.zeros_like(h01_ref)
            c0_ref[...] = jnp.zeros_like(c0_ref)
            h1_ref[...] = jnp.zeros_like(h1_ref)
            c1_ref[...] = jnp.zeros_like(c1_ref)

        # Hoist weight loads out of the time loop (bias stays (1, G); the VPU
        # add broadcasts for free).
        whh0 = whh0_ref[...]
        w1 = w1_ref[...]
        b1 = b1_ref[...]

        c0 = c0_ref[...]
        c1 = c1_ref[...]
        h1 = h1_ref[...]

        def activate(gates, c):
            # Gate slices are 128-lane aligned because H is padded to 128.
            i_g = jax.nn.sigmoid(gates[:, 0 * H_pad:1 * H_pad])
            f_g = jax.nn.sigmoid(gates[:, 1 * H_pad:2 * H_pad])
            g_g = jnp.tanh(gates[:, 2 * H_pad:3 * H_pad])
            o_g = jax.nn.sigmoid(gates[:, 3 * H_pad:4 * H_pad])
            c_new = f_g * c + i_g * g_g
            h_new = o_g * jnp.tanh(c_new)
            return h_new, c_new

        if ragged:
            base_t = pl.program_id(0) * tt

        # Statically unrolled recurrence over this time chunk (tt is small).
        for t in range(tt):
            if ragged:
                valid = base_t + t < T_total

            # Layer 0: input projection already done; only h0 @ Whh0 is on
            # the serial critical path (bf16 operands, f32 accumulation).
            h0_prev_bf = h01_ref[:, 0:H_pad]
            g0 = xproj_ref[t] + jnp.dot(h0_prev_bf, whh0,
                                        preferred_element_type=jnp.float32)
            h0_new, c0_new = activate(g0, c0)
            h0_bf = h0_new.astype(jnp.bfloat16)
            if ragged:
                h0_bf = jnp.where(valid, h0_bf, h0_prev_bf)
                c0_new = jnp.where(valid, c0_new, c0)
            h01_ref[:, 0:H_pad] = h0_bf            # lane-aligned half update
            c0 = c0_new

            # Layer 1: single fused matmul  [h0 | h1] @ [Wih1; Whh1].
            g1 = jnp.dot(h01_ref[...], w1,
                         preferred_element_type=jnp.float32) + b1
            h1_new, c1_new = activate(g1, c1)
            h1_bf = h1_new.astype(jnp.bfloat16)
            if ragged:
                h1_bf = jnp.where(valid, h1_bf, h01_ref[:, H_pad:2 * H_pad])
                h1_new = jnp.where(valid, h1_new, h1)
                c1_new = jnp.where(valid, c1_new, c1)
            h01_ref[:, H_pad:2 * H_pad] = h1_bf    # lane-aligned half update
            h1 = h1_new
            c1 = c1_new

        # Carry the state to the next time chunk.
        c0_ref[...] = c0
        c1_ref[...] = c1
        h1_ref[...] = h1

        # Epilogue on the last chunk: folded BN -> ReLU -> Linear.
        @pl.when(pl.program_id(0) == pl.num_programs(0) - 1)
        def _():
            act = jnp.maximum(h1 * scale_ref[...] + shift_ref[...], 0.0)
            out_ref[...] = (jnp.dot(act.astype(jnp.bfloat16), fcw_ref[...],
                                    preferred_element_type=jnp.float32)
                            + fcb_ref[...])

    return kernel


# ----------------------------------------------------------------------------
# Wrapper (layout prep + pallas_call)
# ----------------------------------------------------------------------------
def _round_up(x, m):
    return -(-x // m) * m


def _pad_gate_cols(w, h, h_pad):
    """Zero-pad the trailing 4*h gate axis blockwise (i,f,g,o) to 4*h_pad."""
    lead = w.shape[:-1]
    w4 = w.reshape(lead + (4, h))
    w4 = jnp.pad(w4, [(0, 0)] * len(lead) + [(0, 0), (0, h_pad - h)])
    return w4.reshape(lead + (4 * h_pad,))


def _pad_axis(w, axis, new):
    pads = [(0, 0)] * w.ndim
    pads[axis] = (0, new - w.shape[axis])
    return jnp.pad(w, pads)


def seq2seq_forward(x_btd, params, *, time_chunk=4):
    """x_btd: (B, T, D) float32, batch_first like the PyTorch module."""
    B, T, D = x_btd.shape
    H = params["whh0"].shape[0]
    O = params["fcw"].shape[1]

    B_pad = _round_up(B, 8)        # f32 sublane count -> unmasked sublanes
    H_pad = _round_up(H, 128)      # lane width -> lane-aligned gates
    O_pad = _round_up(O, 128)      # lane-dense output store
    G = 4 * H_pad

    tt = max(1, min(time_chunk, T))
    n_chunks = pl.cdiv(T, tt)
    ragged = (T % tt) != 0         # padded tail steps are masked in-kernel

    # --- parameter prep (plain XLA, one-off) --------------------------------
    wih0 = _pad_gate_cols(params["wih0"], H, H_pad)                        # (D, G) f32
    b0 = _pad_gate_cols(params["b0"], H, H_pad)                            # (1, G) f32
    whh0 = _pad_axis(_pad_gate_cols(params["whh0"], H, H_pad), 0, H_pad)   # (H_pad, G)
    wih1 = _pad_axis(_pad_gate_cols(params["wih1"], H, H_pad), 0, H_pad)   # (H_pad, G)
    whh1 = _pad_axis(_pad_gate_cols(params["whh1"], H, H_pad), 0, H_pad)   # (H_pad, G)
    w1 = jnp.concatenate([wih1, whh1], axis=0)                             # (2*H_pad, G)
    b1 = _pad_gate_cols(params["b1"], H, H_pad)                            # (1, G) f32

    # bf16 MXU operands (f32 accumulation in-kernel).
    whh0_bf = whh0.astype(jnp.bfloat16)
    w1_bf = w1.astype(jnp.bfloat16)

    # BatchNorm1d (eval) folded into a single scale/shift.
    eps = jnp.float32(1e-5)
    scale = params["gamma"] * jax.lax.rsqrt(params["var"] + eps)
    shift = params["beta"] - params["mean"] * scale
    scale = _pad_axis(scale, 1, H_pad)                                     # (1, H_pad)
    shift = _pad_axis(shift, 1, H_pad)

    fcw_bf = _pad_axis(_pad_axis(params["fcw"], 0, H_pad), 1, O_pad
                       ).astype(jnp.bfloat16)                              # (H_pad, O_pad)
    fcb = _pad_axis(params["fcb"], 1, O_pad)                               # (1, O_pad)

    # --- hoisted layer-0 input projection: one big matmul (f32) -------------
    x_pad = _pad_axis(x_btd, 0, B_pad)                                     # (B_pad, T, D)
    x_tbd = jnp.transpose(x_pad, (1, 0, 2))                                # (T, B_pad, D)
    xproj = jnp.einsum("tbd,dg->tbg", x_tbd, wih0,
                       preferred_element_type=jnp.float32) + b0            # (T, B_pad, G)
    xproj = _pad_axis(xproj, 0, n_chunks * tt)                             # ragged tail

    # --- VMEM budget (double-buffered weights + streamed chunk + scratch) ---
    resident = 2 * 2 * (whh0_bf.size + w1_bf.size + fcw_bf.size)           # bf16 weights x2 buf
    resident += 2 * 4 * (b1.size + scale.size + shift.size + fcb.size)     # f32 vectors x2 buf
    resident += 2 * 4 * tt * B_pad * G                                     # streamed xproj x2 buf
    resident += 2 * B_pad * 2 * H_pad + 3 * 4 * B_pad * H_pad              # scratch
    resident += 2 * 4 * B_pad * O_pad                                      # output
    vmem_limit = min(max(32 * 1024 * 1024, int(resident * 1.5)),
                     96 * 1024 * 1024)   # v7x note: cap <= ~56 MiB at large H

    full2d = lambda shape: pl.BlockSpec(shape, lambda t: (0, 0))

    out_pad = pl.pallas_call(
        _make_kernel(H_pad, tt, T, ragged),
        out_shape=jax.ShapeDtypeStruct((B_pad, O_pad), jnp.float32),
        grid_spec=pltpu.PrefetchScalarGridSpec(
            num_scalar_prefetch=0,
            grid=(n_chunks,),
            in_specs=[
                pl.BlockSpec((tt, B_pad, G), lambda t: (t, 0, 0)),  # streamed chunks
                full2d((H_pad, G)),          # whh0 (bf16, resident)
                full2d((2 * H_pad, G)),      # stacked layer-1 weights (bf16)
                full2d((1, G)),              # b1
                full2d((1, H_pad)),          # bn scale
                full2d((1, H_pad)),          # bn shift
                full2d((H_pad, O_pad)),      # fc weight (bf16)
                full2d((1, O_pad)),          # fc bias
            ],
            out_specs=pl.BlockSpec((B_pad, O_pad), lambda t: (0, 0)),
            scratch_shapes=[
                pltpu.VMEM((B_pad, 2 * H_pad), jnp.bfloat16),   # [h0 | h1] operands
                pltpu.VMEM((B_pad, H_pad), jnp.float32),        # c0
                pltpu.VMEM((B_pad, H_pad), jnp.float32),        # h1 (f32 carry)
                pltpu.VMEM((B_pad, H_pad), jnp.float32),        # c1
            ],
        ),
        compiler_params=pltpu.CompilerParams(
            dimension_semantics=("arbitrary",),   # recurrence: sequential grid
            vmem_limit_bytes=vmem_limit,
        ),
    )(xproj, whh0_bf, w1_bf, b1, scale, shift, fcw_bf, fcb)

    return out_pad[:B, :O]


# ----------------------------------------------------------------------------
# Parameters (natural PyTorch-like shapes; wrapper does all TPU layout prep)
# ----------------------------------------------------------------------------
def init_params(key, input_dim, hidden, output_dim):
    """LSTM: U(-1/sqrt(H), 1/sqrt(H)); fc.weight: xavier_uniform_;
    BatchNorm1d: gamma=1, beta=0, running_mean=0, running_var=1.
    Weight matrices stored pre-transposed for (B, in) @ (in, out) matmuls."""
    H = hidden
    k = 1.0 / jnp.sqrt(jnp.float32(H))
    keys = jax.random.split(key, 10)

    def uni(kk, shape, bound):
        return jax.random.uniform(kk, shape, jnp.float32, -bound, bound)

    wih0 = uni(keys[0], (input_dim, 4 * H), k)
    whh0 = uni(keys[1], (H, 4 * H), k)
    b0 = uni(keys[2], (1, 4 * H), k) + uni(keys[3], (1, 4 * H), k)
    wih1 = uni(keys[4], (H, 4 * H), k)
    whh1 = uni(keys[5], (H, 4 * H), k)
    b1 = uni(keys[6], (1, 4 * H), k) + uni(keys[7], (1, 4 * H), k)

    xav = jnp.sqrt(6.0 / (H + output_dim))
    fcw = uni(keys[8], (H, output_dim), xav)
    fcb = uni(keys[9], (1, output_dim), k)

    return {
        "wih0": wih0, "whh0": whh0, "b0": b0,
        "wih1": wih1, "whh1": whh1, "b1": b1,
        "gamma": jnp.ones((1, H), jnp.float32),
        "beta": jnp.zeros((1, H), jnp.float32),
        "mean": jnp.zeros((1, H), jnp.float32),
        "var": jnp.ones((1, H), jnp.float32),
        "fcw": fcw, "fcb": fcb,
    }


# ----------------------------------------------------------------------------
# Pure-JAX reference (for correctness check only)
# ----------------------------------------------------------------------------
def _reference_forward(x_btd, params):
    B, T, D = x_btd.shape
    H = params["whh0"].shape[0]

    def cell(x_t, h, c, wih, whh, b):
        g = x_t @ wih + h @ whh + b
        i = jax.nn.sigmoid(g[:, 0 * H:1 * H])
        f = jax.nn.sigmoid(g[:, 1 * H:2 * H])
        gg = jnp.tanh(g[:, 2 * H:3 * H])
        o = jax.nn.sigmoid(g[:, 3 * H:4 * H])
        c = f * c + i * gg
        h = o * jnp.tanh(c)
        return h, c

    h0 = c0 = h1 = c1 = jnp.zeros((B, H), jnp.float32)
    for t in range(T):
        x_t = x_btd[:, t, :]
        h0, c0 = cell(x_t, h0, c0, params["wih0"], params["whh0"], params["b0"])
        h1, c1 = cell(h0, h1, c1, params["wih1"], params["whh1"], params["b1"])

    eps = jnp.float32(1e-5)
    bn = ((h1 - params["mean"]) * jax.lax.rsqrt(params["var"] + eps)
          * params["gamma"] + params["beta"])
    act = jnp.maximum(bn, 0.0)
    return act @ params["fcw"] + params["fcb"]


if __name__ == "__main__":
    # batch=2, seq=8, input_dim=16, lstm_output_feature_size=32,
    # num_lstm_layers=2, output_dim=4.
    B, T, D, H, O = 2, 8, 16, 32, 4

    key = jax.random.PRNGKey(0)
    k_x, k_p = jax.random.split(key)
    x = jax.random.normal(k_x, (B, T, D), jnp.float32)
    params = init_params(k_p, D, H, O)

    out = seq2seq_forward(x, params)
    jax.block_until_ready(out)
    assert out.shape == (B, O) and out.dtype == jnp.float32

    ref = _reference_forward(x, params)
    assert jnp.allclose(out, ref, rtol=2e-2, atol=2e-2), (
        "max abs err = %g" % float(jnp.max(jnp.abs(out - ref))))

    print("KERNEL_OK")
</pallas_src>

<mosaic_0001>
module attributes {stable_mosaic.version = 11 : i64} {
  func.func @kernel(%arg0: i32, %arg1: memref<4x8x512xf32, #tpu.memory_space<vmem>>, %arg2: memref<128x512xbf16, #tpu.memory_space<vmem>>, %arg3: memref<256x512xbf16, #tpu.memory_space<vmem>>, %arg4: memref<1x512xf32, #tpu.memory_space<vmem>>, %arg5: memref<1x128xf32, #tpu.memory_space<vmem>>, %arg6: memref<1x128xf32, #tpu.memory_space<vmem>>, %arg7: memref<128x128xbf16, #tpu.memory_space<vmem>>, %arg8: memref<1x128xf32, #tpu.memory_space<vmem>>, %arg9: memref<8x128xf32, #tpu.memory_space<vmem>>, %arg10: memref<8x256xbf16, #tpu.memory_space<vmem>>, %arg11: memref<8x128xf32, #tpu.memory_space<vmem>>, %arg12: memref<8x128xf32, #tpu.memory_space<vmem>>, %arg13: memref<8x128xf32, #tpu.memory_space<vmem>>) attributes {dimension_semantics = [#tpu.dimension_semantics<arbitrary>], iteration_bounds = array<i64: 2>, scalar_prefetch = 0 : i64, scratch_operands = 4 : i64, tpu.core_type = #tpu.core_type<tc>, window_params = [{transform_indices = @transform_0, window_bounds = array<i64: 4, 8, 512>}, {pipeline_mode = #tpu.pipeline_mode<synchronous>, transform_indices = @transform_1, window_bounds = array<i64: 128, 512>}, {pipeline_mode = #tpu.pipeline_mode<synchronous>, transform_indices = @transform_2, window_bounds = array<i64: 256, 512>}, {pipeline_mode = #tpu.pipeline_mode<synchronous>, transform_indices = @transform_3, window_bounds = array<i64: 1, 512>}, {pipeline_mode = #tpu.pipeline_mode<synchronous>, transform_indices = @transform_4, window_bounds = array<i64: 1, 128>}, {pipeline_mode = #tpu.pipeline_mode<synchronous>, transform_indices = @transform_5, window_bounds = array<i64: 1, 128>}, {pipeline_mode = #tpu.pipeline_mode<synchronous>, transform_indices = @transform_6, window_bounds = array<i64: 128, 128>}, {pipeline_mode = #tpu.pipeline_mode<synchronous>, transform_indices = @transform_7, window_bounds = array<i64: 1, 128>}, {pipeline_mode = #tpu.pipeline_mode<synchronous>, transform_indices = @transform_8, window_bounds = array<i64: 8, 128>}]} {
    %c0_i32 = arith.constant 0 : i32
    %0 = arith.cmpi eq, %arg0, %c0_i32 : i32
    %1 = arith.extui %0 : i1 to i32
    %c0_i32_0 = arith.constant 0 : i32
    %2 = arith.cmpi ne, %1, %c0_i32_0 : i32
    scf.if %2 {
      %cst_88 = arith.constant 0.000000e+00 : bf16
      %266 = vector.broadcast %cst_88 : bf16 to vector<8x256xbf16>
      %c0_89 = arith.constant 0 : index
      %c0_90 = arith.constant 0 : index
      %267 = vector.load %arg10[%c0_89, %c0_90] : memref<8x256xbf16, #tpu.memory_space<vmem>>, vector<8x256xbf16>
      tpu.vector_store %arg10[%c0_89, %c0_90], %266 {strides = array<i32>} : memref<8x256xbf16, #tpu.memory_space<vmem>>, vector<8x256xbf16>,
      %cst_91 = arith.constant 0.000000e+00 : f32
      %268 = vector.broadcast %cst_91 : f32 to vector<8x128xf32>
      %c0_92 = arith.constant 0 : index
      %c0_93 = arith.constant 0 : index
      %269 = vector.load %arg11[%c0_92, %c0_93] : memref<8x128xf32, #tpu.memory_space<vmem>>, vector<8x128xf32>
      tpu.vector_store %arg11[%c0_92, %c0_93], %268 {strides = array<i32>} : memref<8x128xf32, #tpu.memory_space<vmem>>, vector<8x128xf32>,
      %cst_94 = arith.constant 0.000000e+00 : f32
      %270 = vector.broadcast %cst_94 : f32 to vector<8x128xf32>
      %c0_95 = arith.constant 0 : index
      %c0_96 = arith.constant 0 : index
      %271 = vector.load %arg12[%c0_95, %c0_96] : memref<8x128xf32, #tpu.memory_space<vmem>>, vector<8x128xf32>
      tpu.vector_store %arg12[%c0_95, %c0_96], %270 {strides = array<i32>} : memref<8x128xf32, #tpu.memory_space<vmem>>, vector<8x128xf32>,
      %cst_97 = arith.constant 0.000000e+00 : f32
      %272 = vector.broadcast %cst_97 : f32 to vector<8x128xf32>
      %c0_98 = arith.constant 0 : index
      %c0_99 = arith.constant 0 : index
      %273 = vector.load %arg13[%c0_98, %c0_99] : memref<8x128xf32, #tpu.memory_space<vmem>>, vector<8x128xf32>
      tpu.vector_store %arg13[%c0_98, %c0_99], %272 {strides = array<i32>} : memref<8x128xf32, #tpu.memory_space<vmem>>, vector<8x128xf32>,
    } else {
    }
    %c0 = arith.constant 0 : index
    %c0_1 = arith.constant 0 : index
    %3 = vector.load %arg2[%c0, %c0_1] : memref<128x512xbf16, #tpu.memory_space<vmem>>, vector<128x512xbf16>
    %c0_2 = arith.constant 0 : index
    %c0_3 = arith.constant 0 : index
    %4 = vector.load %arg3[%c0_2, %c0_3] : memref<256x512xbf16, #tpu.memory_space<vmem>>, vector<256x512xbf16>
    %c0_4 = arith.constant 0 : index
    %c0_5 = arith.constant 0 : index
    %5 = vector.load %arg4[%c0_4, %c0_5] : memref<1x512xf32, #tpu.memory_space<vmem>>, vector<1x512xf32>
    %c0_6 = arith.constant 0 : index
    %c0_7 = arith.constant 0 : index
    %6 = vector.load %arg11[%c0_6, %c0_7] : memref<8x128xf32, #tpu.memory_space<vmem>>, vector<8x128xf32>
    %c0_8 = arith.constant 0 : index
    %c0_9 = arith.constant 0 : index
    %7 = vector.load %arg13[%c0_8, %c0_9] : memref<8x128xf32, #tpu.memory_space<vmem>>, vector<8x128xf32>
    %c0_10 = arith.constant 0 : index
    %c0_11 = arith.constant 0 : index
    %8 = vector.load %arg10[%c0_10, %c0_11] : memref<8x256xbf16, #tpu.memory_space<vmem>>, vector<8x128xbf16>
    %c0_12 = arith.constant 0 : index
    %c0_13 = arith.constant 0 : index
    %c0_14 = arith.constant 0 : index
    %9 = vector.load %arg1[%c0_12, %c0_13, %c0_14] : memref<4x8x512xf32, #tpu.memory_space<vmem>>, vector<1x8x512xf32>
    %10 = vector.shape_cast %9 : vector<1x8x512xf32> to vector<8x512xf32>
    %cst = arith.constant dense<0.000000e+00> : vector<8x512xf32>
    %11 = tpu.matmul %8, %3, %cst {dimension_numbers = #tpu.dot_dimension_numbers<[1], [0], [0], [1], [0, 0, 1, 1], [], []>} : vector<8x128xbf16>, vector<128x512xbf16>, vector<8x512xf32> -> vector<8x512xf32>
    %12 = arith.addf %10, %11 : vector<8x512xf32>
    %13 = vector.extract_strided_slice %12 {offsets = [0, 0], sizes = [8, 128], strides = [1, 1]} : vector<8x512xf32> to vector<8x128xf32>
    %14 = arith.negf %13 : vector<8x128xf32>
    %15 = math.exp %14 : vector<8x128xf32>
    %cst_15 = arith.constant 1.000000e+00 : f32
    %16 = vector.broadcast %cst_15 : f32 to vector<8x128xf32>
    %17 = arith.addf %16, %15 : vector<8x128xf32>
    %18 = arith.divf %16, %17 : vector<8x128xf32>
    %19 = vector.extract_strided_slice %12 {offsets = [0, 128], sizes = [8, 128], strides = [1, 1]} : vector<8x512xf32> to vector<8x128xf32>
    %20 = arith.negf %19 : vector<8x128xf32>
    %21 = math.exp %20 : vector<8x128xf32>
    %cst_16 = arith.constant 1.000000e+00 : f32
    %22 = vector.broadcast %cst_16 : f32 to vector<8x128xf32>
    %23 = arith.addf %22, %21 : vector<8x128xf32>
    %24 = arith.divf %22, %23 : vector<8x128xf32>
    %25 = vector.extract_strided_slice %12 {offsets = [0, 256], sizes = [8, 128], strides = [1, 1]} : vector<8x512xf32> to vector<8x128xf32>
    %26 = math.tanh %25 : vector<8x128xf32>
    %27 = vector.extract_strided_slice %12 {offsets = [0, 384], sizes = [8, 128], strides = [1, 1]} : vector<8x512xf32> to vector<8x128xf32>
    %28 = arith.negf %27 : vector<8x128xf32>
    %29 = math.exp %28 : vector<8x128xf32>
    %cst_17 = arith.constant 1.000000e+00 : f32
    %30 = vector.broadcast %cst_17 : f32 to vector<8x128xf32>
    %31 = arith.addf %30, %29 : vector<8x128xf32>
    %32 = arith.divf %30, %31 : vector<8x128xf32>
    %33 = arith.mulf %24, %6 : vector<8x128xf32>
    %34 = arith.mulf %18, %26 : vector<8x128xf32>
    %35 = arith.addf %33, %34 : vector<8x128xf32>
    %36 = math.tanh %35 : vector<8x128xf32>
    %37 = arith.mulf %32, %36 : vector<8x128xf32>
    %38 = arith.truncf %37 : vector<8x128xf32> to vector<8x128xbf16>
    %c0_18 = arith.constant 0 : index
    %c0_19 = arith.constant 0 : index
    %39 = vector.load %arg10[%c0_18, %c0_19] : memref<8x256xbf16, #tpu.memory_space<vmem>>, vector<8x128xbf16>
    tpu.vector_store %arg10[%c0_18, %c0_19], %38 {strides = array<i32>} : memref<8x256xbf16, #tpu.memory_space<vmem>>, vector<8x128xbf16>,
    %c0_20 = arith.constant 0 : index
    %c0_21 = arith.constant 0 : index
    %40 = vector.load %arg10[%c0_20, %c0_21] : memref<8x256xbf16, #tpu.memory_space<vmem>>, vector<8x256xbf16>
    %cst_22 = arith.constant dense<0.000000e+00> : vector<8x512xf32>
    %41 = tpu.matmul %40, %4, %cst_22 {dimension_numbers = #tpu.dot_dimension_numbers<[1], [0], [0], [1], [0, 0, 1, 1], [], []>} : vector<8x256xbf16>, vector<256x512xbf16>, vector<8x512xf32> -> vector<8x512xf32>
    %42 = vector.broadcast %5 : vector<1x512xf32> to vector<8x512xf32>
    %43 = arith.addf %41, %42 : vector<8x512xf32>
    %44 = vector.extract_strided_slice %43 {offsets = [0, 0], sizes = [8, 128], strides = [1, 1]} : vector<8x512xf32> to vector<8x128xf32>
    %45 = arith.negf %44 : vector<8x128xf32>
    %46 = math.exp %45 : vector<8x128xf32>
    %cst_23 = arith.constant 1.000000e+00 : f32
    %47 = vector.broadcast %cst_23 : f32 to vector<8x128xf32>
    %48 = arith.addf %47, %46 : vector<8x128xf32>
    %49 = arith.divf %47, %48 : vector<8x128xf32>
    %50 = vector.extract_strided_slice %43 {offsets = [0, 128], sizes = [8, 128], strides = [1, 1]} : vector<8x512xf32> to vector<8x128xf32>
    %51 = arith.negf %50 : vector<8x128xf32>
    %52 = math.exp %51 : vector<8x128xf32>
    %cst_24 = arith.constant 1.000000e+00 : f32
    %53 = vector.broadcast %cst_24 : f32 to vector<8x128xf32>
    %54 = arith.addf %53, %52 : vector<8x128xf32>
    %55 = arith.divf %53, %54 : vector<8x128xf32>
    %56 = vector.extract_strided_slice %43 {offsets = [0, 256], sizes = [8, 128], strides = [1, 1]} : vector<8x512xf32> to vector<8x128xf32>
    %57 = math.tanh %56 : vector<8x128xf32>
    %58 = vector.extract_strided_slice %43 {offsets = [0, 384], sizes = [8, 128], strides = [1, 1]} : vector<8x512xf32> to vector<8x128xf32>
    %59 = arith.negf %58 : vector<8x128xf32>
    %60 = math.exp %59 : vector<8x128xf32>
    %cst_25 = arith.constant 1.000000e+00 : f32
    %61 = vector.broadcast %cst_25 : f32 to vector<8x128xf32>
    %62 = arith.addf %61, %60 : vector<8x128xf32>
    %63 = arith.divf %61, %62 : vector<8x128xf32>
    %64 = arith.mulf %55, %7 : vector<8x128xf32>
    %65 = arith.mulf %49, %57 : vector<8x128xf32>
    %66 = arith.addf %64, %65 : vector<8x128xf32>
    %67 = math.tanh %66 : vector<8x128xf32>
    %68 = arith.mulf %63, %67 : vector<8x128xf32>
    %69 = arith.truncf %68 : vector<8x128xf32> to vector<8x128xbf16>
    %c0_26 = arith.constant 0 : index
    %c128 = arith.constant 128 : index
    %70 = vector.load %arg10[%c0_26, %c128] : memref<8x256xbf16, #tpu.memory_space<vmem>>, vector<8x128xbf16>
    tpu.vector_store %arg10[%c0_26, %c128], %69 {strides = array<i32>} : memref<8x256xbf16, #tpu.memory_space<vmem>>, vector<8x128xbf16>,
    %c0_27 = arith.constant 0 : index
    %c0_28 = arith.constant 0 : index
    %71 = vector.load %arg10[%c0_27, %c0_28] : memref<8x256xbf16, #tpu.memory_space<vmem>>, vector<8x128xbf16>
    %c1 = arith.constant 1 : index
    %c0_29 = arith.constant 0 : index
    %c0_30 = arith.constant 0 : index
    %72 = vector.load %arg1[%c1, %c0_29, %c0_30] : memref<4x8x512xf32, #tpu.memory_space<vmem>>, vector<1x8x512xf32>
    %73 = vector.shape_cast %72 : vector<1x8x512xf32> to vector<8x512xf32>
    %cst_31 = arith.constant dense<0.000000e+00> : vector<8x512xf32>
    %74 = tpu.matmul %71, %3, %cst_31 {dimension_numbers = #tpu.dot_dimension_numbers<[1], [0], [0], [1], [0, 0, 1, 1], [], []>} : vector<8x128xbf16>, vector<128x512xbf16>, vector<8x512xf32> -> vector<8x512xf32>
    %75 = arith.addf %73, %74 : vector<8x512xf32>
    %76 = vector.extract_strided_slice %75 {offsets = [0, 0], sizes = [8, 128], strides = [1, 1]} : vector<8x512xf32> to vector<8x128xf32>
    %77 = arith.negf %76 : vector<8x128xf32>
    %78 = math.exp %77 : vector<8x128xf32>
    %cst_32 = arith.constant 1.000000e+00 : f32
    %79 = vector.broadcast %cst_32 : f32 to vector<8x128xf32>
    %80 = arith.addf %79, %78 : vector<8x128xf32>
    %81 = arith.divf %79, %80 : vector<8x128xf32>
    %82 = vector.extract_strided_slice %75 {offsets = [0, 128], sizes = [8, 128], strides = [1, 1]} : vector<8x512xf32> to vector<8x128xf32>
    %83 = arith.negf %82 : vector<8x128xf32>
    %84 = math.exp %83 : vector<8x128xf32>
    %cst_33 = arith.constant 1.000000e+00 : f32
    %85 = vector.broadcast %cst_33 : f32 to vector<8x128xf32>
    %86 = arith.addf %85, %84 : vector<8x128xf32>
    %87 = arith.divf %85, %86 : vector<8x128xf32>
    %88 = vector.extract_strided_slice %75 {offsets = [0, 256], sizes = [8, 128], strides = [1, 1]} : vector<8x512xf32> to vector<8x128xf32>
    %89 = math.tanh %88 : vector<8x128xf32>
    %90 = vector.extract_strided_slice %75 {offsets = [0, 384], sizes = [8, 128], strides = [1, 1]} : vector<8x512xf32> to vector<8x128xf32>
    %91 = arith.negf %90 : vector<8x128xf32>
    %92 = math.exp %91 : vector<8x128xf32>
    %cst_34 = arith.constant 1.000000e+00 : f32
    %93 = vector.broadcast %cst_34 : f32 to vector<8x128xf32>
    %94 = arith.addf %93, %92 : vector<8x128xf32>
    %95 = arith.divf %93, %94 : vector<8x128xf32>
    %96 = arith.mulf %87, %35 : vector<8x128xf32>
    %97 = arith.mulf %81, %89 : vector<8x128xf32>
    %98 = arith.addf %96, %97 : vector<8x128xf32>
    %99 = math.tanh %98 : vector<8x128xf32>
    %100 = arith.mulf %95, %99 : vector<8x128xf32>
    %101 = arith.truncf %100 : vector<8x128xf32> to vector<8x128xbf16>
    %c0_35 = arith.constant 0 : index
    %c0_36 = arith.constant 0 : index
    %102 = vector.load %arg10[%c0_35, %c0_36] : memref<8x256xbf16, #tpu.memory_space<vmem>>, vector<8x128xbf16>
    tpu.vector_store %arg10[%c0_35, %c0_36], %101 {strides = array<i32>} : memref<8x256xbf16, #tpu.memory_space<vmem>>, vector<8x128xbf16>,
    %c0_37 = arith.constant 0 : index
    %c0_38 = arith.constant 0 : index
    %103 = vector.load %arg10[%c0_37, %c0_38] : memref<8x256xbf16, #tpu.memory_space<vmem>>, vector<8x256xbf16>
    %cst_39 = arith.constant dense<0.000000e+00> : vector<8x512xf32>
    %104 = tpu.matmul %103, %4, %cst_39 {dimension_numbers = #tpu.dot_dimension_numbers<[1], [0], [0], [1], [0, 0, 1, 1], [], []>} : vector<8x256xbf16>, vector<256x512xbf16>, vector<8x512xf32> -> vector<8x512xf32>
    %105 = vector.broadcast %5 : vector<1x512xf32> to vector<8x512xf32>
    %106 = arith.addf %104, %105 : vector<8x512xf32>
    %107 = vector.extract_strided_slice %106 {offsets = [0, 0], sizes = [8, 128], strides = [1, 1]} : vector<8x512xf32> to vector<8x128xf32>
    %108 = arith.negf %107 : vector<8x128xf32>
    %109 = math.exp %108 : vector<8x128xf32>
    %cst_40 = arith.constant 1.000000e+00 : f32
    %110 = vector.broadcast %cst_40 : f32 to vector<8x128xf32>
    %111 = arith.addf %110, %109 : vector<8x128xf32>
    %112 = arith.divf %110, %111 : vector<8x128xf32>
    %113 = vector.extract_strided_slice %106 {offsets = [0, 128], sizes = [8, 128], strides = [1, 1]} : vector<8x512xf32> to vector<8x128xf32>
    %114 = arith.negf %113 : vector<8x128xf32>
    %115 = math.exp %114 : vector<8x128xf32>
    %cst_41 = arith.constant 1.000000e+00 : f32
    %116 = vector.broadcast %cst_41 : f32 to vector<8x128xf32>
    %117 = arith.addf %116, %115 : vector<8x128xf32>
    %118 = arith.divf %116, %117 : vector<8x128xf32>
    %119 = vector.extract_strided_slice %106 {offsets = [0, 256], sizes = [8, 128], strides = [1, 1]} : vector<8x512xf32> to vector<8x128xf32>
    %120 = math.tanh %119 : vector<8x128xf32>
    %121 = vector.extract_strided_slice %106 {offsets = [0, 384], sizes = [8, 128], strides = [1, 1]} : vector<8x512xf32> to vector<8x128xf32>
    %122 = arith.negf %121 : vector<8x128xf32>
    %123 = math.exp %122 : vector<8x128xf32>
    %cst_42 = arith.constant 1.000000e+00 : f32
    %124 = vector.broadcast %cst_42 : f32 to vector<8x128xf32>
    %125 = arith.addf %124, %123 : vector<8x128xf32>
    %126 = arith.divf %124, %125 : vector<8x128xf32>
    %127 = arith.mulf %118, %66 : vector<8x128xf32>
    %128 = arith.mulf %112, %120 : vector<8x128xf32>
    %129 = arith.addf %127, %128 : vector<8x128xf32>
    %130 = math.tanh %129 : vector<8x128xf32>
    %131 = arith.mulf %126, %130 : vector<8x128xf32>
    %132 = arith.truncf %131 : vector<8x128xf32> to vector<8x128xbf16>
    %c0_43 = arith.constant 0 : index
    %c128_44 = arith.constant 128 : index
    %133 = vector.load %arg10[%c0_43, %c128_44] : memref<8x256xbf16, #tpu.memory_space<vmem>>, vector<8x128xbf16>
    tpu.vector_store %arg10[%c0_43, %c128_44], %132 {strides = array<i32>} : memref<8x256xbf16, #tpu.memory_space<vmem>>, vector<8x128xbf16>,
    %c0_45 = arith.constant 0 : index
    %c0_46 = arith.constant 0 : index
    %134 = vector.load %arg10[%c0_45, %c0_46] : memref<8x256xbf16, #tpu.memory_space<vmem>>, vector<8x128xbf16>
    %c2 = arith.constant 2 : index
    %c0_47 = arith.constant 0 : index
    %c0_48 = arith.constant 0 : index
    %135 = vector.load %arg1[%c2, %c0_47, %c0_48] : memref<4x8x512xf32, #tpu.memory_space<vmem>>, vector<1x8x512xf32>
    %136 = vector.shape_cast %135 : vector<1x8x512xf32> to vector<8x512xf32>
    %cst_49 = arith.constant dense<0.000000e+00> : vector<8x512xf32>
    %137 = tpu.matmul %134, %3, %cst_49 {dimension_numbers = #tpu.dot_dimension_numbers<[1], [0], [0], [1], [0, 0, 1, 1], [], []>} : vector<8x128xbf16>, vector<128x512xbf16>, vector<8x512xf32> -> vector<8x512xf32>
    %138 = arith.addf %136, %137 : vector<8x512xf32>
    %139 = vector.extract_strided_slice %138 {offsets = [0, 0], sizes = [8, 128], strides = [1, 1]} : vector<8x512xf32> to vector<8x128xf32>
    %140 = arith.negf %139 : vector<8x128xf32>
    %141 = math.exp %140 : vector<8x128xf32>
    %cst_50 = arith.constant 1.000000e+00 : f32
    %142 = vector.broadcast %cst_50 : f32 to vector<8x128xf32>
    %143 = arith.addf %142, %141 : vector<8x128xf32>
    %144 = arith.divf %142, %143 : vector<8x128xf32>
    %145 = vector.extract_strided_slice %138 {offsets = [0, 128], sizes = [8, 128], strides = [1, 1]} : vector<8x512xf32> to vector<8x128xf32>
    %146 = arith.negf %145 : vector<8x128xf32>
    %147 = math.exp %146 : vector<8x128xf32>
    %cst_51 = arith.constant 1.000000e+00 : f32
    %148 = vector.broadcast %cst_51 : f32 to vector<8x128xf32>
    %149 = arith.addf %148, %147 : vector<8x128xf32>
    %150 = arith.divf %148, %149 : vector<8x128xf32>
    %151 = vector.extract_strided_slice %138 {offsets = [0, 256], sizes = [8, 128], strides = [1, 1]} : vector<8x512xf32> to vector<8x128xf32>
    %152 = math.tanh %151 : vector<8x128xf32>
    %153 = vector.extract_strided_slice %138 {offsets = [0, 384], sizes = [8, 128], strides = [1, 1]} : vector<8x512xf32> to vector<8x128xf32>
    %154 = arith.negf %153 : vector<8x128xf32>
    %155 = math.exp %154 : vector<8x128xf32>
    %cst_52 = arith.constant 1.000000e+00 : f32
    %156 = vector.broadcast %cst_52 : f32 to vector<8x128xf32>
    %157 = arith.addf %156, %155 : vector<8x128xf32>
    %158 = arith.divf %156, %157 : vector<8x128xf32>
    %159 = arith.mulf %150, %98 : vector<8x128xf32>
    %160 = arith.mulf %144, %152 : vector<8x128xf32>
    %161 = arith.addf %159, %160 : vector<8x128xf32>
    %162 = math.tanh %161 : vector<8x128xf32>
    %163 = arith.mulf %158, %162 : vector<8x128xf32>
    %164 = arith.truncf %163 : vector<8x128xf32> to vector<8x128xbf16>
    %c0_53 = arith.constant 0 : index
    %c0_54 = arith.constant 0 : index
    %165 = vector.load %arg10[%c0_53, %c0_54] : memref<8x256xbf16, #tpu.memory_space<vmem>>, vector<8x128xbf16>
    tpu.vector_store %arg10[%c0_53, %c0_54], %164 {strides = array<i32>} : memref<8x256xbf16, #tpu.memory_space<vmem>>, vector<8x128xbf16>,
    %c0_55 = arith.constant 0 : index
    %c0_56 = arith.constant 0 : index
    %166 = vector.load %arg10[%c0_55, %c0_56] : memref<8x256xbf16, #tpu.memory_space<vmem>>, vector<8x256xbf16>
    %cst_57 = arith.constant dense<0.000000e+00> : vector<8x512xf32>
    %167 = tpu.matmul %166, %4, %cst_57 {dimension_numbers = #tpu.dot_dimension_numbers<[1], [0], [0], [1], [0, 0, 1, 1], [], []>} : vector<8x256xbf16>, vector<256x512xbf16>, vector<8x512xf32> -> vector<8x512xf32>
    %168 = vector.broadcast %5 : vector<1x512xf32> to vector<8x512xf32>
    %169 = arith.addf %167, %168 : vector<8x512xf32>
    %170 = vector.extract_strided_slice %169 {offsets = [0, 0], sizes = [8, 128], strides = [1, 1]} : vector<8x512xf32> to vector<8x128xf32>
    %171 = arith.negf %170 : vector<8x128xf32>
    %172 = math.exp %171 : vector<8x128xf32>
    %cst_58 = arith.constant 1.000000e+00 : f32
    %173 = vector.broadcast %cst_58 : f32 to vector<8x128xf32>
    %174 = arith.addf %173, %172 : vector<8x128xf32>
    %175 = arith.divf %173, %174 : vector<8x128xf32>
    %176 = vector.extract_strided_slice %169 {offsets = [0, 128], sizes = [8, 128], strides = [1, 1]} : vector<8x512xf32> to vector<8x128xf32>
    %177 = arith.negf %176 : vector<8x128xf32>
    %178 = math.exp %177 : vector<8x128xf32>
    %cst_59 = arith.constant 1.000000e+00 : f32
    %179 = vector.broadcast %cst_59 : f32 to vector<8x128xf32>
    %180 = arith.addf %179, %178 : vector<8x128xf32>
    %181 = arith.divf %179, %180 : vector<8x128xf32>
    %182 = vector.extract_strided_slice %169 {offsets = [0, 256], sizes = [8, 128], strides = [1, 1]} : vector<8x512xf32> to vector<8x128xf32>
    %183 = math.tanh %182 : vector<8x128xf32>
    %184 = vector.extract_strided_slice %169 {offsets = [0, 384], sizes = [8, 128], strides = [1, 1]} : vector<8x512xf32> to vector<8x128xf32>
    %185 = arith.negf %184 : vector<8x128xf32>
    %186 = math.exp %185 : vector<8x128xf32>
    %cst_60 = arith.constant 1.000000e+00 : f32
    %187 = vector.broadcast %cst_60 : f32 to vector<8x128xf32>
    %188 = arith.addf %187, %186 : vector<8x128xf32>
    %189 = arith.divf %187, %188 : vector<8x128xf32>
    %190 = arith.mulf %181, %129 : vector<8x128xf32>
    %191 = arith.mulf %175, %183 : vector<8x128xf32>
    %192 = arith.addf %190, %191 : vector<8x128xf32>
    %193 = math.tanh %192 : vector<8x128xf32>
    %194 = arith.mulf %189, %193 : vector<8x128xf32>
    %195 = arith.truncf %194 : vector<8x128xf32> to vector<8x128xbf16>
    %c0_61 = arith.constant 0 : index
    %c128_62 = arith.constant 128 : index
    %196 = vector.load %arg10[%c0_61, %c128_62] : memref<8x256xbf16, #tpu.memory_space<vmem>>, vector<8x128xbf16>
    tpu.vector_store %arg10[%c0_61, %c128_62], %195 {strides = array<i32>} : memref<8x256xbf16, #tpu.memory_space<vmem>>, vector<8x128xbf16>,
    %c0_63 = arith.constant 0 : index
    %c0_64 = arith.constant 0 : index
    %197 = vector.load %arg10[%c0_63, %c0_64] : memref<8x256xbf16, #tpu.memory_space<vmem>>, vector<8x128xbf16>
    %c3 = arith.constant 3 : index
    %c0_65 = arith.constant 0 : index
    %c0_66 = arith.constant 0 : index
    %198 = vector.load %arg1[%c3, %c0_65, %c0_66] : memref<4x8x512xf32, #tpu.memory_space<vmem>>, vector<1x8x512xf32>
    %199 = vector.shape_cast %198 : vector<1x8x512xf32> to vector<8x512xf32>
    %cst_67 = arith.constant dense<0.000000e+00> : vector<8x512xf32>
    %200 = tpu.matmul %197, %3, %cst_67 {dimension_numbers = #tpu.dot_dimension_numbers<[1], [0], [0], [1], [0, 0, 1, 1], [], []>} : vector<8x128xbf16>, vector<128x512xbf16>, vector<8x512xf32> -> vector<8x512xf32>
    %201 = arith.addf %199, %200 : vector<8x512xf32>
    %202 = vector.extract_strided_slice %201 {offsets = [0, 0], sizes = [8, 128], strides = [1, 1]} : vector<8x512xf32> to vector<8x128xf32>
    %203 = arith.negf %202 : vector<8x128xf32>
    %204 = math.exp %203 : vector<8x128xf32>
    %cst_68 = arith.constant 1.000000e+00 : f32
    %205 = vector.broadcast %cst_68 : f32 to vector<8x128xf32>
    %206 = arith.addf %205, %204 : vector<8x128xf32>
    %207 = arith.divf %205, %206 : vector<8x128xf32>
    %208 = vector.extract_strided_slice %201 {offsets = [0, 128], sizes = [8, 128], strides = [1, 1]} : vector<8x512xf32> to vector<8x128xf32>
    %209 = arith.negf %208 : vector<8x128xf32>
    %210 = math.exp %209 : vector<8x128xf32>
    %cst_69 = arith.constant 1.000000e+00 : f32
    %211 = vector.broadcast %cst_69 : f32 to vector<8x128xf32>
    %212 = arith.addf %211, %210 : vector<8x128xf32>
    %213 = arith.divf %211, %212 : vector<8x128xf32>
    %214 = vector.extract_strided_slice %201 {offsets = [0, 256], sizes = [8, 128], strides = [1, 1]} : vector<8x512xf32> to vector<8x128xf32>
    %215 = math.tanh %214 : vector<8x128xf32>
    %216 = vector.extract_strided_slice %201 {offsets = [0, 384], sizes = [8, 128], strides = [1, 1]} : vector<8x512xf32> to vector<8x128xf32>
    %217 = arith.negf %216 : vector<8x128xf32>
    %218 = math.exp %217 : vector<8x128xf32>
    %cst_70 = arith.constant 1.000000e+00 : f32
    %219 = vector.broadcast %cst_70 : f32 to vector<8x128xf32>
    %220 = arith.addf %219, %218 : vector<8x128xf32>
    %221 = arith.divf %219, %220 : vector<8x128xf32>
    %222 = arith.mulf %213, %161 : vector<8x128xf32>
    %223 = arith.mulf %207, %215 : vector<8x128xf32>
    %224 = arith.addf %222, %223 : vector<8x128xf32>
    %225 = math.tanh %224 : vector<8x128xf32>
    %226 = arith.mulf %221, %225 : vector<8x128xf32>
    %227 = arith.truncf %226 : vector<8x128xf32> to vector<8x128xbf16>
    %c0_71 = arith.constant 0 : index
    %c0_72 = arith.constant 0 : index
    %228 = vector.load %arg10[%c0_71, %c0_72] : memref<8x256xbf16, #tpu.memory_space<vmem>>, vector<8x128xbf16>
    tpu.vector_store %arg10[%c0_71, %c0_72], %227 {strides = array<i32>} : memref<8x256xbf16, #tpu.memory_space<vmem>>, vector<8x128xbf16>,
    %c0_73 = arith.constant 0 : index
    %c0_74 = arith.constant 0 : index
    %229 = vector.load %arg10[%c0_73, %c0_74] : memref<8x256xbf16, #tpu.memory_space<vmem>>, vector<8x256xbf16>
    %cst_75 = arith.constant dense<0.000000e+00> : vector<8x512xf32>
    %230 = tpu.matmul %229, %4, %cst_75 {dimension_numbers = #tpu.dot_dimension_numbers<[1], [0], [0], [1], [0, 0, 1, 1], [], []>} : vector<8x256xbf16>, vector<256x512xbf16>, vector<8x512xf32> -> vector<8x512xf32>
    %231 = vector.broadcast %5 : vector<1x512xf32> to vector<8x512xf32>
    %232 = arith.addf %230, %231 : vector<8x512xf32>
    %233 = vector.extract_strided_slice %232 {offsets = [0, 0], sizes = [8, 128], strides = [1, 1]} : vector<8x512xf32> to vector<8x128xf32>
    %234 = arith.negf %233 : vector<8x128xf32>
    %235 = math.exp %234 : vector<8x128xf32>
    %cst_76 = arith.constant 1.000000e+00 : f32
    %236 = vector.broadcast %cst_76 : f32 to vector<8x128xf32>
    %237 = arith.addf %236, %235 : vector<8x128xf32>
    %238 = arith.divf %236, %237 : vector<8x128xf32>
    %239 = vector.extract_strided_slice %232 {offsets = [0, 128], sizes = [8, 128], strides = [1, 1]} : vector<8x512xf32> to vector<8x128xf32>
    %240 = arith.negf %239 : vector<8x128xf32>
    %241 = math.exp %240 : vector<8x128xf32>
    %cst_77 = arith.constant 1.000000e+00 : f32
    %242 = vector.broadcast %cst_77 : f32 to vector<8x128xf32>
    %243 = arith.addf %242, %241 : vector<8x128xf32>
    %244 = arith.divf %242, %243 : vector<8x128xf32>
    %245 = vector.extract_strided_slice %232 {offsets = [0, 256], sizes = [8, 128], strides = [1, 1]} : vector<8x512xf32> to vector<8x128xf32>
    %246 = math.tanh %245 : vector<8x128xf32>
    %247 = vector.extract_strided_slice %232 {offsets = [0, 384], sizes = [8, 128], strides = [1, 1]} : vector<8x512xf32> to vector<8x128xf32>
    %248 = arith.negf %247 : vector<8x128xf32>
    %249 = math.exp %248 : vector<8x128xf32>
    %cst_78 = arith.constant 1.000000e+00 : f32
    %250 = vector.broadcast %cst_78 : f32 to vector<8x128xf32>
    %251 = arith.addf %250, %249 : vector<8x128xf32>
    %252 = arith.divf %250, %251 : vector<8x128xf32>
    %253 = arith.mulf %244, %192 : vector<8x128xf32>
    %254 = arith.mulf %238, %246 : vector<8x128xf32>
    %255 = arith.addf %253, %254 : vector<8x128xf32>
    %256 = math.tanh %255 : vector<8x128xf32>
    %257 = arith.mulf %252, %256 : vector<8x128xf32>
    %258 = arith.truncf %257 : vector<8x128xf32> to vector<8x128xbf16>
    %c0_79 = arith.constant 0 : index
    %c128_80 = arith.constant 128 : index
    %259 = vector.load %arg10[%c0_79, %c128_80] : memref<8x256xbf16, #tpu.memory_space<vmem>>, vector<8x128xbf16>
    tpu.vector_store %arg10[%c0_79, %c128_80], %258 {strides = array<i32>} : memref<8x256xbf16, #tpu.memory_space<vmem>>, vector<8x128xbf16>,
    %c0_81 = arith.constant 0 : index
    %c0_82 = arith.constant 0 : index
    %260 = vector.load %arg11[%c0_81, %c0_82] : memref<8x128xf32, #tpu.memory_space<vmem>>, vector<8x128xf32>
    tpu.vector_store %arg11[%c0_81, %c0_82], %224 {strides = array<i32>} : memref<8x128xf32, #tpu.memory_space<vmem>>, vector<8x128xf32>,
    %c0_83 = arith.constant 0 : index
    %c0_84 = arith.constant 0 : index
    %261 = vector.load %arg13[%c0_83, %c0_84] : memref<8x128xf32, #tpu.memory_space<vmem>>, vector<8x128xf32>
    tpu.vector_store %arg13[%c0_83, %c0_84], %255 {strides = array<i32>} : memref<8x128xf32, #tpu.memory_space<vmem>>, vector<8x128xf32>,
    %c0_85 = arith.constant 0 : index
    %c0_86 = arith.constant 0 : index
    %262 = vector.load %arg12[%c0_85, %c0_86] : memref<8x128xf32, #tpu.memory_space<vmem>>, vector<8x128xf32>
    tpu.vector_store %arg12[%c0_85, %c0_86], %257 {strides = array<i32>} : memref<8x128xf32, #tpu.memory_space<vmem>>, vector<8x128xf32>,
    %c1_i32 = arith.constant 1 : i32
    %263 = arith.cmpi eq, %arg0, %c1_i32 : i32
    %264 = arith.extui %263 : i1 to i32
    %c0_i32_87 = arith.constant 0 : i32
    %265 = arith.cmpi ne, %264, %c0_i32_87 : i32
    scf.if %265 {
      %c0_88 = arith.constant 0 : index
      %c0_89 = arith.constant 0 : index
      %266 = vector.load %arg5[%c0_88, %c0_89] : memref<1x128xf32, #tpu.memory_space<vmem>>, vector<1x128xf32>
      %267 = vector.broadcast %266 : vector<1x128xf32> to vector<8x128xf32>
      %268 = arith.mulf %257, %267 : vector<8x128xf32>
      %c0_90 = arith.constant 0 : index
      %c0_91 = arith.constant 0 : index
      %269 = vector.load %arg6[%c0_90, %c0_91] : memref<1x128xf32, #tpu.memory_space<vmem>>, vector<1x128xf32>
      %270 = vector.broadcast %269 : vector<1x128xf32> to vector<8x128xf32>
      %271 = arith.addf %268, %270 : vector<8x128xf32>
      %cst_92 = arith.constant 0.000000e+00 : f32
      %272 = vector.broadcast %cst_92 : f32 to vector<8x128xf32>
      %273 = arith.maximumf %271, %272 : vector<8x128xf32>
      %274 = arith.truncf %273 : vector<8x128xf32> to vector<8x128xbf16>
      %c0_93 = arith.constant 0 : index
      %c0_94 = arith.constant 0 : index
      %275 = vector.load %arg7[%c0_93, %c0_94] : memref<128x128xbf16, #tpu.memory_space<vmem>>, vector<128x128xbf16>
      %cst_95 = arith.constant dense<0.000000e+00> : vector<8x128xf32>
      %276 = tpu.matmul %274, %275, %cst_95 {dimension_numbers = #tpu.dot_dimension_numbers<[1], [0], [0], [1], [0, 0, 1, 1], [], []>} : vector<8x128xbf16>, vector<128x128xbf16>, vector<8x128xf32> -> vector<8x128xf32>
      %c0_96 = arith.constant 0 : index
      %c0_97 = arith.constant 0 : index
      %277 = vector.load %arg8[%c0_96, %c0_97] : memref<1x128xf32, #tpu.memory_space<vmem>>, vector<1x128xf32>
      %278 = vector.broadcast %277 : vector<1x128xf32> to vector<8x128xf32>
      %279 = arith.addf %276, %278 : vector<8x128xf32>
      %c0_98 = arith.constant 0 : index
      %c0_99 = arith.constant 0 : index
      %280 = vector.load %arg9[%c0_98, %c0_99] : memref<8x128xf32, #tpu.memory_space<vmem>>, vector<8x128xf32>
      tpu.vector_store %arg9[%c0_98, %c0_99], %279 {strides = array<i32>} : memref<8x128xf32, #tpu.memory_space<vmem>>, vector<8x128xf32>,
    } else {
    }
    return
  }
  func.func @transform_0(%arg0: i32) -> (i32, i32, i32) {
    %c0_i32 = arith.constant 0 : i32
    %c0_i32_0 = arith.constant 0 : i32
    %c0_i32_1 = arith.constant 0 : i32
    return %arg0, %c0_i32, %c0_i32_0 : i32, i32, i32
  }
  func.func @transform_1(%arg0: i32) -> (i32, i32) {
    %c0_i32 = arith.constant 0 : i32
    %c0_i32_0 = arith.constant 0 : i32
    %c0_i32_1 = arith.constant 0 : i32
    return %c0_i32, %c0_i32_0 : i32, i32
  }
  func.func @transform_2(%arg0: i32) -> (i32, i32) {
    %c0_i32 = arith.constant 0 : i32
    %c0_i32_0 = arith.constant 0 : i32
    %c0_i32_1 = arith.constant 0 : i32
    return %c0_i32, %c0_i32_0 : i32, i32
  }
  func.func @transform_3(%arg0: i32) -> (i32, i32) {
    %c0_i32 = arith.constant 0 : i32
    %c0_i32_0 = arith.constant 0 : i32
    %c0_i32_1 = arith.constant 0 : i32
    return %c0_i32, %c0_i32_0 : i32, i32
  }
  func.func @transform_4(%arg0: i32) -> (i32, i32) {
    %c0_i32 = arith.constant 0 : i32
    %c0_i32_0 = arith.constant 0 : i32
    %c0_i32_1 = arith.constant 0 : i32
    return %c0_i32, %c0_i32_0 : i32, i32
  }
  func.func @transform_5(%arg0: i32) -> (i32, i32) {
    %c0_i32 = arith.constant 0 : i32
    %c0_i32_0 = arith.constant 0 : i32
    %c0_i32_1 = arith.constant 0 : i32
    return %c0_i32, %c0_i32_0 : i32, i32
  }
  func.func @transform_6(%arg0: i32) -> (i32, i32) {
    %c0_i32 = arith.constant 0 : i32
    %c0_i32_0 = arith.constant 0 : i32
    %c0_i32_1 = arith.constant 0 : i32
    return %c0_i32, %c0_i32_0 : i32, i32
  }
  func.func @transform_7(%arg0: i32) -> (i32, i32) {
    %c0_i32 = arith.constant 0 : i32
    %c0_i32_0 = arith.constant 0 : i32
    %c0_i32_1 = arith.constant 0 : i32
    return %c0_i32, %c0_i32_0 : i32, i32
  }
  func.func @transform_8(%arg0: i32) -> (i32, i32) {
    %c0_i32 = arith.constant 0 : i32
    %c0_i32_0 = arith.constant 0 : i32
    %c0_i32_1 = arith.constant 0 : i32
    return %c0_i32, %c0_i32_0 : i32, i32
  }
}

</mosaic_0001>

<bundles_post_ra>
// kernel: tpu_custom_call.1
= control target key start
LH: loop header
LB: loop body
LE: loop exit
PB: predicated region body
PF: predicated region fallthrough
CT: control target
= control target key end

     0   :  { %13 = vsyncpa [#allocation7], 0  ;;  %s4320_s0 = inlined_call_operand.hbm [shape: f32[8,8,512], index: 0, kind: input, shape index: {}]   ;;  %s4321_s1 = inlined_call_operand.hbm [shape: bf16[128,512], index: 1, kind: input, shape index: {}]   ;;  %s4322_s2 = inlined_call_operand.hbm [shape: bf16[256,512], index: 2, kind: input, shape index: {}]   ;;  %s4323_s3 = inlined_call_operand.hbm [shape: f32[1,512], index: 3, kind: input, shape index: {}]   ;;  %s4324_s4 = inlined_call_operand.vmem [shape: f32[1,128], index: 4, kind: input, shape index: {}]   ;;  %s4325_s5 = inlined_call_operand.vmem [shape: f32[1,128], index: 5, kind: input, shape index: {}]   ;;  %s4326_s6 = inlined_call_operand.hbm [shape: bf16[128,128], index: 6, kind: input, shape index: {}]   ;;  %s4327_s7 = inlined_call_operand.vmem [shape: f32[1,128], index: 7, kind: input, shape index: {}]   ;;  %s4328_s8 = inlined_call_operand.hbm [shape: f32[8,128], index: 8, kind: output, shape index: {}]  }
   0x1   :  { %15 = vsyncpa [#allocation7 + $0x1], 0 }
   0x2   :  { %16 = vsyncpa [#allocation10], 0 }
   0x3   :  { %17 = vsyncpa [#allocation13], 0 }
   0x4   :  { %18 = vsyncpa [#allocation8], 0  ;;  %s3481_s27 = smov 0   ;;  %s3483_s28 = smov 0  }
   0x5   :  { %s3485_s29 = smov 0   ;;  %s3487_s30 = smov 0  }
   0x6 LB: > { %s3500_s9 = sadd.s32 4294967295, %s3421_s30   ;;  %p44_p0 = scmp.ne.s32.totalorder %s3413_s28, %s3409_s27  ;;  %s3421_s30 = sphi %s3487_s30, %s4723_s30   ;;  %s3417_s29 = sphi %s3485_s29, %s4722_s29   ;;  %s3413_s28 = sphi %s3483_s28, %s4721_s28   ;;  %s3409_s27 = sphi %s3481_s27, %s4720_s27  }
   0x7   : > { %p45_p1 = scmp.eq.s32.totalorder %s3500_s9, 0  ;;  %p2391_p2 = scmp.ge.s32.totalorder %s3421_s30, 1 }
   0x8   : > { %p223_p3 = scmp.lt.s32.totalorder %s3421_s30, 3  ;;  %p2392_p4 = scmp.ne.s32.totalorder %s3500_s9, 0 }
   0x9   : > { %p3509_p5 = por %p45_p1, %p44_p0  ;;  %s234_s13 = sshll.u32 %s4321_s1, 4  ;;  %s235_s13 = int_to_ptr.hbm [resolvable:$true] %s234_s13 }
   0xa   : > { %p3516_p6 = pnand %p2391_p2, %p223_p3  ;;  %s3423_s15 = smov [#allocation9]  }
   0xb   : > { %s236_s16 = sshll.u32 %s3423_s15, 4  ;;  %s263_s20 = sshll.u32 %s4323_s3, 4  ;;  %s237_s16 = int_to_ptr.vmem [resolvable:$true] %s236_s16  ;;  %s264_s20 = int_to_ptr.hbm [resolvable:$true] %s263_s20 }
   0xc   : > { %p2993_p7 = pneg %p3516_p6  ;;  %s3424_s21 = smov 256  }
   0xd   : > { %s3425_s22 = smov 16   ;;  %s3426_s23 = smov [#allocation12]  }
   0xe   : > { %p3524_p8 = pnand %p2993_p7, %p45_p1  ;;  %s265_s24 = sshll.u32 %s3426_s23, 4  ;;  %s266_s24 = int_to_ptr.vmem [resolvable:$true] %s265_s24 }
   0xf   : > { %s248_s27 = sshll.u32 %s4322_s2, 4  ;;  %s280_s15 = sshll.u32 %s4326_s6, 4  ;;  %s249_s27 = int_to_ptr.hbm [resolvable:$true] %s248_s27  ;;  %s281_s15 = int_to_ptr.hbm [resolvable:$true] %s280_s15 }
  0x10   : > { %2996 = dma.hbm_to_vmem [thread:$0]  (!%p3524_p8), %s235_s13, 4096, %s237_s16, [#allocation10], %s3424_s21, %s3424_s21, %s3425_s22  }
  0x11   : > { %3002 = dma.hbm_to_vmem [thread:$0]  (!%p3524_p8), %s264_s20, 64, %s266_s24, [#allocation13]  }
  0x12   : > { %s3427_s13 = smov [#allocation11]   ;;  %s3428_s18 = smov [#allocation14]  }
  0x13   : > { %s250_s16 = sshll.u32 %s3427_s13, 4  ;;  %s282_s19 = sshll.u32 %s3428_s18, 4  ;;  %s251_s16 = int_to_ptr.vmem [resolvable:$true] %s250_s16  ;;  %s283_s19 = int_to_ptr.vmem [resolvable:$true] %s282_s19 }
  0x14   : > { %2999 = dma.hbm_to_vmem [thread:$0]  (!%p3524_p8), %s249_s27, 8192, %s251_s16, [#allocation10], %s3424_s21, %s3424_s21, %s3425_s22  }
  0x15   : > { %s3429_s20 = smov 64   ;;  %s3430_s23 = smov 4  }
  0x16   : > { %3005 = dma.hbm_to_vmem [thread:$0]  (!%p3524_p8), %s281_s15, 1024, %s283_s19, [#allocation13], %s3429_s20, %s3429_s20, %s3430_s23  }
  0x17   : > { %s3546_s24 = sadd.s32 1, %s3421_s30   ;;  %s31_s26 = sadd.s32 1, %s3417_s29 }
  0x18   : > { %s28_s25 = ssub.s32 %s3421_s30, %s3546_s24  ;;  %p38_p10 = scmp.ne.s32.totalorder %s3417_s29, %s3413_s28 }
  0x19   : > { %p29_p9 = scmp.eq.s32.totalorder %s28_s25, 0  ;;  %p39_p11 = scmp.eq.s32.totalorder %s3421_s30, 0 }
  0x1a   : > { %p3014_p13 = scmp.lt.s32.totalorder %s3421_s30, 2  ;;  %s299_s21 = sand.u32 1, %s3417_s29  }
  0x1b   : > { %s3555_s11 = scalar_select %p29_p9, %s3417_s29, %s31_s26  }
  0x1c   : > { %p40_p12 = por %p39_p11, %p38_p10  ;;  %s2866_s22 = sshll.u32 %s3421_s30, 7 }
  0x1d   : > { %s2397_s27 = sshll.u32 %s299_s21, 7  ;;  %s309_s17 = scalar_lea.hbm %s4320_s0, %s2866_s22 }
  0x1e   : > { %s310_s15 = sshll.u32 %s309_s17, 4  ;;  %s303_s16 = scalar_lea.vmem [#allocation6], %s2397_s27  ;;  %s311_s15 = int_to_ptr.hbm [resolvable:$true] %s310_s15 }
  0x1f   : > { %s312_s18 = sshll.u32 %s303_s16, 4  ;;  %p3563_p0 = pnand %p3014_p13, %p40_p12  ;;  %s313_s18 = int_to_ptr.vmem [resolvable:$true] %s312_s18 }
  0x20   : > { %s300_s20 = scalar_lea.sflag [#allocation7], %s299_s21  ;;  %s3317_s23 = sshra.s32 %s311_s15, 4  ;;  %s3318_s23 = int_to_ptr.hbm [resolvable:$true] %s3317_s23 }
  0x21   : > { %s3319_s25 = scalar_lea.hbm %s3318_s23, 128  ;;  %p3321_p3 = pneg %p3563_p0 }
  0x22   : > { %p3320_p2 = scmp.ne.s32.totalorder %s3318_s23, %s3319_s25  ;;  %s3324_s22 = scalar_lea.hbm %s4320_s0, 256 }
  0x23   : > { %p3325_p9 = scmp.lt.s32.totalorder %s3318_s23, %s4320_s0  ;;  %p3326_p10 = scmp.lt.s32.totalorder %s3324_s22, %s3319_s25 }
  0x24   : > { %p3322_p7 = pnand %p3321_p3, %p3320_p2 }
  0x25   : > { %p3327_p11 = por %p3326_p10, %p3325_p9 }
  0x26   : > { %p3323_p8 = pneg %p3322_p7 }
  0x28   : > { %p3328_p12 = pnand %p3327_p11, %p3323_p8 }
  0x2a   : > { %3331 = shalt.err (!%p3328_p12)
}
  0x2b   : > { %s3431_s21 = smov 512   ;;  %s3432_s13 = smov 32  }
  0x2c   : > { %3009 = dma.hbm_to_vmem [thread:$0]  (!%p3563_p0), %s311_s15, 2048, %s313_s18, %s300_s20, %s3431_s21, %s3431_s21, %s3432_s13  }
  0x2d   : > { %324 = sbr.rel (%p3516_p6) target bundleno = 1296 (0x510), region = 52 }
  0x32   : > { %s326_s17 = sand.u32 1, %s3413_s28  }
  0x33   : > { %s2402_s16 = sshll.u32 %s326_s17, 7  ;;  %s327_s30 = scalar_lea.sflag [#allocation7], %s326_s17 }
  0x34   : > { %s3580_s26 = scalar_lea.vmem [#allocation6], %s2402_s16 }
  0x35   : > { %3392 = dma.done.wait (%p3509_p5), %s327_s30, 2048  }
  0x36   : > { %3394 = vsyncadd (%p3509_p5), %s327_s30, 4294965248 }
  0x37   : > { %3396 = dma.done.wait (%p45_p1), [#allocation10], 12288  }
  0x38   : > { %3398 = vsyncadd (%p45_p1), [#allocation10], 4294955008 }
  0x39   : > { %3400 = dma.done.wait (%p45_p1), [#allocation13], 1088  }
  0x3a   : > { %3402 = vsyncadd (%p45_p1), [#allocation13], 4294966208  ;;  %384 = sbr.rel (%p2392_p4) target bundleno = 67 (0x43), region = 76 }
  0x3f   : > { %v3433_v0 = vmov 0   ;;  %v3434_v1 = vmov 0.0  }
  0x40   : > { %385 = vst [vmem:[#allocation2] sm:$0xff] %v3433_v0 }
  0x41   : > { %386 = vst [vmem:[#allocation3] sm:$0xff] %v3434_v1 }
  0x42   : > { %388 = vst [vmem:[#allocation5] sm:$0xff] %v3434_v1 }
  0x43 PF: > { %v2522_v2 = vld [vmem:[#allocation9 + $0xe0] sm:$0xf]  ;;  %v2897_v3 = vld [vmem:[#allocation9 + $0xec] sm:$0xf0]  ;;  %v2895_v4 = vld [vmem:[#allocation9 + $0xe4] sm:$0xf] }
  0x44   : > { %v3596_v5 = vor.u32 %v2897_v3, %v2522_v2  ;;  %v2524_v6 = vld [vmem:[#allocation9 + $0xf0] sm:$0xf0]  ;;  %v2896_v7 = vld [vmem:[#allocation9 + $0xec] sm:$0xf]  ;;  %v2532_v8 = vld [vmem:[#allocation9 + $0xf8] sm:$0xf0] }
  0x45   : > { %v3598_v9 = vor.u32 %v2895_v4, %v2524_v6  ;;  %v3600_v10 = vor.u32 %v2896_v7, %v2532_v8  ;;  %v2506_v11 = vld [vmem:[#allocation9 + $0xc0] sm:$0xf]  ;;  %v2893_v12 = vld [vmem:[#allocation9 + $0xcc] sm:$0xf0]  ;;  %v2891_v13 = vld [vmem:[#allocation9 + $0xc4] sm:$0xf] }
  0x46   : > { %653 = vmatpush.bf16.msra.mxu0 %v3596_v5  ;;  %v3603_v14 = vor.u32 %v2893_v12, %v2506_v11  ;;  %v2508_v15 = vld [vmem:[#allocation9 + $0xd0] sm:$0xf0]  ;;  %v2892_v16 = vld [vmem:[#allocation9 + $0xcc] sm:$0xf]  ;;  %v2516_v17 = vld [vmem:[#allocation9 + $0xd8] sm:$0xf0] }
  0x47   : > { %666 = vmatpush.bf16.msra.mxu1 %v3598_v9  ;;  %692 = vmatpush.bf16.msra.mxu3 %v3600_v10  ;;  %v3607_v18 = vor.u32 %v2891_v13, %v2508_v15  ;;  %v3609_v19 = vor.u32 %v2892_v16, %v2516_v17  ;;  %v2530_v20 = vld [vmem:[#allocation9 + $0xe8] sm:$0xf]  ;;  %v2898_v21 = vld [vmem:[#allocation9 + $0xf4] sm:$0xf0]  ;;  %v2490_v22 = vld [vmem:[#allocation9 + $0xa0] sm:$0xf] }
  0x48   : > { %v3611_v23 = vor.u32 %v2898_v21, %v2530_v20  ;;  %v2889_v24 = vld [vmem:[#allocation9 + $0xac] sm:$0xf0]  ;;  %v2887_v25 = vld [vmem:[#allocation9 + $0xa4] sm:$0xf]  ;;  %v2492_v26 = vld [vmem:[#allocation9 + $0xb0] sm:$0xf0] }
  0x49   : > { %v2888_v27 = vld [vmem:[#allocation9 + $0xac] sm:$0xf]  ;;  %v2500_v28 = vld [vmem:[#allocation9 + $0xb8] sm:$0xf0]  ;;  %v2514_v29 = vld [vmem:[#allocation9 + $0xc8] sm:$0xf]  ;;  %v3615_v30 = vor.u32 %v2889_v24, %v2490_v22  ;;  %v3619_v34 = vor.u32 %v2887_v25, %v2492_v26 }
  0x4a   : > { %654 = vmatpush.bf16.msra.mxu0 %v3603_v14  ;;  %679 = vmatpush.bf16.msra.mxu2 %v3611_v23  ;;  %v2894_v31 = vld [vmem:[#allocation9 + $0xd4] sm:$0xf0]  ;;  %v2474_v32 = vld [vmem:[#allocation9 + $0x80] sm:$0xf]  ;;  %v2885_v33 = vld [vmem:[#allocation9 + $0x8c] sm:$0xf0]  ;;  %v3621_v35 = vor.u32 %v2888_v27, %v2500_v28 }
  0x4b   : > { %667 = vmatpush.bf16.msra.mxu1 %v3607_v18  ;;  %693 = vmatpush.bf16.msra.mxu3 %v3609_v19  ;;  %v3623_v36 = vor.u32 %v2894_v31, %v2514_v29  ;;  %v2883_v37 = vld [vmem:[#allocation9 + $0x84] sm:$0xf]  ;;  %v2476_v38 = vld [vmem:[#allocation9 + $0x90] sm:$0xf0]  ;;  %v2884_v39 = vld [vmem:[#allocation9 + $0x8c] sm:$0xf]  ;;  %v3627_v43 = vor.u32 %v2885_v33, %v2474_v32 }
  0x4c   : > { %v2484_v40 = vld [vmem:[#allocation9 + $0x98] sm:$0xf0]  ;;  %v2498_v41 = vld [vmem:[#allocation9 + $0xa8] sm:$0xf]  ;;  %v2890_v42 = vld [vmem:[#allocation9 + $0xb4] sm:$0xf0]  ;;  %v3633_v47 = vor.u32 %v2883_v37, %v2476_v38 }
  0x4d   : > { %v3629_v44 = vor.u32 %v2890_v42, %v2498_v41  ;;  %v2458_v45 = vld [vmem:[#allocation9 + $0x60] sm:$0xf]  ;;  %v2881_v46 = vld [vmem:[#allocation9 + $0x6c] sm:$0xf0]  ;;  %v3635_v48 = vor.u32 %v2884_v39, %v2484_v40  ;;  %v2879_v49 = vld [vmem:[#allocation9 + $0x64] sm:$0xf] }
  0x4e   : > { %655 = vmatpush.bf16.msra.mxu0 %v3615_v30  ;;  %680 = vmatpush.bf16.msra.mxu2 %v3623_v36  ;;  %v2482_v50 = vld [vmem:[#allocation9 + $0x88] sm:$0xf]  ;;  %v2886_v51 = vld [vmem:[#allocation9 + $0x94] sm:$0xf0]  ;;  %v2460_v52 = vld [vmem:[#allocation9 + $0x70] sm:$0xf0]  ;;  %v3639_v55 = vor.u32 %v2881_v46, %v2458_v45 }
  0x4f   : > { %668 = vmatpush.bf16.msra.mxu1 %v3619_v34  ;;  %694 = vmatpush.bf16.msra.mxu3 %v3621_v35  ;;  %v2880_v53 = vld [vmem:[#allocation9 + $0x6c] sm:$0xf]  ;;  %v2468_v54 = vld [vmem:[#allocation9 + $0x78] sm:$0xf0]  ;;  %v3641_v56 = vor.u32 %v2886_v51, %v2482_v50  ;;  %v2442_v57 = vld [vmem:[#allocation9 + $0x40] sm:$0xf]  ;;  %v3645_v59 = vor.u32 %v2879_v49, %v2460_v52 }
  0x50   : > { %v2877_v58 = vld [vmem:[#allocation9 + $0x4c] sm:$0xf0]  ;;  %v3647_v60 = vor.u32 %v2880_v53, %v2468_v54  ;;  %v2875_v61 = vld [vmem:[#allocation9 + $0x44] sm:$0xf]  ;;  %v2466_v62 = vld [vmem:[#allocation9 + $0x68] sm:$0xf] }
  0x51   : > { %v2882_v63 = vld [vmem:[#allocation9 + $0x74] sm:$0xf0]  ;;  %v2444_v0 = vld [vmem:[#allocation9 + $0x50] sm:$0xf0]  ;;  %v2876_v1 = vld [vmem:[#allocation9 + $0x4c] sm:$0xf]  ;;  %v3651_v3 = vor.u32 %v2877_v58, %v2442_v57 }
  0x52   : > { %656 = vmatpush.bf16.msra.mxu0 %v3627_v43  ;;  %681 = vmatpush.bf16.msra.mxu2 %v3629_v44  ;;  %v2452_v2 = vld [vmem:[#allocation9 + $0x58] sm:$0xf0]  ;;  %v3653_v4 = vor.u32 %v2882_v63, %v2466_v62  ;;  %v2426_v6 = vld [vmem:[#allocation9 + $0x20] sm:$0xf]  ;;  %v2873_v7 = vld [vmem:[#allocation9 + $0x2c] sm:$0xf0]  ;;  %v3657_v8 = vor.u32 %v2875_v61, %v2444_v0 }
  0x53   : > { %669 = vmatpush.bf16.msra.mxu1 %v3633_v47  ;;  %695 = vmatpush.bf16.msra.mxu3 %v3635_v48  ;;  %v3659_v11 = vor.u32 %v2876_v1, %v2452_v2  ;;  %v2871_v12 = vld [vmem:[#allocation9 + $0x24] sm:$0xf]  ;;  %v2450_v13 = vld [vmem:[#allocation9 + $0x48] sm:$0xf]  ;;  %v2878_v15 = vld [vmem:[#allocation9 + $0x54] sm:$0xf0]  ;;  %v3663_v21 = vor.u32 %v2873_v7, %v2426_v6 }
  0x54   : > { %v2428_v16 = vld [vmem:[#allocation9 + $0x30] sm:$0xf0]  ;;  %v2872_v17 = vld [vmem:[#allocation9 + $0x2c] sm:$0xf]  ;;  %v2436_v20 = vld [vmem:[#allocation9 + $0x38] sm:$0xf0]  ;;  %v3665_v22 = vor.u32 %v2878_v15, %v2450_v13 }
  0x55   : > { %v2410_v24 = vld [vmem:[#allocation9] sm:$0xf]  ;;  %v2869_v25 = vld [vmem:[#allocation9 + $0xc] sm:$0xf0]  ;;  %v3669_v26 = vor.u32 %v2871_v12, %v2428_v16  ;;  %v3671_v27 = vor.u32 %v2872_v17, %v2436_v20  ;;  %v2867_v28 = vld [vmem:[#allocation9 + $0x4] sm:$0xf] }
  0x56   : > { %657 = vmatpush.bf16.msra.mxu0 %v3639_v55  ;;  %682 = vmatpush.bf16.msra.mxu2 %v3641_v56  ;;  %v2434_v29 = vld [vmem:[#allocation9 + $0x28] sm:$0xf]  ;;  %v2874_v31 = vld [vmem:[#allocation9 + $0x34] sm:$0xf0]  ;;  %v2412_v32 = vld [vmem:[#allocation9 + $0x10] sm:$0xf0]  ;;  %v3675_v38 = vor.u32 %v2869_v25, %v2410_v24 }
  0x57   : > { %670 = vmatpush.bf16.msra.mxu1 %v3645_v59  ;;  %696 = vmatpush.bf16.msra.mxu3 %v3647_v60  ;;  %v2868_v33 = vld [vmem:[#allocation9 + $0xc] sm:$0xf]  ;;  %v2420_v37 = vld [vmem:[#allocation9 + $0x18] sm:$0xf0]  ;;  %v3677_v39 = vor.u32 %v2874_v31, %v2434_v29  ;;  %v3681_v40 = vor.u32 %v2867_v28, %v2412_v32  ;;  %v2418_v42 = vld [vmem:[#allocation9 + $0x8] sm:$0xf] }
  0x58   : > { %v3683_v41 = vor.u32 %v2868_v33, %v2420_v37  ;;  %v2870_v45 = vld [vmem:[#allocation9 + $0x14] sm:$0xf0]  ;;  %v488_v46 = vld [vmem:[#allocation2] sm:$0xf]  ;;  %v2653_v50 = vld [vmem:[#allocation11 + $0xe0] sm:$0xf] }
  0x59   : > { %v3689_v49 = vor.u32 %v2870_v45, %v2418_v42  ;;  %v2929_v51 = vld [vmem:[#allocation11 + $0xec] sm:$0xf0]  ;;  %v2781_v52 = vld [vmem:[#allocation11 + $0x1e0] sm:$0xf]  ;;  %v2927_v57 = vld [vmem:[#allocation11 + $0xe4] sm:$0xf] }
  0x5a   : > { %658 = vmatpush.bf16.msra.mxu0 %v3651_v3  ;;  %683 = vmatpush.bf16.msra.mxu2 %v3653_v4  ;;  %v3692_v53 = vor.u32 %v2929_v51, %v2653_v50  ;;  %v2961_v54 = vld [vmem:[#allocation11 + $0x1ec] sm:$0xf0]  ;;  %v2655_v58 = vld [vmem:[#allocation11 + $0xf0] sm:$0xf0]  ;;  %v2959_v63 = vld [vmem:[#allocation11 + $0x1e4] sm:$0xf] }
  0x5b   : > { %671 = vmatpush.bf16.msra.mxu1 %v3657_v8  ;;  %697 = vmatpush.bf16.msra.mxu3 %v3659_v11  ;;  %v3694_v61 = vor.u32 %v2961_v54, %v2781_v52  ;;  %v3696_v62 = vor.u32 %v2927_v57, %v2655_v58  ;;  %v2783_v0 = vld [vmem:[#allocation11 + $0x1f0] sm:$0xf0]  ;;  %v2637_v2 = vld [vmem:[#allocation11 + $0xc0] sm:$0xf]  ;;  %v2925_v6 = vld [vmem:[#allocation11 + $0xcc] sm:$0xf0] }
  0x5c   : > { %v3699_v1 = vor.u32 %v2959_v63, %v2783_v0  ;;  %v2765_v7 = vld [vmem:[#allocation11 + $0x1c0] sm:$0xf]  ;;  %v3704_v12 = vor.u32 %v2925_v6, %v2637_v2  ;;  %v2957_v13 = vld [vmem:[#allocation11 + $0x1cc] sm:$0xf0]  ;;  %v2923_v15 = vld [vmem:[#allocation11 + $0xc4] sm:$0xf] }
  0x5d   : > { %4465 = vst [vmem:[#allocation20_spill] sm:$0xff] %v3696_v62  ;;  %v2639_v16 = vld [vmem:[#allocation11 + $0xd0] sm:$0xf0]  ;;  %v3706_v17 = vor.u32 %v2957_v13, %v2765_v7  ;;  %v2955_v24 = vld [vmem:[#allocation11 + $0x1c4] sm:$0xf]  ;;  %p2828_p1 = scmp.ne.s32.totalorder %s3500_s9, 1 }
  0x5e   : > { %659 = vmatpush.bf16.msra.mxu0 %v3663_v21  ;;  %684 = vmatpush.bf16.msra.mxu2 %v3665_v22  ;;  %4466 = vst [vmem:[#allocation21_spill] sm:$0xff] %v3699_v1  ;;  %v3708_v20 = vor.u32 %v2923_v15, %v2639_v16  ;;  %v2767_v25 = vld [vmem:[#allocation11 + $0x1d0] sm:$0xf0]  ;;  %v2621_v29 = vld [vmem:[#allocation11 + $0xa0] sm:$0xf] }
  0x5f   : > { %672 = vmatpush.bf16.msra.mxu1 %v3669_v26  ;;  %698 = vmatpush.bf16.msra.mxu3 %v3671_v27  ;;  %4467 = vst [vmem:[#allocation22_spill] sm:$0xff] %v3704_v12  ;;  %v3711_v28 = vor.u32 %v2955_v24, %v2767_v25  ;;  %v2921_v31 = vld [vmem:[#allocation11 + $0xac] sm:$0xf0]  ;;  %v2749_v33 = vld [vmem:[#allocation11 + $0x1a0] sm:$0xf] }
  0x60   : > { %4468 = vst [vmem:[#allocation23_spill] sm:$0xff] %v3706_v17  ;;  %v3716_v32 = vor.u32 %v2921_v31, %v2621_v29  ;;  %v2953_v37 = vld [vmem:[#allocation11 + $0x1ac] sm:$0xf0]  ;;  %v2919_v42 = vld [vmem:[#allocation11 + $0xa4] sm:$0xf] }
  0x61   : > { %4469 = vst [vmem:[#allocation24_spill] sm:$0xff] %v3708_v20  ;;  %v3718_v45 = vor.u32 %v2953_v37, %v2749_v33  ;;  %v2951_v50 = vld [vmem:[#allocation11 + $0x1a4] sm:$0xf]  ;;  %v2751_v51 = vld [vmem:[#allocation11 + $0x1b0] sm:$0xf0] }
  0x62   : > { %660 = vmatpush.bf16.msra.mxu0 %v3675_v38  ;;  %685 = vmatpush.bf16.msra.mxu2 %v3677_v39  ;;  %4470 = vst [vmem:[#allocation25_spill] sm:$0xff] %v3711_v28  ;;  %v3723_v54 = vor.u32 %v2951_v50, %v2751_v51  ;;  %v2605_v57 = vld [vmem:[#allocation11 + $0x80] sm:$0xf]  ;;  %v2917_v58 = vld [vmem:[#allocation11 + $0x8c] sm:$0xf0] }
  0x63   : > { %673 = vmatpush.bf16.msra.mxu1 %v3681_v40  ;;  %699 = vmatpush.bf16.msra.mxu3 %v3683_v41  ;;  %4471 = vst [vmem:[#allocation26_spill] sm:$0xff] %v3716_v32  ;;  %v2733_v63 = vld [vmem:[#allocation11 + $0x180] sm:$0xf]  ;;  %v3728_v0 = vor.u32 %v2917_v58, %v2605_v57  ;;  %v2949_v2 = vld [vmem:[#allocation11 + $0x18c] sm:$0xf0] }
  0x64   : > { %4472 = vst [vmem:[#allocation27_spill] sm:$0xff] %v3718_v45  ;;  %v2915_v6 = vld [vmem:[#allocation11 + $0x84] sm:$0xf]  ;;  %v2607_v7 = vld [vmem:[#allocation11 + $0x90] sm:$0xf0]  ;;  %v3730_v13 = vor.u32 %v2949_v2, %v2733_v63 }
  0x65   : > { %661 = vmatmul.bf16.vlgmr.msra.gmra.mxu0 %v488_v46  ;;  %4474 = vst [vmem:[#allocation29_spill] sm:$0xff] %v3723_v54  ;;  %v3732_v15 = vor.u32 %v2915_v6, %v2607_v7  ;;  %v2947_v16 = vld [vmem:[#allocation11 + $0x184] sm:$0xf]  ;;  %v2735_v24 = vld [vmem:[#allocation11 + $0x190] sm:$0xf0] }
  0x66   : > { %674 = vmatmul.bf16.vlgmr.msra.gmra.mxu1 %v488_v46  ;;  %700 = vmatmul.bf16.vlgmr.msra.gmra.mxu3 %v488_v46  ;;  %4475 = vst [vmem:[#allocation30_spill] sm:$0xff] %v3728_v0  ;;  %v3735_v25 = vor.u32 %v2947_v16, %v2735_v24  ;;  %v2589_v29 = vld [vmem:[#allocation11 + $0x60] sm:$0xf]  ;;  %v2913_v31 = vld [vmem:[#allocation11 + $0x6c] sm:$0xf0] }
  0x67   : > { %686 = vmatpush.bf16.msra.mxu2 %v3689_v49  ;;  %1111 = vmatpush.bf16.msrb.mxu0 %v3692_v53  ;;  %4476 = vst [vmem:[#allocation31_spill] sm:$0xff] %v3730_v13  ;;  %v2717_v33 = vld [vmem:[#allocation11 + $0x160] sm:$0xf]  ;;  %v3740_v37 = vor.u32 %v2913_v31, %v2589_v29  ;;  %v2591_v50 = vld [vmem:[#allocation11 + $0x70] sm:$0xf0] }
  0x68   : > { %1124 = vmatpush.bf16.msrb.mxu1 %v3694_v61  ;;  %1150 = vmatpush.bf16.msrb.mxu3 %v3699_v1  ;;  %4477 = vst [vmem:[#allocation32_spill] sm:$0xff] %v3732_v15  ;;  %v2943_v58 = vld [vmem:[#allocation11 + $0x164] sm:$0xf]  ;;  %v2719_v63 = vld [vmem:[#allocation11 + $0x170] sm:$0xf0] }
  0x69   : > { %4478 = vst [vmem:[#allocation33_spill] sm:$0xff] %v3735_v25  ;;  %v3747_v2 = vor.u32 %v2943_v58, %v2719_v63  ;;  %v2573_v6 = vld [vmem:[#allocation11 + $0x40] sm:$0xf]  ;;  %v2909_v7 = vld [vmem:[#allocation11 + $0x4c] sm:$0xf0] }
  0x6a   : > { %687 = vmatmul.bf16.vlgmr.msra.gmra.mxu2 %v488_v46  ;;  %v2623_v46 = vld [vmem:[#allocation11 + $0xb0] sm:$0xf0]  ;;  %4479 = vst [vmem:[#allocation34_spill] sm:$0xff] %v3740_v37  ;;  %v2701_v16 = vld [vmem:[#allocation11 + $0x140] sm:$0xf]  ;;  %v3752_v24 = vor.u32 %v2909_v7, %v2573_v6 }
  0x6b   : > { %1137 = vmatpush.bf16.msrb.mxu2 %v3696_v62  ;;  %1112 = vmatpush.bf16.msrb.mxu0 %v3704_v12  ;;  %v3721_v52 = vor.u32 %v2919_v42, %v2623_v46  ;;  %v2945_v42 = vld [vmem:[#allocation11 + $0x16c] sm:$0xf0]  ;;  %v2911_v46 = vld [vmem:[#allocation11 + $0x64] sm:$0xf]  ;;  %4482 = vst [vmem:[#allocation37_spill] sm:$0xff] %v3747_v2 }
  0x6c   : > { %1125 = vmatpush.bf16.msrb.mxu1 %v3706_v17  ;;  %1151 = vmatpush.bf16.msrb.mxu3 %v3711_v28  ;;  %v3742_v51 = vor.u32 %v2945_v42, %v2717_v33  ;;  %v3744_v57 = vor.u32 %v2911_v46, %v2591_v50  ;;  %4483 = vst [vmem:[#allocation38_spill] sm:$0xff] %v3752_v24  ;;  %v2941_v29 = vld [vmem:[#allocation11 + $0x14c] sm:$0xf0]  ;;  %v2907_v31 = vld [vmem:[#allocation11 + $0x44] sm:$0xf] }
  0x6d   : > { %4473 = vst [vmem:[#allocation28_spill] sm:$0xff] %v3721_v52  ;;  %v2575_v33 = vld [vmem:[#allocation11 + $0x50] sm:$0xf0]  ;;  %v3754_v42 = vor.u32 %v2941_v29, %v2701_v16  ;;  %v2939_v50 = vld [vmem:[#allocation11 + $0x144] sm:$0xf] }
  0x6e   : > { %4480 = vst [vmem:[#allocation35_spill] sm:$0xff] %v3742_v51  ;;  %v3756_v46 = vor.u32 %v2907_v31, %v2575_v33  ;;  %v2703_v58 = vld [vmem:[#allocation11 + $0x150] sm:$0xf0]  ;;  %v2557_v6 = vld [vmem:[#allocation11 + $0x20] sm:$0xf] }
  0x6f   : > { %1138 = vmatpush.bf16.msrb.mxu2 %v3708_v20  ;;  %1113 = vmatpush.bf16.msrb.mxu0 %v3716_v32  ;;  %4481 = vst [vmem:[#allocation36_spill] sm:$0xff] %v3744_v57  ;;  %v3759_v63 = vor.u32 %v2939_v50, %v2703_v58  ;;  %v2905_v7 = vld [vmem:[#allocation11 + $0x2c] sm:$0xf0]  ;;  %v2903_v31 = vld [vmem:[#allocation11 + $0x24] sm:$0xf] }
  0x70   : > { %1126 = vmatpush.bf16.msrb.mxu1 %v3718_v45  ;;  %1152 = vmatpush.bf16.msrb.mxu3 %v3723_v54  ;;  %4484 = vst [vmem:[#allocation39_spill] sm:$0xff] %v3754_v42  ;;  %v3764_v16 = vor.u32 %v2905_v7, %v2557_v6  ;;  %v2937_v29 = vld [vmem:[#allocation11 + $0x12c] sm:$0xf0]  ;;  %v2559_v33 = vld [vmem:[#allocation11 + $0x30] sm:$0xf0] }
  0x71   : > { %4485 = vst [vmem:[#allocation40_spill] sm:$0xff] %v3756_v46  ;;  %v2935_v50 = vld [vmem:[#allocation11 + $0x124] sm:$0xf]  ;;  %v2687_v58 = vld [vmem:[#allocation11 + $0x130] sm:$0xf0] }
  0x72   : > { %4486 = vst [vmem:[#allocation41_spill] sm:$0xff] %v3759_v63  ;;  %v2541_v6 = vld [vmem:[#allocation11] sm:$0xf]  ;;  %v2901_v7 = vld [vmem:[#allocation11 + $0xc] sm:$0xf0] }
  0x73   : > { %1139 = vmatpush.bf16.msrb.mxu2 %v3721_v52  ;;  %1114 = vmatpush.bf16.msrb.mxu0 %v3728_v0  ;;  %4487 = vst [vmem:[#allocation42_spill] sm:$0xff] %v3764_v16  ;;  %v2645_v0 = vld [vmem:[#allocation11 + $0xc8] sm:$0xf]  ;;  %v2958_v54 = vld [vmem:[#allocation11 + $0x1d4] sm:$0xf0] }
  0x74   : > { %1127 = vmatpush.bf16.msrb.mxu1 %v3730_v13  ;;  %1153 = vmatpush.bf16.msrb.mxu3 %v3735_v25  ;;  %v2930_v25 = vld [vmem:[#allocation11 + $0xf4] sm:$0xf0]  ;;  %v2791_v13 = vld [vmem:[#allocation11 + $0x1f8] sm:$0xf0]  ;;  %v2904_v28 = vld [vmem:[#allocation11 + $0x2c] sm:$0xf] }
  0x75   : > { %v2567_v20 = vld [vmem:[#allocation11 + $0x38] sm:$0xf0] }
  0x76   : > { %v2695_v62 = vld [vmem:[#allocation11 + $0x138] sm:$0xf0] }
  0x77   : > { %1140 = vmatpush.bf16.msrb.mxu2 %v3732_v15  ;;  %1115 = vmatpush.bf16.msrb.mxu0 %v3740_v37  ;;  %v2661_v37 = vld [vmem:[#allocation11 + $0xe8] sm:$0xf] }
  0x78   : > { %1128 = vmatpush.bf16.msrb.mxu1 %v3742_v51  ;;  %1154 = vmatpush.bf16.msrb.mxu3 %v3747_v2  ;;  %v2685_v2 = vld [vmem:[#allocation11 + $0x120] sm:$0xf]  ;;  %v2789_v15 = vld [vmem:[#allocation11 + $0x1e8] sm:$0xf] }
  0x7b   : > { %1141 = vmatpush.bf16.msrb.mxu2 %v3744_v57  ;;  %1116 = vmatpush.bf16.msrb.mxu0 %v3752_v24  ;;  %v3766_v57 = vor.u32 %v2937_v29, %v2685_v2  ;;  %v3768_v24 = vor.u32 %v2903_v31, %v2559_v33  ;;  %v3777_v2 = vor.u32 %v2901_v7, %v2541_v6  ;;  %v2933_v29 = vld [vmem:[#allocation11 + $0x10c] sm:$0xf0]  ;;  %v2899_v31 = vld [vmem:[#allocation11 + $0x4] sm:$0xf]  ;;  %v2543_v33 = vld [vmem:[#allocation11 + $0x10] sm:$0xf0] }
  0x7c   : > { %1129 = vmatpush.bf16.msrb.mxu1 %v3754_v42  ;;  %1155 = vmatpush.bf16.msrb.mxu3 %v3759_v63  ;;  %v3771_v42 = vor.u32 %v2935_v50, %v2687_v58  ;;  %v2669_v63 = vld [vmem:[#allocation11 + $0x100] sm:$0xf]  ;;  %v3781_v50 = vor.u32 %v2899_v31, %v2543_v33  ;;  %v2931_v58 = vld [vmem:[#allocation11 + $0x104] sm:$0xf]  ;;  %v3789_v6 = vor.u32 %v2930_v25, %v2661_v37  ;;  %v2928_v7 = vld [vmem:[#allocation11 + $0xec] sm:$0xf] }
  0x7d   : > { %4488 = vst [vmem:[#allocation43_spill] sm:$0xff] %v3766_v57  ;;  %v3779_v51 = vor.u32 %v2933_v29, %v2669_v63  ;;  %v2962_v63 = vld [vmem:[#allocation11 + $0x1f4] sm:$0xf0]  ;;  %v2663_v29 = vld [vmem:[#allocation11 + $0xf8] sm:$0xf0] }
  0x7e   : > { %4489 = vst [vmem:[#allocation44_spill] sm:$0xff] %v3768_v24  ;;  %v2926_v37 = vld [vmem:[#allocation11 + $0xd4] sm:$0xf0] }
  0x7f   : > { %1142 = vmatpush.bf16.msrb.mxu2 %v3756_v46  ;;  %1117 = vmatpush.bf16.msrb.mxu0 %v3764_v16  ;;  %4490 = vst [vmem:[#allocation45_spill] sm:$0xff] %v3771_v42  ;;  %v489_v46 = vld [vmem:[%s3580_s26] sm:$0xff]  ;;  %v2671_v16 = vld [vmem:[#allocation11 + $0x110] sm:$0xf0] }
  0x80   : > { %1130 = vmatpush.bf16.msrb.mxu1 %v3766_v57  ;;  %1156 = vmatpush.bf16.msrb.mxu3 %v3771_v42  ;;  %4491 = vst [vmem:[#allocation46_spill] sm:$0xff] %v3777_v2  ;;  %v490_v57 = vld [vmem:[%s3580_s26 + $0x8] sm:$0xff] }
  0x81   : > { %4492 = vst [vmem:[#allocation47_spill] sm:$0xff] %v3779_v51 }
  0x82   : > { %4493 = vst [vmem:[#allocation48_spill] sm:$0xff] %v3781_v50 }
  0x83   : > { %1143 = vmatpush.bf16.msrb.mxu2 %v3768_v24  ;;  %1118 = vmatpush.bf16.msrb.mxu0 %v3777_v2  ;;  %v3785_v24 = vor.u32 %v2931_v58, %v2671_v16  ;;  %4495 = vst [vmem:[#allocation50_spill] sm:$0xff] %v3789_v6  ;;  %v3792_v2 = vor.u32 %v2962_v63, %v2789_v15  ;;  %v2960_v58 = vld [vmem:[#allocation11 + $0x1ec] sm:$0xf] }
  0x84   : > { %1131 = vmatpush.bf16.msrb.mxu1 %v3779_v51  ;;  %v3794_v16 = vor.u32 %v2928_v7, %v2663_v29  ;;  %v3797_v25 = vor.u32 %v2960_v58, %v2791_v13  ;;  %v3802_v15 = vor.u32 %v2926_v37, %v2645_v0  ;;  %v2924_v63 = vld [vmem:[#allocation11 + $0xcc] sm:$0xf]  ;;  %v2647_v7 = vld [vmem:[#allocation11 + $0xd8] sm:$0xf0]  ;;  %v2629_v58 = vld [vmem:[#allocation11 + $0xa8] sm:$0xf] }
  0x85   : > { %4494 = vst [vmem:[#allocation49_spill] sm:$0xff] %v3785_v24  ;;  %1157 = vmatpush.bf16.msrb.mxu3 %v3785_v24  ;;  %v3807_v13 = vor.u32 %v2924_v63, %v2647_v7  ;;  %v2956_v29 = vld [vmem:[#allocation11 + $0x1cc] sm:$0xf]  ;;  %v2922_v24 = vld [vmem:[#allocation11 + $0xb4] sm:$0xf0] }
  0x86   : > { %4496 = vst [vmem:[#allocation51_spill] sm:$0xff] %v3792_v2  ;;  %v2954_v0 = vld [vmem:[#allocation11 + $0x1b4] sm:$0xf0]  ;;  %v2952_v7 = vld [vmem:[#allocation11 + $0x1ac] sm:$0xf] }
  0x87   : > { %1144 = vmatpush.bf16.msrb.mxu2 %v3781_v50  ;;  %4497 = vst [vmem:[#allocation52_spill] sm:$0xff] %v3794_v16  ;;  %1163 = vmatpush.bf16.msra.mxu0 %v3789_v6  ;;  %v2773_v50 = vld [vmem:[#allocation11 + $0x1c8] sm:$0xf] }
  0x88   : > { %4498 = vst [vmem:[#allocation53_spill] sm:$0xff] %v3797_v25  ;;  %1176 = vmatpush.bf16.msra.mxu1 %v3792_v2  ;;  %v2757_v2 = vld [vmem:[#allocation11 + $0x1a8] sm:$0xf] }
  0x89   : > { %4499 = vst [vmem:[#allocation54_spill] sm:$0xff] %v3802_v15  ;;  %1202 = vmatpush.bf16.msra.mxu3 %v3797_v25  ;;  %v3816_v63 = vor.u32 %v2954_v0, %v2757_v2  ;;  %v2918_v25 = vld [vmem:[#allocation11 + $0x94] sm:$0xf0]  ;;  %v2916_v0 = vld [vmem:[#allocation11 + $0x8c] sm:$0xf] }
  0x8a   : > { %4501 = vst [vmem:[#allocation56_spill] sm:$0xff] %v3807_v13  ;;  %v2950_v2 = vld [vmem:[#allocation11 + $0x194] sm:$0xf0] }
  0x8b   : > { %1189 = vmatpush.bf16.msra.mxu2 %v3794_v16  ;;  %1164 = vmatpush.bf16.msra.mxu0 %v3802_v15  ;;  %4504 = vst [vmem:[#allocation59_spill] sm:$0xff] %v3816_v63  ;;  %v2613_v15 = vld [vmem:[#allocation11 + $0x88] sm:$0xf] }
  0x8c   : > { %v2741_v16 = vld [vmem:[#allocation11 + $0x188] sm:$0xf] }
  0x8f   : > { %1190 = vmatpush.bf16.msra.mxu2 %v3807_v13  ;;  %v3824_v13 = vor.u32 %v2918_v25, %v2613_v15 }
  0x91   : > { %4507 = vst [vmem:[#allocation62_spill] sm:$0xff] %v3824_v13 }
  0xe2   : > { %v662_v42 = vpop.f32.mrf.mxu0 }
  0xe3   : > { %v705_v31 = vadd.f32 %v662_v42, %v489_v46  ;;  %v675_v33 = vpop.f32.mrf.mxu1  ;;  %v492_v42 = vld [vmem:[%s3580_s26 + $0x18] sm:$0xff]  ;;  %v3804_v46 = vor.u32 %v2958_v54, %v2773_v50  ;;  %v3812_v54 = vor.u32 %v2922_v24, %v2629_v58  ;;  %v2920_v50 = vld [vmem:[#allocation11 + $0xac] sm:$0xf] }
  0xe4   : > { %v706_v51 = vadd.f32 %v675_v33, %v490_v57  ;;  %v2775_v33 = vld [vmem:[#allocation11 + $0x1d8] sm:$0xf0] }
  0xe5   : > { %v2536_v52 = vmul.f32 -1.442695, %v705_v31  ;;  %4500 = vst [vmem:[#allocation55_spill] sm:$0xff] %v3804_v46  ;;  %v3809_v31 = vor.u32 %v2956_v29, %v2775_v33  ;;  %1177 = vmatpush.bf16.msra.mxu1 %v3804_v46  ;;  %v2759_v29 = vld [vmem:[#allocation11 + $0x1b8] sm:$0xf0]  ;;  %1165 = vmatpush.bf16.msra.mxu0 %v3812_v54 }
  0xe6   : > { %v2537_v57 = vmul.f32 -1.442695, %v706_v51  ;;  %4503 = vst [vmem:[#allocation58_spill] sm:$0xff] %v3812_v54  ;;  %v2631_v51 = vld [vmem:[#allocation11 + $0xb8] sm:$0xf0]  ;;  %v3821_v24 = vor.u32 %v2952_v7, %v2759_v29 }
  0xe7   : > { %3066 = vpow2.f32 %v2536_v52  ;;  %4502 = vst [vmem:[#allocation57_spill] sm:$0xff] %v3809_v31  ;;  %v3818_v52 = vor.u32 %v2920_v50, %v2631_v51  ;;  %1203 = vmatpush.bf16.msra.mxu3 %v3809_v31  ;;  %v2948_v7 = vld [vmem:[#allocation11 + $0x18c] sm:$0xf]  ;;  %v2743_v29 = vld [vmem:[#allocation11 + $0x198] sm:$0xf0] }
  0xe8   : > { %3068 = vpow2.f32 %v2537_v57  ;;  %4506 = vst [vmem:[#allocation61_spill] sm:$0xff] %v3821_v24  ;;  %v2709_v46 = vld [vmem:[#allocation11 + $0x148] sm:$0xf] }
  0xe9   : > { %v701_v37 = vpop.f32.mrf.mxu3  ;;  %4505 = vst [vmem:[#allocation60_spill] sm:$0xff] %v3818_v52  ;;  %1178 = vmatpush.bf16.msra.mxu1 %v3816_v63  ;;  %1191 = vmatpush.bf16.msra.mxu2 %v3818_v52  ;;  %v2597_v63 = vld [vmem:[#allocation11 + $0x68] sm:$0xf]  ;;  %v2914_v52 = vld [vmem:[#allocation11 + $0x74] sm:$0xf0] }
  0xea   : > { %v708_v33 = vadd.f32 %v701_v37, %v492_v42  ;;  %v664_v57 = vpop.f32.mrf.mxu0  ;;  %v3828_v42 = vor.u32 %v2950_v2, %v2741_v16  ;;  %v2615_v37 = vld [vmem:[#allocation11 + $0x98] sm:$0xf0]  ;;  %1166 = vmatpush.bf16.msra.mxu0 %v3824_v13  ;;  %v2725_v16 = vld [vmem:[#allocation11 + $0x168] sm:$0xf]  ;;  %v491_v2 = vld [vmem:[%s3580_s26 + $0x10] sm:$0xff] }
  0xeb   : > { %v677_v58 = vpop.f32.mrf.mxu1  ;;  %1204 = vmatpush.bf16.msra.mxu3 %v3821_v24  ;;  %v3833_v25 = vor.u32 %v2916_v0, %v2615_v37  ;;  %v3846_v0 = vor.u32 %v2914_v52, %v2597_v63  ;;  %v2912_v37 = vld [vmem:[#allocation11 + $0x6c] sm:$0xf]  ;;  %v2727_v24 = vld [vmem:[#allocation11 + $0x178] sm:$0xf0] }
  0xec   : > { %v2538_v6 = vmul.f32 -1.442695, %v708_v33  ;;  %4508 = vst [vmem:[#allocation63_spill] sm:$0xff] %v3828_v42  ;;  %v3837_v58 = vor.u32 %v2948_v7, %v2743_v29  ;;  %v2599_v7 = vld [vmem:[#allocation11 + $0x78] sm:$0xf0] }
  0xed   : > { %v3067_v50 = vpop.eup %3066  ;;  %v688_v51 = vpop.f32.mrf.mxu2  ;;  %4509 = vst [vmem:[#allocation64_spill] sm:$0xff] %v3833_v25  ;;  %1179 = vmatpush.bf16.msra.mxu1 %v3828_v42  ;;  %1192 = vmatpush.bf16.msra.mxu2 %v3833_v25  ;;  %v2944_v13 = vld [vmem:[#allocation11 + $0x16c] sm:$0xf]  ;;  %v2581_v25 = vld [vmem:[#allocation11 + $0x48] sm:$0xf] }
  0xee   : > { %v3069_v57 = vpop.eup %3068  ;;  %v3830_v33 = vadd.f32 1.0, %v3067_v50  ;;  %3070 = vpow2.f32 %v2538_v6  ;;  %4510 = vst [vmem:[#allocation65_spill] sm:$0xff] %v3837_v58  ;;  %v2946_v6 = vld [vmem:[#allocation11 + $0x174] sm:$0xf0]  ;;  %v707_v31 = vadd.f32 %v688_v51, %v491_v2  ;;  %1167 = vmatpush.bf16.msra.mxu0 %v3846_v0  ;;  %v2940_v51 = vld [vmem:[#allocation11 + $0x14c] sm:$0xf] }
  0xef   : > { %v3835_v15 = vadd.f32 1.0, %v3069_v57  ;;  %1205 = vmatpush.bf16.msra.mxu3 %v3837_v58  ;;  %4511 = vst [vmem:[#allocation66_spill] sm:$0xff] %v3846_v0  ;;  %v3848_v29 = vor.u32 %v2946_v6, %v2725_v16  ;;  %v3850_v57 = vor.u32 %v2912_v37, %v2599_v7  ;;  %v2910_v42 = vld [vmem:[#allocation11 + $0x54] sm:$0xf0]  ;;  %v2908_v6 = vld [vmem:[#allocation11 + $0x4c] sm:$0xf] }
  0xf0   : > { %3072 = vrcp.f32 %v3830_v33  ;;  %v3859_v52 = vor.u32 %v2910_v42, %v2581_v25  ;;  %v2942_v16 = vld [vmem:[#allocation11 + $0x154] sm:$0xf0]  ;;  %v2711_v2 = vld [vmem:[#allocation11 + $0x158] sm:$0xf0]  ;;  %v722_v42 = vand.u32 2147483647, %v3830_v33  ;;  %vm718_vm3 = vweird.f32 %v3830_v33 }
  0xf1   : > { %3074 = vrcp.f32 %v3835_v15  ;;  %v703_v50 = vpop.f32.mrf.mxu3  ;;  %4512 = vst [vmem:[#allocation67_spill] sm:$0xff] %v3848_v29  ;;  %1180 = vmatpush.bf16.msra.mxu1 %v3848_v29  ;;  %1193 = vmatpush.bf16.msra.mxu2 %v3850_v57  ;;  %v2565_v25 = vld [vmem:[#allocation11 + $0x28] sm:$0xf]  ;;  %v724_v0 = vand.u32 2147483648, %v3830_v33  ;;  %v3880_v32 = vor.u32 %v2940_v51, %v2711_v2  ;;  %v743_v12 = vand.u32 2147483648, %v3835_v15 }
  0xf2   : > { %4513 = vst [vmem:[#allocation68_spill] sm:$0xff] %v3850_v57  ;;  %v3853_v50 = vor.u32 %v2944_v13, %v2727_v24  ;;  %v3864_v13 = vor.u32 %v2942_v16, %v2709_v46  ;;  %v2583_v24 = vld [vmem:[#allocation11 + $0x58] sm:$0xf0]  ;;  %v741_v46 = vand.u32 2147483647, %v3835_v15  ;;  %1168 = vmatpush.bf16.msra.mxu0 %v3859_v52  ;;  %vm737_vm2 = vweird.f32 %v3835_v15 }
  0xf3   : > { %4515 = vst [vmem:[#allocation70_spill] sm:$0xff] %v3859_v52  ;;  %v2693_v16 = vld [vmem:[#allocation11 + $0x128] sm:$0xf]  ;;  %v3878_v45 = vor.u32 %v2908_v6, %v2583_v24  ;;  %v2936_v52 = vld [vmem:[#allocation11 + $0x12c] sm:$0xf]  ;;  %v3891_v6 = vor.u32 %v2904_v28, %v2567_v20  ;;  %vm723_vm5 = vcmp.eq.f32.partialorder %v722_v42, 8.507059e+37 }
  0xf4   : > { %v3071_v54 = vpop.eup %3070  ;;  %4514 = vst [vmem:[#allocation69_spill] sm:$0xff] %v3853_v50  ;;  %1206 = vmatpush.bf16.msra.mxu3 %v3853_v50  ;;  %v2938_v50 = vld [vmem:[#allocation11 + $0x134] sm:$0xf0]  ;;  %v3893_v24 = vor.u32 %v2936_v52, %v2695_v62  ;;  %v2677_v2 = vld [vmem:[#allocation11 + $0x108] sm:$0xf]  ;;  %vm742_vm7 = vcmp.eq.f32.partialorder %v741_v46, 8.507059e+37 }
  0xf5   : > { %v3855_v58 = vadd.f32 1.0, %v3071_v54  ;;  %v690_v63 = vpop.f32.mrf.mxu2  ;;  %4516 = vst [vmem:[#allocation71_spill] sm:$0xff] %v3864_v13  ;;  %1181 = vmatpush.bf16.msra.mxu1 %v3864_v13  ;;  %1194 = vmatpush.bf16.msra.mxu2 %v3878_v45  ;;  %v2902_v51 = vld [vmem:[#allocation11 + $0x14] sm:$0xf0]  ;;  %v2679_v28 = vld [vmem:[#allocation11 + $0x118] sm:$0xf0] }
  0xf6   : > { %v3861_v37 = vpop.eup %3072  ;;  %v2906_v63 = vld [vmem:[#allocation11 + $0x34] sm:$0xf0]  ;;  %4517 = vst [vmem:[#allocation72_spill] sm:$0xff] %v3878_v45 }
  0xf7   : > { %v3866_v54 = vpop.eup %3074  ;;  %v714_v7 = vmul.f32 %v3861_v37, %v3830_v33  ;;  %3076 = vrcp.f32 %v3855_v58  ;;  %4518 = vst [vmem:[#allocation73_spill] sm:$0xff] %v3880_v32  ;;  %v3883_v1 = vor.u32 %v2906_v63, %v2565_v25  ;;  %vm719_vm0 = vweird.f32 %v3861_v37  ;;  %v2934_v25 = vld [vmem:[#allocation11 + $0x114] sm:$0xf0]  ;;  %v2900_v63 = vld [vmem:[#allocation11 + $0xc] sm:$0xf] }
  0xf8   : > { %v733_v57 = vmul.f32 %v3866_v54, %v3835_v15  ;;  %3078 = vtanh.f32 %v707_v31  ;;  %v3885_v31 = vor.u32 %v2938_v50, %v2693_v16  ;;  %1207 = vmatpush.bf16.msra.mxu3 %v3880_v32  ;;  %4521 = vst [vmem:[#allocation76_spill] sm:$0xff] %v3891_v6  ;;  %vm738_vm1 = vweird.f32 %v3866_v54  ;;  %v2551_v16 = vld [vmem:[#allocation11 + $0x18] sm:$0xf0]  ;;  %vm720_vm4 = vmor %vm718_vm3, %vm719_vm0 }
  0xf9   : > { %v715_v29 = vsub.f32 1.0, %v714_v7  ;;  %4519 = vst [vmem:[#allocation74_spill] sm:$0xff] %v3883_v1  ;;  %1169 = vmatpush.bf16.msra.mxu0 %v3883_v1  ;;  %v3904_v20 = vor.u32 %v2934_v25, %v2677_v2  ;;  %vm739_vm6 = vmor %vm737_vm2, %vm738_vm1  ;;  %v744_v33 = vor.u32 1.1754944e-38, %v743_v12  ;;  %1195 = vmatpush.bf16.msra.mxu2 %v3891_v6  ;;  %v3915_v25 = vor.u32 %v2900_v63, %v2551_v16 }
  0xfa   : > { %v734_v17 = vsub.f32 1.0, %v733_v57  ;;  %4520 = vst [vmem:[#allocation75_spill] sm:$0xff] %v3885_v31  ;;  %v2549_v57 = vld [vmem:[#allocation11 + $0x8] sm:$0xf]  ;;  %1182 = vmatpush.bf16.msra.mxu1 %v3885_v31  ;;  %vm757_vm9 = vweird.f32 %v3855_v58 }
  0xfb   : > { %v716_v7 = vmul.f32 %v3861_v37, %v715_v29  ;;  %4522 = vst [vmem:[#allocation77_spill] sm:$0xff] %v3893_v24  ;;  %v3898_v29 = vor.u32 %v2902_v51, %v2549_v57  ;;  %v725_v51 = vor.u32 1.1754944e-38, %v724_v0 }
  0xfc   : > { %v735_v50 = vmul.f32 %v3866_v54, %v734_v17  ;;  %4524 = vst [vmem:[#allocation79_spill] sm:$0xff] %v3904_v20  ;;  %v2932_v17 = vld [vmem:[#allocation11 + $0x10c] sm:$0xf]  ;;  %1208 = vmatpush.bf16.msra.mxu3 %v3893_v24 }
  0xfd   : > { %4523 = vst [vmem:[#allocation78_spill] sm:$0xff] %v3898_v29  ;;  %v3077_v45 = vpop.eup %3076  ;;  %v717_v62 = vadd.f32 %v3861_v37, %v716_v7  ;;  %v486_v7 = vld [vmem:[#allocation3] sm:$0xff]  ;;  %v3917_v31 = vor.u32 %v2932_v17, %v2679_v28  ;;  %1170 = vmatpush.bf16.msra.mxu0 %v3898_v29  ;;  %1196 = vmatpush.bf16.msra.mxu2 %v3915_v25  ;;  %v763_v17 = vand.u32 2147483648, %v3855_v58 }
  0xfe   : > { %v3079_v52 = vpop.eup %3078  ;;  %v753_v57 = vmul.f32 %v3077_v45, %v3855_v58  ;;  %v736_v15 = vadd.f32 %v3866_v54, %v735_v50  ;;  %4525 = vst [vmem:[#allocation80_spill] sm:$0xff] %v3915_v25  ;;  %1183 = vmatpush.bf16.msra.mxu1 %v3904_v20  ;;  %vm758_vm8 = vweird.f32 %v3077_v45 }
  0xff   : > { %v721_v2 = vsel %vm720_vm4, %v3861_v37, %v717_v62  ;;  %4526 = vst [vmem:[#allocation81_spill] sm:$0xff] %v3917_v31  ;;  %vm759_vm10 = vmor %vm757_vm9, %vm758_vm8 }
 0x100   : > { %v754_v1 = vsub.f32 1.0, %v753_v57  ;;  %v726_v42 = vsel %vm723_vm5, %v725_v51, %v721_v2  ;;  %v740_v0 = vsel %vm739_vm6, %v3866_v54, %v736_v15  ;;  %1209 = vmatpush.bf16.msra.mxu3 %v3917_v31  ;;  %v761_v54 = vand.u32 2147483647, %v3855_v58  ;;  %v4527_v58 = vld [vmem:[#allocation20_spill] sm:$0xff] }
 0x101   : > { %v745_v50 = vsel %vm742_vm7, %v744_v33, %v740_v0  ;;  %v768_v12 = vmul.f32 %v3079_v52, %v726_v42  ;;  %v4528_v0 = vld [vmem:[#allocation21_spill] sm:$0xff] }
 0x102   : > { %v755_v37 = vmul.f32 %v3077_v45, %v754_v1  ;;  %v767_v62 = vmul.f32 %v745_v50, %v486_v7  ;;  %v764_v1 = vor.u32 1.1754944e-38, %v763_v17  ;;  %vm762_vm11 = vcmp.eq.f32.partialorder %v761_v54, 8.507059e+37  ;;  %v4529_v50 = vld [vmem:[#allocation22_spill] sm:$0xff]  ;;  %v4534_v17 = vld [vmem:[#allocation27_spill] sm:$0xff]  ;;  %v4535_v54 = vld [vmem:[#allocation28_spill] sm:$0xff] }
 0x104   : > { %v3924_v63 = vadd.f32 %v768_v12, %v767_v62  ;;  %v756_v16 = vadd.f32 %v3077_v45, %v755_v37  ;;  %v4530_v12 = vld [vmem:[#allocation23_spill] sm:$0xff]  ;;  %v4531_v37 = vld [vmem:[#allocation24_spill] sm:$0xff]  ;;  %v4532_v62 = vld [vmem:[#allocation25_spill] sm:$0xff] }
 0x106   : > { %3080 = vtanh.f32 %v3924_v63  ;;  %v760_v46 = vsel %vm759_vm10, %v3077_v45, %v756_v16  ;;  %v4533_v16 = vld [vmem:[#allocation26_spill] sm:$0xff] }
 0x107   : > { %v765_v52 = vsel %vm762_vm11, %v764_v1, %v760_v46  ;;  %v4536_v46 = vld [vmem:[#allocation29_spill] sm:$0xff]  ;;  %v4537_v1 = vld [vmem:[#allocation30_spill] sm:$0xff] }
 0x10c   : > { %v3081_v28 = vpop.eup %3080 }
 0x10d   : > { %v771_v57 = vmul.f32 %v3081_v28, %v765_v52  ;;  %v4538_v28 = vld [vmem:[#allocation31_spill] sm:$0xff]  ;;  %v4539_v52 = vld [vmem:[#allocation32_spill] sm:$0xff] }
 0x10f   : > { %v772_v51 = vpack.c.bf16 %v771_v57, %v771_v57  ;;  %v4540_v57 = vld [vmem:[#allocation33_spill] sm:$0xff] }
 0x111   : > { %773 = vst [vmem:[#allocation2] sm:$0xf] %v772_v51  ;;  %v4541_v51 = vld [vmem:[#allocation34_spill] sm:$0xff] }
 0x118   : > { %v774_v15 = vld [vmem:[#allocation2] sm:$0xff] }
 0x119   : > { %v785_v33 = vunpack.c.l.b16 %v774_v15  ;;  %v786_v7 = vunpack.c.h.b16 %v774_v15  ;;  %v1280_v45 = vld [vmem:[#allocation2] sm:$0xf] }
 0x11a   : > { %v4542_v15 = vld [vmem:[#allocation35_spill] sm:$0xff] }
 0x11b   : > { %v787_v2 = vpack.c.b16 %v785_v33, %v785_v33  ;;  %v788_v42 = vpack.c.b16 %v786_v7, %v786_v7  ;;  %v4543_v33 = vld [vmem:[#allocation36_spill] sm:$0xff]  ;;  %v4544_v7 = vld [vmem:[#allocation37_spill] sm:$0xff] }
 0x11d   : > { %1119 = vmatmul.bf16.vlgmr.msrb.gmra.mxu0 %v787_v2  ;;  %1132 = vmatmul.bf16.vlgmr.msrb.gmra.mxu1 %v788_v42 }
 0x11e   : > { %1145 = vmatmul.bf16.vlgmr.msrb.gmra.mxu2 %v787_v2  ;;  %1158 = vmatmul.bf16.vlgmr.msrb.gmra.mxu3 %v788_v42 }
 0x11f   : > { %1286 = vmatpush.bf16.msrb.mxu0 %v3596_v5  ;;  %1299 = vmatpush.bf16.msrb.mxu1 %v3598_v9 }
 0x120   : > { %1312 = vmatpush.bf16.msrb.mxu2 %v3611_v23  ;;  %1325 = vmatpush.bf16.msrb.mxu3 %v3600_v10 }
 0x123   : > { %1287 = vmatpush.bf16.msrb.mxu0 %v3603_v14  ;;  %1300 = vmatpush.bf16.msrb.mxu1 %v3607_v18 }
 0x124   : > { %1313 = vmatpush.bf16.msrb.mxu2 %v3623_v36  ;;  %1326 = vmatpush.bf16.msrb.mxu3 %v3609_v19 }
 0x127   : > { %1288 = vmatpush.bf16.msrb.mxu0 %v3615_v30  ;;  %1301 = vmatpush.bf16.msrb.mxu1 %v3619_v34 }
 0x128   : > { %1314 = vmatpush.bf16.msrb.mxu2 %v3629_v44  ;;  %1327 = vmatpush.bf16.msrb.mxu3 %v3621_v35 }
 0x12b   : > { %1289 = vmatpush.bf16.msrb.mxu0 %v3627_v43  ;;  %1302 = vmatpush.bf16.msrb.mxu1 %v3633_v47 }
 0x12c   : > { %1315 = vmatpush.bf16.msrb.mxu2 %v3641_v56  ;;  %1328 = vmatpush.bf16.msrb.mxu3 %v3635_v48 }
 0x12d   : > { %1171 = vmatmul.bf16.vlgmr.msra.gmra.mxu0 %v787_v2  ;;  %1184 = vmatmul.bf16.vlgmr.msra.gmra.mxu1 %v788_v42 }
 0x12e   : > { %1197 = vmatmul.bf16.vlgmr.msra.gmra.mxu2 %v787_v2  ;;  %1210 = vmatmul.bf16.vlgmr.msra.gmra.mxu3 %v788_v42  ;;  %v4545_v2 = vld [vmem:[#allocation38_spill] sm:$0xff]  ;;  %v4546_v42 = vld [vmem:[#allocation39_spill] sm:$0xff] }
 0x12f   : > { %1290 = vmatpush.bf16.msrb.mxu0 %v3639_v55  ;;  %1303 = vmatpush.bf16.msrb.mxu1 %v3645_v59 }
 0x130   : > { %1316 = vmatpush.bf16.msrb.mxu2 %v3653_v4  ;;  %1329 = vmatpush.bf16.msrb.mxu3 %v3647_v60 }
 0x133   : > { %1291 = vmatpush.bf16.msrb.mxu0 %v3651_v3  ;;  %1304 = vmatpush.bf16.msrb.mxu1 %v3657_v8 }
 0x134   : > { %1317 = vmatpush.bf16.msrb.mxu2 %v3665_v22  ;;  %1330 = vmatpush.bf16.msrb.mxu3 %v3659_v11 }
 0x137   : > { %1292 = vmatpush.bf16.msrb.mxu0 %v3663_v21  ;;  %1305 = vmatpush.bf16.msrb.mxu1 %v3669_v26 }
 0x138   : > { %1318 = vmatpush.bf16.msrb.mxu2 %v3677_v39  ;;  %1331 = vmatpush.bf16.msrb.mxu3 %v3671_v27 }
 0x13b   : > { %1293 = vmatpush.bf16.msrb.mxu0 %v3675_v38  ;;  %1306 = vmatpush.bf16.msrb.mxu1 %v3681_v40 }
 0x13c   : > { %1319 = vmatpush.bf16.msrb.mxu2 %v3689_v49  ;;  %1332 = vmatpush.bf16.msrb.mxu3 %v3683_v41 }
 0x13e   : > { %1294 = vmatmul.bf16.vlgmr.msrb.gmra.mxu0 %v1280_v45  ;;  %1307 = vmatmul.bf16.vlgmr.msrb.gmra.mxu1 %v1280_v45 }
 0x13f   : > { %1415 = vmatpush.bf16.msra.mxu0 %v3692_v53  ;;  %1428 = vmatpush.bf16.msra.mxu1 %v3694_v61 }
 0x140   : > { %1320 = vmatmul.bf16.vlgmr.msrb.gmra.mxu2 %v1280_v45  ;;  %1333 = vmatmul.bf16.vlgmr.msrb.gmra.mxu3 %v1280_v45  ;;  %v4547_v45 = vld [vmem:[#allocation40_spill] sm:$0xff] }
 0x141   : > { %1441 = vmatpush.bf16.msra.mxu2 %v4527_v58  ;;  %1454 = vmatpush.bf16.msra.mxu3 %v4528_v0 }
 0x143   : > { %1416 = vmatpush.bf16.msra.mxu0 %v4529_v50  ;;  %1429 = vmatpush.bf16.msra.mxu1 %v4530_v12 }
 0x145   : > { %1442 = vmatpush.bf16.msra.mxu2 %v4531_v37  ;;  %1455 = vmatpush.bf16.msra.mxu3 %v4532_v62  ;;  %v2798_v62 = vld [vmem:[%s3580_s26 + $0x20] sm:$0xff]  ;;  %v2799_v37 = vld [vmem:[%s3580_s26 + $0x28] sm:$0xff] }
 0x147   : > { %1417 = vmatpush.bf16.msra.mxu0 %v4533_v16  ;;  %1430 = vmatpush.bf16.msra.mxu1 %v4534_v17 }
 0x149   : > { %1443 = vmatpush.bf16.msra.mxu2 %v4535_v54  ;;  %1456 = vmatpush.bf16.msra.mxu3 %v4536_v46 }
 0x14b   : > { %1418 = vmatpush.bf16.msra.mxu0 %v4537_v1  ;;  %1431 = vmatpush.bf16.msra.mxu1 %v4538_v28  ;;  %v4548_v1 = vld [vmem:[#allocation41_spill] sm:$0xff]  ;;  %v4549_v28 = vld [vmem:[#allocation42_spill] sm:$0xff] }
 0x14d   : > { %1444 = vmatpush.bf16.msra.mxu2 %v4539_v52  ;;  %1457 = vmatpush.bf16.msra.mxu3 %v4540_v57  ;;  %v4550_v52 = vld [vmem:[#allocation43_spill] sm:$0xff]  ;;  %v4551_v57 = vld [vmem:[#allocation44_spill] sm:$0xff] }
 0x14f   : > { %1419 = vmatpush.bf16.msra.mxu0 %v4541_v51  ;;  %1432 = vmatpush.bf16.msra.mxu1 %v4542_v15  ;;  %v4552_v51 = vld [vmem:[#allocation45_spill] sm:$0xff]  ;;  %v4553_v15 = vld [vmem:[#allocation46_spill] sm:$0xff] }
 0x151   : > { %1445 = vmatpush.bf16.msra.mxu2 %v4543_v33  ;;  %1458 = vmatpush.bf16.msra.mxu3 %v4544_v7  ;;  %v4554_v33 = vld [vmem:[#allocation47_spill] sm:$0xff]  ;;  %v4555_v7 = vld [vmem:[#allocation50_spill] sm:$0xff] }
 0x153   : > { %1420 = vmatpush.bf16.msra.mxu0 %v4545_v2  ;;  %1433 = vmatpush.bf16.msra.mxu1 %v4546_v42  ;;  %v4556_v2 = vld [vmem:[#allocation51_spill] sm:$0xff]  ;;  %v4557_v42 = vld [vmem:[#allocation48_spill] sm:$0xff] }
 0x155   : > { %1446 = vmatpush.bf16.msra.mxu2 %v4547_v45  ;;  %1459 = vmatpush.bf16.msra.mxu3 %v4548_v1  ;;  %v4558_v45 = vld [vmem:[#allocation49_spill] sm:$0xff]  ;;  %v4559_v1 = vld [vmem:[#allocation52_spill] sm:$0xff] }
 0x157   : > { %1421 = vmatpush.bf16.msra.mxu0 %v4549_v28  ;;  %1434 = vmatpush.bf16.msra.mxu1 %v4550_v52  ;;  %v4560_v28 = vld [vmem:[#allocation53_spill] sm:$0xff]  ;;  %v4561_v52 = vld [vmem:[#allocation54_spill] sm:$0xff] }
 0x159   : > { %1447 = vmatpush.bf16.msra.mxu2 %v4551_v57  ;;  %1460 = vmatpush.bf16.msra.mxu3 %v4552_v51  ;;  %v4562_v57 = vld [vmem:[#allocation55_spill] sm:$0xff]  ;;  %v4563_v51 = vld [vmem:[#allocation56_spill] sm:$0xff] }
 0x15b   : > { %1422 = vmatpush.bf16.msra.mxu0 %v4553_v15  ;;  %1435 = vmatpush.bf16.msra.mxu1 %v4554_v33  ;;  %v4564_v15 = vld [vmem:[#allocation57_spill] sm:$0xff]  ;;  %v4565_v33 = vld [vmem:[#allocation58_spill] sm:$0xff] }
 0x15d   : > { %1448 = vmatpush.bf16.msra.mxu2 %v4557_v42  ;;  %1461 = vmatpush.bf16.msra.mxu3 %v4558_v45  ;;  %v4568_v42 = vld [vmem:[#allocation61_spill] sm:$0xff]  ;;  %v4569_v45 = vld [vmem:[#allocation62_spill] sm:$0xff] }
 0x15f   : > { %1467 = vmatpush.bf16.msrb.mxu0 %v4555_v7  ;;  %1480 = vmatpush.bf16.msrb.mxu1 %v4556_v2  ;;  %v4566_v7 = vld [vmem:[#allocation59_spill] sm:$0xff]  ;;  %v4567_v2 = vld [vmem:[#allocation60_spill] sm:$0xff] }
 0x161   : > { %1493 = vmatpush.bf16.msrb.mxu2 %v4559_v1  ;;  %1506 = vmatpush.bf16.msrb.mxu3 %v4560_v28  ;;  %v4570_v1 = vld [vmem:[#allocation63_spill] sm:$0xff]  ;;  %v4571_v28 = vld [vmem:[#allocation64_spill] sm:$0xff] }
 0x163   : > { %1468 = vmatpush.bf16.msrb.mxu0 %v4561_v52  ;;  %1481 = vmatpush.bf16.msrb.mxu1 %v4562_v57  ;;  %v4572_v52 = vld [vmem:[#allocation65_spill] sm:$0xff]  ;;  %v4573_v57 = vld [vmem:[#allocation66_spill] sm:$0xff] }
 0x165   : > { %1494 = vmatpush.bf16.msrb.mxu2 %v4563_v51  ;;  %1507 = vmatpush.bf16.msrb.mxu3 %v4564_v15  ;;  %v4574_v51 = vld [vmem:[#allocation67_spill] sm:$0xff]  ;;  %v4575_v15 = vld [vmem:[#allocation68_spill] sm:$0xff] }
 0x167   : > { %1469 = vmatpush.bf16.msrb.mxu0 %v4565_v33  ;;  %1482 = vmatpush.bf16.msrb.mxu1 %v4566_v7  ;;  %v4576_v33 = vld [vmem:[#allocation69_spill] sm:$0xff]  ;;  %v4577_v7 = vld [vmem:[#allocation70_spill] sm:$0xff] }
 0x169   : > { %1495 = vmatpush.bf16.msrb.mxu2 %v4567_v2  ;;  %1508 = vmatpush.bf16.msrb.mxu3 %v4568_v42  ;;  %v4578_v42 = vld [vmem:[#allocation72_spill] sm:$0xff] }
 0x16b   : > { %1470 = vmatpush.bf16.msrb.mxu0 %v4569_v45  ;;  %1483 = vmatpush.bf16.msrb.mxu1 %v4570_v1  ;;  %v4579_v1 = vld [vmem:[#allocation74_spill] sm:$0xff] }
 0x16d   : > { %1496 = vmatpush.bf16.msrb.mxu2 %v4571_v28  ;;  %1509 = vmatpush.bf16.msrb.mxu3 %v4572_v52  ;;  %v4580_v28 = vld [vmem:[#allocation75_spill] sm:$0xff] }
 0x16f   : > { %1471 = vmatpush.bf16.msrb.mxu0 %v4573_v57  ;;  %1484 = vmatpush.bf16.msrb.mxu1 %v4574_v51 }
 0x171   : > { %1497 = vmatpush.bf16.msrb.mxu2 %v4575_v15  ;;  %1510 = vmatpush.bf16.msrb.mxu3 %v4576_v33 }
 0x173   : > { %1472 = vmatpush.bf16.msrb.mxu0 %v4577_v7  ;;  %1485 = vmatpush.bf16.msrb.mxu1 %v3864_v13  ;;  %v485_v13 = vld [vmem:[#allocation12] sm:$0xf] }
 0x174   : > { %v4029_v33 = vperm.slane %v485_v13, 1 }
 0x175   : > { %1498 = vmatpush.bf16.msrb.mxu2 %v4578_v42  ;;  %1511 = vmatpush.bf16.msrb.mxu3 %v3880_v32  ;;  %v4026_v42 = vperm.slane %v485_v13, 0 }
 0x176   : > { %4582 = vst [vmem:[#allocation21_spill] sm:$0xff] %v4029_v33 }
 0x177   : > { %1473 = vmatpush.bf16.msrb.mxu0 %v4579_v1  ;;  %1486 = vmatpush.bf16.msrb.mxu1 %v4580_v28  ;;  %4581 = vst [vmem:[#allocation20_spill] sm:$0xff] %v4026_v42 }
 0x179   : > { %1499 = vmatpush.bf16.msrb.mxu2 %v3891_v6  ;;  %1512 = vmatpush.bf16.msrb.mxu3 %v3893_v24 }
 0x17b   : > { %1474 = vmatpush.bf16.msrb.mxu0 %v3898_v29  ;;  %1487 = vmatpush.bf16.msrb.mxu1 %v3904_v20 }
 0x17d   : > { %1500 = vmatpush.bf16.msrb.mxu2 %v3915_v25  ;;  %1513 = vmatpush.bf16.msrb.mxu3 %v3917_v31 }
 0x19a   : > { %v1120_v32 = vpop.f32.mrf.mxu0  ;;  %v1133_v7 = vpop.f32.mrf.mxu1 }
 0x19b   : > { %v1121_v1 = vadd.f32 %v1120_v32, %v4026_v42  ;;  %v4032_v42 = vperm.slane %v485_v13, 3 }
 0x19d   : > { %v1134_v28 = vadd.f32 %v1133_v7, %v1121_v1 }
 0x19f   : > { %v2795_v6 = vmul.f32 -1.442695, %v1134_v28 }
 0x1a1   : > { %3082 = vpow2.f32 %v2795_v6  ;;  %v1146_v24 = vpop.f32.mrf.mxu2  ;;  %v1159_v29 = vpop.f32.mrf.mxu3 }
 0x1a2   : > { %v1147_v20 = vadd.f32 %v1146_v24, %v4029_v33  ;;  %v1122_v15 = vpop.f32.mrf.mxu0  ;;  %v1135_v25 = vpop.f32.mrf.mxu1  ;;  %v4034_v24 = vperm.slane %v485_v13, 2 }
 0x1a4   : > { %v1160_v51 = vadd.f32 %v1159_v29, %v1147_v20  ;;  %4583 = vst [vmem:[#allocation82_spill] sm:$0xff] %v4034_v24 }
 0x1a6   : > { %v2796_v31 = vmul.f32 -1.442695, %v1160_v51 }
 0x1a7   : > { %v3083_v57 = vpop.eup %3082 }
 0x1a8   : > { %v1218_v52 = vadd.f32 1.0, %v3083_v57  ;;  %3084 = vpow2.f32 %v2796_v31 }
 0x1a9   : > { %v1148_v45 = vpop.f32.mrf.mxu2  ;;  %v1161_v2 = vpop.f32.mrf.mxu3 }
 0x1aa   : > { %3086 = vrcp.f32 %v1218_v52  ;;  %v1172_v32 = vpop.f32.mrf.mxu0  ;;  %v1185_v1 = vpop.f32.mrf.mxu1  ;;  %vm1224_vm12 = vweird.f32 %v1218_v52 }
 0x1ab   : > { %v1173_v2 = vadd.f32 %v1172_v32, %v4034_v24 }
 0x1ad   : > { %v1186_v17 = vadd.f32 %v1185_v1, %v1173_v2 }
 0x1ae   : > { %v3085_v7 = vpop.eup %3084 }
 0x1af   : > { %v1237_v6 = vadd.f32 1.0, %v3085_v7 }
 0x1b0   : > { %v3087_v28 = vpop.eup %3086 }
 0x1b1   : > { %v1220_v46 = vmul.f32 %v3087_v28, %v1218_v52  ;;  %3088 = vrcp.f32 %v1237_v6  ;;  %v1198_v25 = vpop.f32.mrf.mxu2  ;;  %v1211_v29 = vpop.f32.mrf.mxu3  ;;  %vm1225_vm13 = vweird.f32 %v3087_v28  ;;  %vm1243_vm15 = vweird.f32 %v1237_v6 }
 0x1b2   : > { %v1199_v31 = vadd.f32 %v1198_v25, %v4032_v42  ;;  %v1174_v20 = vpop.f32.mrf.mxu0  ;;  %v1187_v57 = vpop.f32.mrf.mxu1  ;;  %v1249_v25 = vand.u32 2147483648, %v1237_v6  ;;  %vm4040_vm0 = vmor %vm1224_vm12, %vm1225_vm13 }
 0x1b3   : > { %v1221_v51 = vsub.f32 1.0, %v1220_v46  ;;  %v1228_v20 = vand.u32 2147483647, %v1218_v52  ;;  %v1230_v46 = vand.u32 2147483648, %v1218_v52 }
 0x1b4   : > { %v1212_v15 = vadd.f32 %v1211_v29, %v1199_v31  ;;  %v1247_v29 = vand.u32 2147483647, %v1237_v6 }
 0x1b5   : > { %v1222_v45 = vmul.f32 %v3087_v28, %v1221_v51  ;;  %vm1229_vm2 = vcmp.eq.f32.partialorder %v1228_v20, 8.507059e+37 }
 0x1b6   : > { %v2797_v33 = vmul.f32 -1.442695, %v1212_v15  ;;  %vm1248_vm3 = vcmp.eq.f32.partialorder %v1247_v29, 8.507059e+37 }
 0x1b7   : > { %v3089_v7 = vpop.eup %3088  ;;  %v1223_v50 = vadd.f32 %v3087_v28, %v1222_v45  ;;  %v1250_v45 = vor.u32 1.1754944e-38, %v1249_v25 }
 0x1b8   : > { %v1239_v54 = vmul.f32 %v3089_v7, %v1237_v6  ;;  %3090 = vpow2.f32 %v2797_v33  ;;  %vm1244_vm14 = vweird.f32 %v3089_v7  ;;  %v2801_v6 = vld [vmem:[%s3580_s26 + $0x38] sm:$0xff] }
 0x1b9   : > { %v1200_v13 = vpop.f32.mrf.mxu2  ;;  %v1213_v16 = vpop.f32.mrf.mxu3  ;;  %3092 = vtanh.f32 %v1186_v17  ;;  %vm1245_vm1 = vmor %vm1243_vm15, %vm1244_vm14 }
 0x1ba   : > { %v1240_v12 = vsub.f32 1.0, %v1239_v54  ;;  %v1227_v54 = vsel %vm4040_vm0, %v3087_v28, %v1223_v50  ;;  %v1231_v13 = vor.u32 1.1754944e-38, %v1230_v46 }
 0x1bb   : > { %v1295_v31 = vpop.f32.mrf.mxu0  ;;  %v1308_v32 = vpop.f32.mrf.mxu1 }
 0x1bc   : > { %v1241_v57 = vmul.f32 %v3089_v7, %v1240_v12  ;;  %v1338_v51 = vadd.f32 %v2798_v62, %v1295_v31  ;;  %v1339_v15 = vadd.f32 %v2799_v37, %v1308_v32  ;;  %v487_v12 = vld [vmem:[#allocation5] sm:$0xff]  ;;  %v1232_v31 = vsel %vm1229_vm2, %v1231_v13, %v1227_v54 }
 0x1be   : > { %v3091_v16 = vpop.eup %3090  ;;  %v1242_v1 = vadd.f32 %v3089_v7, %v1241_v57  ;;  %v2802_v52 = vmul.f32 -1.442695, %v1338_v51  ;;  %v2803_v2 = vmul.f32 -1.442695, %v1339_v15 }
 0x1bf   : > { %v1257_v62 = vadd.f32 1.0, %v3091_v16  ;;  %v3093_v28 = vpop.eup %3092 }
 0x1c0   : > { %v1246_v37 = vsel %vm1245_vm1, %v3089_v7, %v1242_v1  ;;  %3094 = vpow2.f32 %v2802_v52  ;;  %v1274_v25 = vmul.f32 %v3093_v28, %v1232_v31 }
 0x1c1   : > { %v1251_v32 = vsel %vm1248_vm3, %v1250_v45, %v1246_v37  ;;  %3096 = vrcp.f32 %v1257_v62  ;;  %v1267_v37 = vand.u32 2147483647, %v1257_v62  ;;  %vm1263_vm5 = vweird.f32 %v1257_v62 }
 0x1c2   : > { %v1273_v17 = vmul.f32 %v1251_v32, %v487_v12  ;;  %3098 = vpow2.f32 %v2803_v2  ;;  %v1269_v12 = vand.u32 2147483648, %v1257_v62 }
 0x1c3   : > { %v1321_v33 = vpop.f32.mrf.mxu2  ;;  %v1334_v50 = vpop.f32.mrf.mxu3  ;;  %vm1268_vm7 = vcmp.eq.f32.partialorder %v1267_v37, 8.507059e+37 }
 0x1c4   : > { %v1341_v57 = vadd.f32 %v2801_v6, %v1334_v50  ;;  %v1297_v51 = vpop.f32.mrf.mxu0  ;;  %v1310_v15 = vpop.f32.mrf.mxu1  ;;  %v4047_v16 = vadd.f32 %v1274_v25, %v1273_v17  ;;  %v2800_v6 = vld [vmem:[%s3580_s26 + $0x30] sm:$0xff]  ;;  %v1270_v50 = vor.u32 1.1754944e-38, %v1269_v12 }
 0x1c5   : > { %v1340_v28 = vadd.f32 %v2800_v6, %v1321_v33 }
 0x1c6   : > { %v2804_v24 = vmul.f32 -1.442695, %v1341_v57  ;;  %v3095_v46 = vpop.eup %3094  ;;  %4586 = vst [vmem:[#allocation83_spill] sm:$0xff] %v4047_v16 }
 0x1c7   : > { %v3097_v7 = vpop.eup %3096  ;;  %v1345_v20 = vadd.f32 1.0, %v3095_v46 }
 0x1c8   : > { %3100 = vpow2.f32 %v2804_v24  ;;  %v3099_v29 = vpop.eup %3098  ;;  %v1259_v54 = vmul.f32 %v3097_v7, %v1257_v62  ;;  %vm1264_vm4 = vweird.f32 %v3097_v7 }
 0x1c9   : > { %3102 = vrcp.f32 %v1345_v20  ;;  %v1364_v1 = vadd.f32 1.0, %v3099_v29  ;;  %vm1265_vm6 = vmor %vm1263_vm5, %vm1264_vm4  ;;  %vm1351_vm9 = vweird.f32 %v1345_v20 }
 0x1ca   : > { %3104 = vtanh.f32 %v4047_v16  ;;  %v1260_v52 = vsub.f32 1.0, %v1259_v54 }
 0x1cb   : > { %v1323_v2 = vpop.f32.mrf.mxu2  ;;  %v1336_v45 = vpop.f32.mrf.mxu3  ;;  %3106 = vrcp.f32 %v1364_v1  ;;  %v1376_v16 = vand.u32 2147483648, %v1364_v1  ;;  %v1374_v37 = vand.u32 2147483647, %v1364_v1  ;;  %vm1370_vm12 = vweird.f32 %v1364_v1 }
 0x1cc   : > { %v1261_v13 = vmul.f32 %v3097_v7, %v1260_v52  ;;  %v1355_v2 = vand.u32 2147483647, %v1345_v20  ;;  %v1357_v45 = vand.u32 2147483648, %v1345_v20 }
 0x1cd   : > { %vm1375_vm15 = vcmp.eq.f32.partialorder %v1374_v37, 8.507059e+37 }
 0x1ce   : > { %v3101_v31 = vpop.eup %3100  ;;  %v1262_v32 = vadd.f32 %v3097_v7, %v1261_v13  ;;  %v1358_v6 = vor.u32 1.1754944e-38, %v1357_v45  ;;  %vm1356_vm13 = vcmp.eq.f32.partialorder %v1355_v2, 8.507059e+37 }
 0x1cf   : > { %v1384_v17 = vadd.f32 1.0, %v3101_v31  ;;  %v3103_v24 = vpop.eup %3102 }
 0x1d0   : > { %v3105_v57 = vpop.eup %3104  ;;  %v1266_v51 = vsel %vm1265_vm6, %v3097_v7, %v1262_v32  ;;  %v1347_v15 = vmul.f32 %v3103_v24, %v1345_v20  ;;  %vm1352_vm8 = vweird.f32 %v3103_v24 }
 0x1d1   : > { %3108 = vrcp.f32 %v1384_v17  ;;  %v3107_v25 = vpop.eup %3106  ;;  %v1271_v46 = vsel %vm1268_vm7, %v1270_v50, %v1266_v51  ;;  %vm1353_vm11 = vmor %vm1351_vm9, %vm1352_vm8  ;;  %v1377_v51 = vor.u32 1.1754944e-38, %v1376_v16  ;;  %vm1390_vm1 = vweird.f32 %v1384_v17 }
 0x1d2   : > { %v1277_v29 = vmul.f32 %v3105_v57, %v1271_v46  ;;  %v1348_v54 = vsub.f32 1.0, %v1347_v15  ;;  %v1366_v52 = vmul.f32 %v3107_v25, %v1364_v1  ;;  %3110 = vtanh.f32 %v1340_v28 }
 0x1d3   : > { %vm1371_vm10 = vweird.f32 %v3107_v25  ;;  %v1396_v1 = vand.u32 2147483648, %v1384_v17 }
 0x1d4   : > { %v1278_v13 = vpack.c.bf16 %v1277_v29, %v1277_v29  ;;  %v1367_v62 = vsub.f32 1.0, %v1366_v52  ;;  %v1349_v31 = vmul.f32 %v3103_v24, %v1348_v54  ;;  %vm1372_vm14 = vmor %vm1370_vm12, %vm1371_vm10 }
 0x1d5   : > { %v1397_v2 = vor.u32 1.1754944e-38, %v1396_v1  ;;  %v4599_v1 = vld [vmem:[#allocation34_spill] sm:$0xff] }
 0x1d6   : > { %1279 = vst [vmem:[#allocation2 + $0x4] sm:$0xf] %v1278_v13  ;;  %v1368_v7 = vmul.f32 %v3107_v25, %v1367_v62  ;;  %v1350_v12 = vadd.f32 %v3103_v24, %v1349_v31 }
 0x1d7   : > { %v3109_v33 = vpop.eup %3108 }
 0x1d8   : > { %v1386_v32 = vmul.f32 %v3109_v33, %v1384_v17  ;;  %v1354_v50 = vsel %vm1353_vm11, %v3103_v24, %v1350_v12  ;;  %v1369_v57 = vadd.f32 %v3107_v25, %v1368_v7  ;;  %v3111_v28 = vpop.eup %3110  ;;  %vm1391_vm0 = vweird.f32 %v3109_v33 }
 0x1d9   : > { %v1359_v15 = vsel %vm1356_vm13, %v1358_v6, %v1354_v50  ;;  %v1394_v24 = vand.u32 2147483647, %v1384_v17  ;;  %vm1392_vm2 = vmor %vm1390_vm1, %vm1391_vm0 }
 0x1da   : > { %v1387_v46 = vsub.f32 1.0, %v1386_v32  ;;  %v1373_v29 = vsel %vm1372_vm14, %v3107_v25, %v1369_v57  ;;  %v1401_v20 = vmul.f32 %v3111_v28, %v1359_v15  ;;  %v4588_v57 = vld [vmem:[#allocation23_spill] sm:$0xff]  ;;  %v4589_v28 = vld [vmem:[#allocation24_spill] sm:$0xff]  ;;  %v4591_v15 = vld [vmem:[#allocation26_spill] sm:$0xff] }
 0x1db   : > { %v1378_v54 = vsel %vm1375_vm15, %v1377_v51, %v1373_v29  ;;  %vm1395_vm3 = vcmp.eq.f32.partialorder %v1394_v24, 8.507059e+37  ;;  %v4590_v51 = vld [vmem:[#allocation25_spill] sm:$0xff]  ;;  %v4593_v29 = vld [vmem:[#allocation28_spill] sm:$0xff]  ;;  %v4600_v24 = vld [vmem:[#allocation35_spill] sm:$0xff] }
 0x1dc   : > { %v1388_v52 = vmul.f32 %v3109_v33, %v1387_v46  ;;  %v1400_v13 = vmul.f32 %v1378_v54, %v3924_v63  ;;  %v4592_v46 = vld [vmem:[#allocation27_spill] sm:$0xff]  ;;  %v4595_v54 = vld [vmem:[#allocation30_spill] sm:$0xff] }
 0x1de   : > { %v4052_v62 = vadd.f32 %v1401_v20, %v1400_v13  ;;  %v1389_v45 = vadd.f32 %v3109_v33, %v1388_v52  ;;  %v4594_v20 = vld [vmem:[#allocation29_spill] sm:$0xff]  ;;  %v4596_v52 = vld [vmem:[#allocation31_spill] sm:$0xff]  ;;  %v4597_v13 = vld [vmem:[#allocation32_spill] sm:$0xff] }
 0x1e0   : > { %3112 = vtanh.f32 %v4052_v62  ;;  %v1393_v16 = vsel %vm1392_vm2, %v3109_v33, %v1389_v45  ;;  %v4587_v33 = vld [vmem:[#allocation22_spill] sm:$0xff]  ;;  %v4598_v45 = vld [vmem:[#allocation33_spill] sm:$0xff] }
 0x1e1   : > { %v1398_v31 = vsel %vm1395_vm3, %v1397_v2, %v1393_v16  ;;  %v4601_v16 = vld [vmem:[#allocation36_spill] sm:$0xff]  ;;  %v4602_v2 = vld [vmem:[#allocation37_spill] sm:$0xff] }
 0x1e6   : > { %v3113_v25 = vpop.eup %3112 }
 0x1e7   : > { %v1404_v7 = vmul.f32 %v3113_v25, %v1398_v31  ;;  %v4603_v25 = vld [vmem:[#allocation38_spill] sm:$0xff]  ;;  %v4604_v31 = vld [vmem:[#allocation39_spill] sm:$0xff] }
 0x1e9   : > { %v1405_v12 = vpack.c.bf16 %v1404_v7, %v1404_v7  ;;  %v4605_v7 = vld [vmem:[#allocation40_spill] sm:$0xff] }
 0x1eb   : > { %1406 = vst [vmem:[#allocation2] sm:$0xf] %v1405_v12  ;;  %v4606_v12 = vld [vmem:[#allocation41_spill] sm:$0xff] }
 0x1f2   : > { %v1407_v37 = vld [vmem:[#allocation2] sm:$0xff] }
 0x1f3   : > { %v1409_v63 = vunpack.c.l.b16 %v1407_v37  ;;  %v1410_v6 = vunpack.c.h.b16 %v1407_v37  ;;  %v1584_v17 = vld [vmem:[#allocation2] sm:$0xf]  ;;  %v4607_v37 = vld [vmem:[#allocation42_spill] sm:$0xff] }
 0x1f5   : > { %v1411_v32 = vpack.c.b16 %v1409_v63, %v1409_v63  ;;  %v1412_v50 = vpack.c.b16 %v1410_v6, %v1410_v6  ;;  %v4608_v63 = vld [vmem:[#allocation43_spill] sm:$0xff]  ;;  %v4609_v6 = vld [vmem:[#allocation44_spill] sm:$0xff] }
 0x1f7   : > { %1423 = vmatmul.bf16.vlgmr.msra.gmra.mxu0 %v1411_v32  ;;  %1436 = vmatmul.bf16.vlgmr.msra.gmra.mxu1 %v1412_v50 }
 0x1f8   : > { %1449 = vmatmul.bf16.vlgmr.msra.gmra.mxu2 %v1411_v32  ;;  %1462 = vmatmul.bf16.vlgmr.msra.gmra.mxu3 %v1412_v50 }
 0x1f9   : > { %1590 = vmatpush.bf16.msra.mxu0 %v3596_v5  ;;  %1603 = vmatpush.bf16.msra.mxu1 %v3598_v9 }
 0x1fa   : > { %1616 = vmatpush.bf16.msra.mxu2 %v3611_v23  ;;  %1629 = vmatpush.bf16.msra.mxu3 %v3600_v10 }
 0x1fd   : > { %1591 = vmatpush.bf16.msra.mxu0 %v3603_v14  ;;  %1604 = vmatpush.bf16.msra.mxu1 %v3607_v18 }
 0x1fe   : > { %1617 = vmatpush.bf16.msra.mxu2 %v3623_v36  ;;  %1630 = vmatpush.bf16.msra.mxu3 %v3609_v19 }
 0x201   : > { %1592 = vmatpush.bf16.msra.mxu0 %v3615_v30  ;;  %1605 = vmatpush.bf16.msra.mxu1 %v3619_v34 }
 0x202   : > { %1618 = vmatpush.bf16.msra.mxu2 %v3629_v44  ;;  %1631 = vmatpush.bf16.msra.mxu3 %v3621_v35 }
 0x205   : > { %1593 = vmatpush.bf16.msra.mxu0 %v3627_v43  ;;  %1606 = vmatpush.bf16.msra.mxu1 %v3633_v47 }
 0x206   : > { %1619 = vmatpush.bf16.msra.mxu2 %v3641_v56  ;;  %1632 = vmatpush.bf16.msra.mxu3 %v3635_v48 }
 0x207   : > { %1475 = vmatmul.bf16.vlgmr.msrb.gmra.mxu0 %v1411_v32  ;;  %1488 = vmatmul.bf16.vlgmr.msrb.gmra.mxu1 %v1412_v50 }
 0x208   : > { %1501 = vmatmul.bf16.vlgmr.msrb.gmra.mxu2 %v1411_v32  ;;  %1514 = vmatmul.bf16.vlgmr.msrb.gmra.mxu3 %v1412_v50  ;;  %v4610_v32 = vld [vmem:[#allocation45_spill] sm:$0xff]  ;;  %v4611_v50 = vld [vmem:[#allocation46_spill] sm:$0xff] }
 0x209   : > { %1594 = vmatpush.bf16.msra.mxu0 %v3639_v55  ;;  %1607 = vmatpush.bf16.msra.mxu1 %v3645_v59 }
 0x20a   : > { %1620 = vmatpush.bf16.msra.mxu2 %v3653_v4  ;;  %1633 = vmatpush.bf16.msra.mxu3 %v3647_v60 }
 0x20d   : > { %1595 = vmatpush.bf16.msra.mxu0 %v3651_v3  ;;  %1608 = vmatpush.bf16.msra.mxu1 %v3657_v8 }
 0x20e   : > { %1621 = vmatpush.bf16.msra.mxu2 %v3665_v22  ;;  %1634 = vmatpush.bf16.msra.mxu3 %v3659_v11 }
 0x211   : > { %1596 = vmatpush.bf16.msra.mxu0 %v3663_v21  ;;  %1609 = vmatpush.bf16.msra.mxu1 %v3669_v26 }
 0x212   : > { %1622 = vmatpush.bf16.msra.mxu2 %v3677_v39  ;;  %1635 = vmatpush.bf16.msra.mxu3 %v3671_v27 }
 0x215   : > { %1597 = vmatpush.bf16.msra.mxu0 %v3675_v38  ;;  %1610 = vmatpush.bf16.msra.mxu1 %v3681_v40 }
 0x216   : > { %1623 = vmatpush.bf16.msra.mxu2 %v3689_v49  ;;  %1636 = vmatpush.bf16.msra.mxu3 %v3683_v41 }
 0x218   : > { %1598 = vmatmul.bf16.vlgmr.msra.gmra.mxu0 %v1584_v17  ;;  %1611 = vmatmul.bf16.vlgmr.msra.gmra.mxu1 %v1584_v17 }
 0x219   : > { %1719 = vmatpush.bf16.msrb.mxu0 %v3692_v53  ;;  %1732 = vmatpush.bf16.msrb.mxu1 %v3694_v61 }
 0x21a   : > { %1624 = vmatmul.bf16.vlgmr.msra.gmra.mxu2 %v1584_v17  ;;  %1637 = vmatmul.bf16.vlgmr.msra.gmra.mxu3 %v1584_v17  ;;  %v4612_v17 = vld [vmem:[#allocation47_spill] sm:$0xff] }
 0x21b   : > { %1745 = vmatpush.bf16.msrb.mxu2 %v4527_v58  ;;  %1758 = vmatpush.bf16.msrb.mxu3 %v4528_v0 }
 0x21d   : > { %1720 = vmatpush.bf16.msrb.mxu0 %v4587_v33  ;;  %1733 = vmatpush.bf16.msrb.mxu1 %v4588_v57 }
 0x21f   : > { %1746 = vmatpush.bf16.msrb.mxu2 %v4589_v28  ;;  %1759 = vmatpush.bf16.msrb.mxu3 %v4590_v51  ;;  %v2808_v51 = vld [vmem:[%s3580_s26 + $0x40] sm:$0xff]  ;;  %v2809_v28 = vld [vmem:[%s3580_s26 + $0x48] sm:$0xff] }
 0x221   : > { %1721 = vmatpush.bf16.msrb.mxu0 %v4591_v15  ;;  %1734 = vmatpush.bf16.msrb.mxu1 %v4592_v46 }
 0x223   : > { %1747 = vmatpush.bf16.msrb.mxu2 %v4593_v29  ;;  %1760 = vmatpush.bf16.msrb.mxu3 %v4594_v20 }
 0x225   : > { %1722 = vmatpush.bf16.msrb.mxu0 %v4595_v54  ;;  %1735 = vmatpush.bf16.msrb.mxu1 %v4596_v52 }
 0x227   : > { %1748 = vmatpush.bf16.msrb.mxu2 %v4597_v13  ;;  %1761 = vmatpush.bf16.msrb.mxu3 %v4598_v45 }
 0x229   : > { %1723 = vmatpush.bf16.msrb.mxu0 %v4599_v1  ;;  %1736 = vmatpush.bf16.msrb.mxu1 %v4600_v24 }
 0x22b   : > { %1749 = vmatpush.bf16.msrb.mxu2 %v4601_v16  ;;  %1762 = vmatpush.bf16.msrb.mxu3 %v4602_v2  ;;  %v4613_v2 = vld [vmem:[#allocation50_spill] sm:$0xff]  ;;  %v4647_v16 = vld [vmem:[#allocation20_spill] sm:$0xff] }
 0x22d   : > { %1724 = vmatpush.bf16.msrb.mxu0 %v4603_v25  ;;  %1737 = vmatpush.bf16.msrb.mxu1 %v4604_v31  ;;  %v4614_v25 = vld [vmem:[#allocation51_spill] sm:$0xff]  ;;  %v4615_v31 = vld [vmem:[#allocation48_spill] sm:$0xff] }
 0x22f   : > { %1750 = vmatpush.bf16.msrb.mxu2 %v4605_v7  ;;  %1763 = vmatpush.bf16.msrb.mxu3 %v4606_v12  ;;  %v4616_v7 = vld [vmem:[#allocation49_spill] sm:$0xff]  ;;  %v4617_v12 = vld [vmem:[#allocation52_spill] sm:$0xff] }
 0x231   : > { %1725 = vmatpush.bf16.msrb.mxu0 %v4607_v37  ;;  %1738 = vmatpush.bf16.msrb.mxu1 %v4608_v63  ;;  %v4618_v37 = vld [vmem:[#allocation53_spill] sm:$0xff]  ;;  %v4619_v63 = vld [vmem:[#allocation54_spill] sm:$0xff] }
 0x233   : > { %1751 = vmatpush.bf16.msrb.mxu2 %v4609_v6  ;;  %1764 = vmatpush.bf16.msrb.mxu3 %v4610_v32  ;;  %v4620_v6 = vld [vmem:[#allocation55_spill] sm:$0xff]  ;;  %v4621_v32 = vld [vmem:[#allocation56_spill] sm:$0xff] }
 0x235   : > { %1726 = vmatpush.bf16.msrb.mxu0 %v4611_v50  ;;  %1739 = vmatpush.bf16.msrb.mxu1 %v4612_v17  ;;  %v4622_v50 = vld [vmem:[#allocation57_spill] sm:$0xff]  ;;  %v4623_v17 = vld [vmem:[#allocation58_spill] sm:$0xff] }
 0x237   : > { %1752 = vmatpush.bf16.msrb.mxu2 %v4615_v31  ;;  %1765 = vmatpush.bf16.msrb.mxu3 %v4616_v7  ;;  %v4626_v31 = vld [vmem:[#allocation61_spill] sm:$0xff]  ;;  %v4627_v7 = vld [vmem:[#allocation62_spill] sm:$0xff] }
 0x239   : > { %1771 = vmatpush.bf16.msra.mxu0 %v4613_v2  ;;  %1784 = vmatpush.bf16.msra.mxu1 %v4614_v25  ;;  %v4624_v2 = vld [vmem:[#allocation59_spill] sm:$0xff]  ;;  %v4625_v25 = vld [vmem:[#allocation60_spill] sm:$0xff] }
 0x23b   : > { %1797 = vmatpush.bf16.msra.mxu2 %v4617_v12  ;;  %1810 = vmatpush.bf16.msra.mxu3 %v4618_v37  ;;  %v4628_v12 = vld [vmem:[#allocation63_spill] sm:$0xff]  ;;  %v4629_v37 = vld [vmem:[#allocation64_spill] sm:$0xff] }
 0x23d   : > { %1772 = vmatpush.bf16.msra.mxu0 %v4619_v63  ;;  %1785 = vmatpush.bf16.msra.mxu1 %v4620_v6  ;;  %v4630_v63 = vld [vmem:[#allocation65_spill] sm:$0xff]  ;;  %v4631_v6 = vld [vmem:[#allocation66_spill] sm:$0xff] }
 0x23f   : > { %1798 = vmatpush.bf16.msra.mxu2 %v4621_v32  ;;  %1811 = vmatpush.bf16.msra.mxu3 %v4622_v50  ;;  %v4632_v32 = vld [vmem:[#allocation67_spill] sm:$0xff]  ;;  %v4633_v50 = vld [vmem:[#allocation68_spill] sm:$0xff] }
 0x241   : > { %1773 = vmatpush.bf16.msra.mxu0 %v4623_v17  ;;  %1786 = vmatpush.bf16.msra.mxu1 %v4624_v2  ;;  %v4634_v17 = vld [vmem:[#allocation69_spill] sm:$0xff]  ;;  %v4635_v2 = vld [vmem:[#allocation70_spill] sm:$0xff] }
 0x243   : > { %1799 = vmatpush.bf16.msra.mxu2 %v4625_v25  ;;  %1812 = vmatpush.bf16.msra.mxu3 %v4626_v31  ;;  %v4636_v25 = vld [vmem:[#allocation71_spill] sm:$0xff]  ;;  %v4637_v31 = vld [vmem:[#allocation72_spill] sm:$0xff] }
 0x245   : > { %1774 = vmatpush.bf16.msra.mxu0 %v4627_v7  ;;  %1787 = vmatpush.bf16.msra.mxu1 %v4628_v12  ;;  %v4638_v7 = vld [vmem:[#allocation73_spill] sm:$0xff]  ;;  %v4639_v12 = vld [vmem:[#allocation74_spill] sm:$0xff] }
 0x247   : > { %1800 = vmatpush.bf16.msra.mxu2 %v4629_v37  ;;  %1813 = vmatpush.bf16.msra.mxu3 %v4630_v63  ;;  %v4640_v37 = vld [vmem:[#allocation75_spill] sm:$0xff]  ;;  %v4641_v63 = vld [vmem:[#allocation76_spill] sm:$0xff] }
 0x249   : > { %1775 = vmatpush.bf16.msra.mxu0 %v4631_v6  ;;  %1788 = vmatpush.bf16.msra.mxu1 %v4632_v32  ;;  %v4642_v6 = vld [vmem:[#allocation77_spill] sm:$0xff]  ;;  %v4643_v32 = vld [vmem:[#allocation78_spill] sm:$0xff] }
 0x24b   : > { %1801 = vmatpush.bf16.msra.mxu2 %v4633_v50  ;;  %1814 = vmatpush.bf16.msra.mxu3 %v4634_v17  ;;  %v4644_v50 = vld [vmem:[#allocation79_spill] sm:$0xff]  ;;  %v4645_v17 = vld [vmem:[#allocation80_spill] sm:$0xff] }
 0x24d   : > { %1776 = vmatpush.bf16.msra.mxu0 %v4635_v2  ;;  %1789 = vmatpush.bf16.msra.mxu1 %v4636_v25  ;;  %v4646_v2 = vld [vmem:[#allocation81_spill] sm:$0xff] }
 0x24f   : > { %1802 = vmatpush.bf16.msra.mxu2 %v4637_v31  ;;  %1815 = vmatpush.bf16.msra.mxu3 %v4638_v7 }
 0x251   : > { %1777 = vmatpush.bf16.msra.mxu0 %v4639_v12  ;;  %1790 = vmatpush.bf16.msra.mxu1 %v4640_v37 }
 0x253   : > { %1803 = vmatpush.bf16.msra.mxu2 %v4641_v63  ;;  %1816 = vmatpush.bf16.msra.mxu3 %v4642_v6  ;;  %v4648_v63 = vld [vmem:[#allocation21_spill] sm:$0xff] }
 0x255   : > { %1778 = vmatpush.bf16.msra.mxu0 %v4643_v32  ;;  %1791 = vmatpush.bf16.msra.mxu1 %v4644_v50 }
 0x257   : > { %1804 = vmatpush.bf16.msra.mxu2 %v4645_v17  ;;  %1817 = vmatpush.bf16.msra.mxu3 %v4646_v2 }
 0x274   : > { %v1424_v25 = vpop.f32.mrf.mxu0  ;;  %v1437_v31 = vpop.f32.mrf.mxu1 }
 0x275   : > { %v1425_v7 = vadd.f32 %v1424_v25, %v4647_v16 }
 0x277   : > { %v1438_v24 = vadd.f32 %v1437_v31, %v1425_v7 }
 0x279   : > { %v2805_v12 = vmul.f32 -1.442695, %v1438_v24 }
 0x27b   : > { %3114 = vpow2.f32 %v2805_v12  ;;  %v1450_v37 = vpop.f32.mrf.mxu2  ;;  %v1463_v1 = vpop.f32.mrf.mxu3 }
 0x27c   : > { %v1451_v45 = vadd.f32 %v1450_v37, %v4648_v63  ;;  %v1426_v6 = vpop.f32.mrf.mxu0  ;;  %v1439_v13 = vpop.f32.mrf.mxu1 }
 0x27e   : > { %v1464_v32 = vadd.f32 %v1463_v1, %v1451_v45 }
 0x280   : > { %v2806_v52 = vmul.f32 -1.442695, %v1464_v32  ;;  %v4649_v32 = vld [vmem:[#allocation82_spill] sm:$0xff] }
 0x281   : > { %v3115_v50 = vpop.eup %3114 }
 0x282   : > { %v1522_v54 = vadd.f32 1.0, %v3115_v50  ;;  %3116 = vpow2.f32 %v2806_v52 }
 0x283   : > { %v1452_v17 = vpop.f32.mrf.mxu2  ;;  %v1465_v2 = vpop.f32.mrf.mxu3 }
 0x284   : > { %3118 = vrcp.f32 %v1522_v54  ;;  %v1476_v20 = vpop.f32.mrf.mxu0  ;;  %v1489_v29 = vpop.f32.mrf.mxu1  ;;  %vm1528_vm4 = vweird.f32 %v1522_v54 }
 0x285   : > { %v1477_v2 = vadd.f32 %v1476_v20, %v4649_v32 }
 0x288   : > { %v3117_v25 = vpop.eup %3116 }
 0x289   : > { %v1541_v31 = vadd.f32 1.0, %v3117_v25  ;;  %v1490_v25 = vadd.f32 %v1489_v29, %v1477_v2 }
 0x28a   : > { %v3119_v24 = vpop.eup %3118 }
 0x28b   : > { %v1524_v7 = vmul.f32 %v3119_v24, %v1522_v54  ;;  %3120 = vrcp.f32 %v1541_v31  ;;  %v1502_v12 = vpop.f32.mrf.mxu2  ;;  %v1515_v37 = vpop.f32.mrf.mxu3  ;;  %vm1529_vm5 = vweird.f32 %v3119_v24  ;;  %vm1547_vm7 = vweird.f32 %v1541_v31 }
 0x28c   : > { %v1503_v13 = vadd.f32 %v1502_v12, %v4032_v42  ;;  %v1478_v45 = vpop.f32.mrf.mxu0  ;;  %v1491_v1 = vpop.f32.mrf.mxu1  ;;  %v1553_v12 = vand.u32 2147483648, %v1541_v31  ;;  %vm4157_vm8 = vmor %vm1528_vm4, %vm1529_vm5 }
 0x28d   : > { %v1525_v6 = vsub.f32 1.0, %v1524_v7  ;;  %v1532_v45 = vand.u32 2147483647, %v1522_v54  ;;  %v1534_v7 = vand.u32 2147483648, %v1522_v54 }
 0x28e   : > { %v1516_v52 = vadd.f32 %v1515_v37, %v1503_v13  ;;  %v1551_v37 = vand.u32 2147483647, %v1541_v31 }
 0x28f   : > { %v1526_v50 = vmul.f32 %v3119_v24, %v1525_v6  ;;  %vm1533_vm10 = vcmp.eq.f32.partialorder %v1532_v45, 8.507059e+37 }
 0x290   : > { %v2807_v17 = vmul.f32 -1.442695, %v1516_v52  ;;  %vm1552_vm11 = vcmp.eq.f32.partialorder %v1551_v37, 8.507059e+37 }
 0x291   : > { %v3121_v63 = vpop.eup %3120  ;;  %v1527_v33 = vadd.f32 %v3119_v24, %v1526_v50  ;;  %v1554_v50 = vor.u32 1.1754944e-38, %v1553_v12 }
 0x292   : > { %v1543_v16 = vmul.f32 %v3121_v63, %v1541_v31  ;;  %3122 = vpow2.f32 %v2807_v17  ;;  %vm1548_vm6 = vweird.f32 %v3121_v63 }
 0x293   : > { %v1504_v46 = vpop.f32.mrf.mxu2  ;;  %v1517_v15 = vpop.f32.mrf.mxu3  ;;  %3124 = vtanh.f32 %v1490_v25  ;;  %v1531_v29 = vsel %vm4157_vm8, %v3119_v24, %v1527_v33  ;;  %vm1549_vm9 = vmor %vm1547_vm7, %vm1548_vm6  ;;  %v4652_v25 = vld [vmem:[#allocation83_spill] sm:$0xff] }
 0x294   : > { %v1544_v57 = vsub.f32 1.0, %v1543_v16 }
 0x295   : > { %v1599_v13 = vpop.f32.mrf.mxu0  ;;  %v1612_v20 = vpop.f32.mrf.mxu1 }
 0x296   : > { %v1545_v1 = vmul.f32 %v3121_v63, %v1544_v57  ;;  %v1642_v6 = vadd.f32 %v2808_v51, %v1599_v13  ;;  %v1643_v52 = vadd.f32 %v2809_v28, %v1612_v20  ;;  %v1535_v57 = vor.u32 1.1754944e-38, %v1534_v7  ;;  %v2811_v51 = vld [vmem:[%s3580_s26 + $0x58] sm:$0xff] }
 0x298   : > { %v3123_v46 = vpop.eup %3122  ;;  %v1546_v16 = vadd.f32 %v3121_v63, %v1545_v1  ;;  %v2812_v54 = vmul.f32 -1.442695, %v1642_v6  ;;  %v2813_v2 = vmul.f32 -1.442695, %v1643_v52  ;;  %v1536_v31 = vsel %vm1533_vm10, %v1535_v57, %v1531_v29 }
 0x299   : > { %v1561_v17 = vadd.f32 1.0, %v3123_v46  ;;  %v3125_v24 = vpop.eup %3124 }
 0x29a   : > { %v1550_v28 = vsel %vm1549_vm9, %v3121_v63, %v1546_v16  ;;  %3126 = vpow2.f32 %v2812_v54  ;;  %v1578_v12 = vmul.f32 %v3125_v24, %v1536_v31 }
 0x29b   : > { %v1555_v13 = vsel %vm1552_vm11, %v1554_v50, %v1550_v28  ;;  %3128 = vrcp.f32 %v1561_v17  ;;  %v1573_v28 = vand.u32 2147483648, %v1561_v17  ;;  %v1571_v31 = vand.u32 2147483647, %v1561_v17 }
 0x29c   : > { %v1577_v20 = vmul.f32 %v1555_v13, %v4652_v25  ;;  %3130 = vpow2.f32 %v2813_v2  ;;  %v2810_v13 = vld [vmem:[%s3580_s26 + $0x50] sm:$0xff]  ;;  %vm1567_vm13 = vweird.f32 %v1561_v17 }
 0x29d   : > { %v1625_v15 = vpop.f32.mrf.mxu2  ;;  %v1638_v33 = vpop.f32.mrf.mxu3  ;;  %vm1572_vm15 = vcmp.eq.f32.partialorder %v1571_v31, 8.507059e+37 }
 0x29e   : > { %v1645_v1 = vadd.f32 %v2811_v51, %v1638_v33  ;;  %v1601_v6 = vpop.f32.mrf.mxu0  ;;  %v1614_v52 = vpop.f32.mrf.mxu1  ;;  %v4165_v45 = vadd.f32 %v1578_v12, %v1577_v20 }
 0x29f   : > { %v1644_v6 = vadd.f32 %v2810_v13, %v1625_v15 }
 0x2a0   : > { %v2814_v7 = vmul.f32 -1.442695, %v1645_v1  ;;  %v3127_v46 = vpop.eup %3126  ;;  %4653 = vst [vmem:[#allocation83_spill] sm:$0xff] %v4165_v45  ;;  %v1574_v1 = vor.u32 1.1754944e-38, %v1573_v28 }
 0x2a1   : > { %v3129_v63 = vpop.eup %3128  ;;  %v1649_v37 = vadd.f32 1.0, %v3127_v46 }
 0x2a2   : > { %3132 = vpow2.f32 %v2814_v7  ;;  %v3131_v29 = vpop.eup %3130  ;;  %v1563_v16 = vmul.f32 %v3129_v63, %v1561_v17  ;;  %vm1568_vm12 = vweird.f32 %v3129_v63 }
 0x2a3   : > { %3134 = vrcp.f32 %v1649_v37  ;;  %v1668_v54 = vadd.f32 1.0, %v3131_v29  ;;  %vm1569_vm14 = vmor %vm1567_vm13, %vm1568_vm12  ;;  %vm1655_vm1 = vweird.f32 %v1649_v37 }
 0x2a4   : > { %3136 = vtanh.f32 %v4165_v45  ;;  %v1564_v2 = vsub.f32 1.0, %v1563_v16  ;;  %v1661_v45 = vand.u32 2147483648, %v1649_v37 }
 0x2a5   : > { %v1627_v50 = vpop.f32.mrf.mxu2  ;;  %v1640_v57 = vpop.f32.mrf.mxu3  ;;  %3138 = vrcp.f32 %v1668_v54  ;;  %v1680_v32 = vand.u32 2147483648, %v1668_v54  ;;  %v1678_v31 = vand.u32 2147483647, %v1668_v54  ;;  %vm1674_vm4 = vweird.f32 %v1668_v54 }
 0x2a6   : > { %v1565_v51 = vmul.f32 %v3129_v63, %v1564_v2  ;;  %v1659_v57 = vand.u32 2147483647, %v1649_v37  ;;  %v1662_v13 = vor.u32 1.1754944e-38, %v1661_v45 }
 0x2a7   : > { %vm1679_vm7 = vcmp.eq.f32.partialorder %v1678_v31, 8.507059e+37 }
 0x2a8   : > { %v3133_v25 = vpop.eup %3132  ;;  %v1566_v20 = vadd.f32 %v3129_v63, %v1565_v51  ;;  %vm1660_vm5 = vcmp.eq.f32.partialorder %v1659_v57, 8.507059e+37 }
 0x2a9   : > { %v1688_v33 = vadd.f32 1.0, %v3133_v25  ;;  %v3135_v24 = vpop.eup %3134 }
 0x2aa   : > { %v3137_v52 = vpop.eup %3136  ;;  %v1570_v12 = vsel %vm1569_vm14, %v3129_v63, %v1566_v20  ;;  %v1651_v7 = vmul.f32 %v3135_v24, %v1649_v37  ;;  %vm1656_vm0 = vweird.f32 %v3135_v24 }
 0x2ab   : > { %3140 = vrcp.f32 %v1688_v33  ;;  %v3139_v46 = vpop.eup %3138  ;;  %v1575_v29 = vsel %vm1572_vm15, %v1574_v1, %v1570_v12  ;;  %vm1657_vm3 = vmor %vm1655_vm1, %vm1656_vm0  ;;  %v1681_v12 = vor.u32 1.1754944e-38, %v1680_v32  ;;  %vm1694_vm9 = vweird.f32 %v1688_v33 }
 0x2ac   : > { %v1581_v16 = vmul.f32 %v3137_v52, %v1575_v29  ;;  %v1652_v2 = vsub.f32 1.0, %v1651_v7  ;;  %v1670_v50 = vmul.f32 %v3139_v46, %v1668_v54  ;;  %3142 = vtanh.f32 %v1644_v6 }
 0x2ad   : > { %vm1675_vm2 = vweird.f32 %v3139_v46  ;;  %v1700_v54 = vand.u32 2147483648, %v1688_v33 }
 0x2ae   : > { %v1582_v51 = vpack.c.bf16 %v1581_v16, %v1581_v16  ;;  %v1671_v17 = vsub.f32 1.0, %v1670_v50  ;;  %v1653_v25 = vmul.f32 %v3135_v24, %v1652_v2  ;;  %vm1676_vm6 = vmor %vm1674_vm4, %vm1675_vm2 }
 0x2af   : > { %v1701_v57 = vor.u32 1.1754944e-38, %v1700_v54  ;;  %v4702_v54 = vld [vmem:[#allocation70_spill] sm:$0xff] }
 0x2b0   : > { %1583 = vst [vmem:[#allocation2 + $0x4] sm:$0xf] %v1582_v51  ;;  %v1672_v63 = vmul.f32 %v3139_v46, %v1671_v17  ;;  %v1654_v28 = vadd.f32 %v3135_v24, %v1653_v25 }
 0x2b1   : > { %v3141_v15 = vpop.eup %3140 }
 0x2b2   : > { %v1690_v20 = vmul.f32 %v3141_v15, %v1688_v33  ;;  %v1658_v1 = vsel %vm1657_vm3, %v3135_v24, %v1654_v28  ;;  %v1673_v52 = vadd.f32 %v3139_v46, %v1672_v63  ;;  %v3143_v6 = vpop.eup %3142  ;;  %vm1695_vm8 = vweird.f32 %v3141_v15 }
 0x2b3   : > { %v1663_v7 = vsel %vm1660_vm5, %v1662_v13, %v1658_v1  ;;  %v1698_v24 = vand.u32 2147483647, %v1688_v33  ;;  %vm1696_vm10 = vmor %vm1694_vm9, %vm1695_vm8  ;;  %v4689_v33 = vld [vmem:[#allocation57_spill] sm:$0xff] }
 0x2b4   : > { %v1691_v29 = vsub.f32 1.0, %v1690_v20  ;;  %v1677_v16 = vsel %vm1676_vm6, %v3139_v46, %v1673_v52  ;;  %v1705_v37 = vmul.f32 %v3143_v6, %v1663_v7  ;;  %v4691_v52 = vld [vmem:[#allocation59_spill] sm:$0xff]  ;;  %v4692_v6 = vld [vmem:[#allocation60_spill] sm:$0xff]  ;;  %v4694_v7 = vld [vmem:[#allocation62_spill] sm:$0xff] }
 0x2b5   : > { %v1682_v2 = vsel %vm1679_vm7, %v1681_v12, %v1677_v16  ;;  %vm1699_vm11 = vcmp.eq.f32.partialorder %v1698_v24, 8.507059e+37  ;;  %v4693_v12 = vld [vmem:[#allocation61_spill] sm:$0xff]  ;;  %v4696_v16 = vld [vmem:[#allocation64_spill] sm:$0xff]  ;;  %v4703_v24 = vld [vmem:[#allocation71_spill] sm:$0xff] }
 0x2b6   : > { %v1692_v50 = vmul.f32 %v3141_v15, %v1691_v29  ;;  %v1704_v51 = vmul.f32 %v1682_v2, %v4052_v62  ;;  %v4695_v29 = vld [vmem:[#allocation63_spill] sm:$0xff]  ;;  %v4698_v2 = vld [vmem:[#allocation66_spill] sm:$0xff] }
 0x2b8   : > { %v4170_v17 = vadd.f32 %v1705_v37, %v1704_v51  ;;  %v1693_v45 = vadd.f32 %v3141_v15, %v1692_v50  ;;  %v4697_v37 = vld [vmem:[#allocation65_spill] sm:$0xff]  ;;  %v4699_v50 = vld [vmem:[#allocation67_spill] sm:$0xff]  ;;  %v4700_v51 = vld [vmem:[#allocation68_spill] sm:$0xff] }
 0x2ba   : > { %3144 = vtanh.f32 %v4170_v17  ;;  %v1697_v32 = vsel %vm1696_vm10, %v3141_v15, %v1693_v45  ;;  %v4690_v15 = vld [vmem:[#allocation58_spill] sm:$0xff]  ;;  %v4701_v45 = vld [vmem:[#allocation69_spill] sm:$0xff] }
 0x2bb   : > { %v1702_v25 = vsel %vm1699_vm11, %v1701_v57, %v1697_v32  ;;  %v4704_v32 = vld [vmem:[#allocation72_spill] sm:$0xff]  ;;  %v4705_v57 = vld [vmem:[#allocation73_spill] sm:$0xff] }
 0x2c0   : > { %v3145_v46 = vpop.eup %3144 }
 0x2c1   : > { %v1708_v63 = vmul.f32 %v3145_v46, %v1702_v25  ;;  %v4706_v46 = vld [vmem:[#allocation74_spill] sm:$0xff]  ;;  %v4707_v25 = vld [vmem:[#allocation75_spill] sm:$0xff] }
 0x2c3   : > { %v1709_v28 = vpack.c.bf16 %v1708_v63, %v1708_v63  ;;  %v4708_v63 = vld [vmem:[#allocation76_spill] sm:$0xff] }
 0x2c5   : > { %1710 = vst [vmem:[#allocation2] sm:$0xf] %v1709_v28  ;;  %v4709_v28 = vld [vmem:[#allocation77_spill] sm:$0xff] }
 0x2cc   : > { %v1711_v31 = vld [vmem:[#allocation2] sm:$0xff] }
 0x2cd   : > { %v1713_v62 = vunpack.c.l.b16 %v1711_v31  ;;  %v1714_v13 = vunpack.c.h.b16 %v1711_v31  ;;  %v4710_v31 = vld [vmem:[#allocation78_spill] sm:$0xff] }
 0x2cf   : > { %v1715_v20 = vpack.c.b16 %v1713_v62, %v1713_v62  ;;  %v1716_v1 = vpack.c.b16 %v1714_v13, %v1714_v13  ;;  %v4711_v62 = vld [vmem:[#allocation79_spill] sm:$0xff]  ;;  %v4712_v13 = vld [vmem:[#allocation80_spill] sm:$0xff] }
 0x2d1   : > { %1727 = vmatmul.bf16.vlgmr.msrb.gmra.mxu0 %v1715_v20  ;;  %1740 = vmatmul.bf16.vlgmr.msrb.gmra.mxu1 %v1716_v1 }
 0x2d2   : > { %1753 = vmatmul.bf16.vlgmr.msrb.gmra.mxu2 %v1715_v20  ;;  %1766 = vmatmul.bf16.vlgmr.msrb.gmra.mxu3 %v1716_v1 }
 0x2d3   : > { %1894 = vmatpush.bf16.msrb.mxu0 %v3596_v5  ;;  %1907 = vmatpush.bf16.msrb.mxu1 %v3598_v9  ;;  %v1888_v5 = vld [vmem:[#allocation2] sm:$0xf]  ;;  %v4654_v9 = vld [vmem:[#allocation22_spill] sm:$0xff] }
 0x2d4   : > { %1920 = vmatpush.bf16.msrb.mxu2 %v3611_v23  ;;  %1933 = vmatpush.bf16.msrb.mxu3 %v3600_v10  ;;  %v4655_v10 = vld [vmem:[#allocation23_spill] sm:$0xff] }
 0x2d5   : > { %v4659_v23 = vld [vmem:[#allocation27_spill] sm:$0xff] }
 0x2d7   : > { %1895 = vmatpush.bf16.msrb.mxu0 %v3603_v14  ;;  %1908 = vmatpush.bf16.msrb.mxu1 %v3607_v18  ;;  %v4656_v14 = vld [vmem:[#allocation24_spill] sm:$0xff]  ;;  %v4657_v18 = vld [vmem:[#allocation25_spill] sm:$0xff] }
 0x2d8   : > { %1921 = vmatpush.bf16.msrb.mxu2 %v3623_v36  ;;  %1934 = vmatpush.bf16.msrb.mxu3 %v3609_v19  ;;  %v4658_v19 = vld [vmem:[#allocation26_spill] sm:$0xff]  ;;  %v4663_v36 = vld [vmem:[#allocation31_spill] sm:$0xff] }
 0x2db   : > { %1896 = vmatpush.bf16.msrb.mxu0 %v3615_v30  ;;  %1909 = vmatpush.bf16.msrb.mxu1 %v3619_v34  ;;  %v4660_v30 = vld [vmem:[#allocation28_spill] sm:$0xff]  ;;  %v4661_v34 = vld [vmem:[#allocation29_spill] sm:$0xff] }
 0x2dc   : > { %1922 = vmatpush.bf16.msrb.mxu2 %v3629_v44  ;;  %1935 = vmatpush.bf16.msrb.mxu3 %v3621_v35  ;;  %v4662_v35 = vld [vmem:[#allocation30_spill] sm:$0xff]  ;;  %v4665_v44 = vld [vmem:[#allocation33_spill] sm:$0xff] }
 0x2df   : > { %1897 = vmatpush.bf16.msrb.mxu0 %v3627_v43  ;;  %1910 = vmatpush.bf16.msrb.mxu1 %v3633_v47  ;;  %v4664_v43 = vld [vmem:[#allocation32_spill] sm:$0xff]  ;;  %v4666_v47 = vld [vmem:[#allocation34_spill] sm:$0xff] }
 0x2e0   : > { %1923 = vmatpush.bf16.msrb.mxu2 %v3641_v56  ;;  %1936 = vmatpush.bf16.msrb.mxu3 %v3635_v48  ;;  %v4667_v48 = vld [vmem:[#allocation35_spill] sm:$0xff]  ;;  %v4669_v56 = vld [vmem:[#allocation37_spill] sm:$0xff] }
 0x2e1   : > { %1779 = vmatmul.bf16.vlgmr.msra.gmra.mxu0 %v1715_v20  ;;  %1792 = vmatmul.bf16.vlgmr.msra.gmra.mxu1 %v1716_v1 }
 0x2e2   : > { %1805 = vmatmul.bf16.vlgmr.msra.gmra.mxu2 %v1715_v20  ;;  %1818 = vmatmul.bf16.vlgmr.msra.gmra.mxu3 %v1716_v1  ;;  %v4713_v20 = vld [vmem:[#allocation81_spill] sm:$0xff] }
 0x2e3   : > { %1898 = vmatpush.bf16.msrb.mxu0 %v3639_v55  ;;  %1911 = vmatpush.bf16.msrb.mxu1 %v3645_v59  ;;  %v4668_v55 = vld [vmem:[#allocation36_spill] sm:$0xff]  ;;  %v4670_v59 = vld [vmem:[#allocation38_spill] sm:$0xff] }
 0x2e4   : > { %1924 = vmatpush.bf16.msrb.mxu2 %v3653_v4  ;;  %1937 = vmatpush.bf16.msrb.mxu3 %v3647_v60  ;;  %v4671_v60 = vld [vmem:[#allocation39_spill] sm:$0xff]  ;;  %v4673_v4 = vld [vmem:[#allocation41_spill] sm:$0xff] }
 0x2e7   : > { %1899 = vmatpush.bf16.msrb.mxu0 %v3651_v3  ;;  %1912 = vmatpush.bf16.msrb.mxu1 %v3657_v8  ;;  %v4672_v3 = vld [vmem:[#allocation40_spill] sm:$0xff]  ;;  %v4674_v8 = vld [vmem:[#allocation42_spill] sm:$0xff] }
 0x2e8   : > { %1925 = vmatpush.bf16.msrb.mxu2 %v3665_v22  ;;  %1938 = vmatpush.bf16.msrb.mxu3 %v3659_v11  ;;  %v4675_v11 = vld [vmem:[#allocation43_spill] sm:$0xff]  ;;  %v4677_v22 = vld [vmem:[#allocation45_spill] sm:$0xff] }
 0x2eb   : > { %1900 = vmatpush.bf16.msrb.mxu0 %v3663_v21  ;;  %1913 = vmatpush.bf16.msrb.mxu1 %v3669_v26  ;;  %v4676_v21 = vld [vmem:[#allocation44_spill] sm:$0xff]  ;;  %v4678_v26 = vld [vmem:[#allocation46_spill] sm:$0xff] }
 0x2ec   : > { %1926 = vmatpush.bf16.msrb.mxu2 %v3677_v39  ;;  %1939 = vmatpush.bf16.msrb.mxu3 %v3671_v27  ;;  %v4679_v27 = vld [vmem:[#allocation47_spill] sm:$0xff] }
 0x2ed   : > { %v4681_v39 = vld [vmem:[#allocation51_spill] sm:$0xff] }
 0x2ef   : > { %1901 = vmatpush.bf16.msrb.mxu0 %v3675_v38  ;;  %1914 = vmatpush.bf16.msrb.mxu1 %v3681_v40  ;;  %v4680_v38 = vld [vmem:[#allocation50_spill] sm:$0xff]  ;;  %v4682_v40 = vld [vmem:[#allocation48_spill] sm:$0xff] }
 0x2f0   : > { %1927 = vmatpush.bf16.msrb.mxu2 %v3689_v49  ;;  %1940 = vmatpush.bf16.msrb.mxu3 %v3683_v41  ;;  %v4683_v41 = vld [vmem:[#allocation49_spill] sm:$0xff]  ;;  %v4684_v49 = vld [vmem:[#allocation52_spill] sm:$0xff] }
 0x2f2   : > { %1902 = vmatmul.bf16.vlgmr.msrb.gmra.mxu0 %v1888_v5  ;;  %1915 = vmatmul.bf16.vlgmr.msrb.gmra.mxu1 %v1888_v5 }
 0x2f3   : > { %2023 = vmatpush.bf16.msra.mxu0 %v3692_v53  ;;  %2036 = vmatpush.bf16.msra.mxu1 %v3694_v61  ;;  %v4685_v53 = vld [vmem:[#allocation53_spill] sm:$0xff]  ;;  %v4686_v61 = vld [vmem:[#allocation54_spill] sm:$0xff] }
 0x2f4   : > { %1928 = vmatmul.bf16.vlgmr.msrb.gmra.mxu2 %v1888_v5  ;;  %1941 = vmatmul.bf16.vlgmr.msrb.gmra.mxu3 %v1888_v5 }
 0x2f5   : > { %2049 = vmatpush.bf16.msra.mxu2 %v4527_v58  ;;  %2062 = vmatpush.bf16.msra.mxu3 %v4528_v0  ;;  %v4687_v58 = vld [vmem:[#allocation55_spill] sm:$0xff]  ;;  %v4688_v0 = vld [vmem:[#allocation56_spill] sm:$0xff] }
 0x2f7   : > { %2024 = vmatpush.bf16.msra.mxu0 %v4654_v9  ;;  %2037 = vmatpush.bf16.msra.mxu1 %v4655_v10  ;;  %v4714_v9 = vld [vmem:[#allocation20_spill] sm:$0xff] }
 0x2f9   : > { %2050 = vmatpush.bf16.msra.mxu2 %v4656_v14  ;;  %2063 = vmatpush.bf16.msra.mxu3 %v4657_v18 }
 0x2fb   : > { %2025 = vmatpush.bf16.msra.mxu0 %v4658_v19  ;;  %2038 = vmatpush.bf16.msra.mxu1 %v4659_v23 }
 0x2fd   : > { %2051 = vmatpush.bf16.msra.mxu2 %v4660_v30  ;;  %2064 = vmatpush.bf16.msra.mxu3 %v4661_v34  ;;  %v4715_v30 = vld [vmem:[#allocation21_spill] sm:$0xff] }
 0x2ff   : > { %2026 = vmatpush.bf16.msra.mxu0 %v4662_v35  ;;  %2039 = vmatpush.bf16.msra.mxu1 %v4663_v36 }
 0x301   : > { %2052 = vmatpush.bf16.msra.mxu2 %v4664_v43  ;;  %2065 = vmatpush.bf16.msra.mxu3 %v4665_v44 }
 0x303   : > { %2027 = vmatpush.bf16.msra.mxu0 %v4666_v47  ;;  %2040 = vmatpush.bf16.msra.mxu1 %v4667_v48 }
 0x305   : > { %2053 = vmatpush.bf16.msra.mxu2 %v4668_v55  ;;  %2066 = vmatpush.bf16.msra.mxu3 %v4669_v56 }
 0x307   : > { %2028 = vmatpush.bf16.msra.mxu0 %v4670_v59  ;;  %2041 = vmatpush.bf16.msra.mxu1 %v4671_v60 }
 0x309   : > { %2054 = vmatpush.bf16.msra.mxu2 %v4672_v3  ;;  %2067 = vmatpush.bf16.msra.mxu3 %v4673_v4 }
 0x30b   : > { %2029 = vmatpush.bf16.msra.mxu0 %v4674_v8  ;;  %2042 = vmatpush.bf16.msra.mxu1 %v4675_v11 }
 0x30d   : > { %2055 = vmatpush.bf16.msra.mxu2 %v4676_v21  ;;  %2068 = vmatpush.bf16.msra.mxu3 %v4677_v22 }
 0x30f   : > { %2030 = vmatpush.bf16.msra.mxu0 %v4678_v26  ;;  %2043 = vmatpush.bf16.msra.mxu1 %v4679_v27 }
 0x311   : > { %2056 = vmatpush.bf16.msra.mxu2 %v4682_v40  ;;  %2069 = vmatpush.bf16.msra.mxu3 %v4683_v41  ;;  %v4716_v41 = vld [vmem:[#allocation82_spill] sm:$0xff] }
 0x313   : > { %2075 = vmatpush.bf16.msrb.mxu0 %v4680_v38  ;;  %2088 = vmatpush.bf16.msrb.mxu1 %v4681_v39 }
 0x315   : > { %2101 = vmatpush.bf16.msrb.mxu2 %v4684_v49  ;;  %2114 = vmatpush.bf16.msrb.mxu3 %v4685_v53 }
 0x317   : > { %2076 = vmatpush.bf16.msrb.mxu0 %v4686_v61  ;;  %2089 = vmatpush.bf16.msrb.mxu1 %v4687_v58 }
 0x319   : > { %2102 = vmatpush.bf16.msrb.mxu2 %v4688_v0  ;;  %2115 = vmatpush.bf16.msrb.mxu3 %v4689_v33 }
 0x31b   : > { %2077 = vmatpush.bf16.msrb.mxu0 %v4690_v15  ;;  %2090 = vmatpush.bf16.msrb.mxu1 %v4691_v52 }
 0x31d   : > { %2103 = vmatpush.bf16.msrb.mxu2 %v4692_v6  ;;  %2116 = vmatpush.bf16.msrb.mxu3 %v4693_v12  ;;  %v2818_v6 = vld [vmem:[%s3580_s26 + $0x60] sm:$0xff]  ;;  %v2819_v12 = vld [vmem:[%s3580_s26 + $0x68] sm:$0xff] }
 0x31f   : > { %2078 = vmatpush.bf16.msrb.mxu0 %v4694_v7  ;;  %2091 = vmatpush.bf16.msrb.mxu1 %v4695_v29 }
 0x321   : > { %2104 = vmatpush.bf16.msrb.mxu2 %v4696_v16  ;;  %2117 = vmatpush.bf16.msrb.mxu3 %v4697_v37 }
 0x323   : > { %2079 = vmatpush.bf16.msrb.mxu0 %v4698_v2  ;;  %2092 = vmatpush.bf16.msrb.mxu1 %v4699_v50 }
 0x325   : > { %2105 = vmatpush.bf16.msrb.mxu2 %v4700_v51  ;;  %2118 = vmatpush.bf16.msrb.mxu3 %v4701_v45 }
 0x327   : > { %2080 = vmatpush.bf16.msrb.mxu0 %v4702_v54  ;;  %2093 = vmatpush.bf16.msrb.mxu1 %v4703_v24 }
 0x329   : > { %2106 = vmatpush.bf16.msrb.mxu2 %v4704_v32  ;;  %2119 = vmatpush.bf16.msrb.mxu3 %v4705_v57 }
 0x32b   : > { %2081 = vmatpush.bf16.msrb.mxu0 %v4706_v46  ;;  %2094 = vmatpush.bf16.msrb.mxu1 %v4707_v25 }
 0x32d   : > { %2107 = vmatpush.bf16.msrb.mxu2 %v4708_v63  ;;  %2120 = vmatpush.bf16.msrb.mxu3 %v4709_v28 }
 0x32f   : > { %2082 = vmatpush.bf16.msrb.mxu0 %v4710_v31  ;;  %2095 = vmatpush.bf16.msrb.mxu1 %v4711_v62 }
 0x331   : > { %2108 = vmatpush.bf16.msrb.mxu2 %v4712_v13  ;;  %2121 = vmatpush.bf16.msrb.mxu3 %v4713_v20 }
 0x34e   : > { %v1728_v1 = vpop.f32.mrf.mxu0  ;;  %v1741_v5 = vpop.f32.mrf.mxu1 }
 0x34f   : > { %v1729_v10 = vadd.f32 %v1728_v1, %v4714_v9 }
 0x351   : > { %v1742_v14 = vadd.f32 %v1741_v5, %v1729_v10  ;;  %v2821_v5 = vld [vmem:[%s3580_s26 + $0x78] sm:$0xff] }
 0x353   : > { %v2815_v18 = vmul.f32 -1.442695, %v1742_v14 }
 0x355   : > { %3146 = vpow2.f32 %v2815_v18  ;;  %v1754_v19 = vpop.f32.mrf.mxu2  ;;  %v1767_v23 = vpop.f32.mrf.mxu3  ;;  %v4719_v18 = vld [vmem:[#allocation83_spill] sm:$0xff] }
 0x356   : > { %v1755_v34 = vadd.f32 %v1754_v19, %v4715_v30  ;;  %v1730_v35 = vpop.f32.mrf.mxu0  ;;  %v1743_v36 = vpop.f32.mrf.mxu1 }
 0x358   : > { %v1768_v43 = vadd.f32 %v1767_v23, %v1755_v34 }
 0x35a   : > { %v2816_v44 = vmul.f32 -1.442695, %v1768_v43 }
 0x35b   : > { %v3147_v47 = vpop.eup %3146 }
 0x35c   : > { %v1826_v48 = vadd.f32 1.0, %v3147_v47  ;;  %3148 = vpow2.f32 %v2816_v44 }
 0x35d   : > { %v1756_v55 = vpop.f32.mrf.mxu2  ;;  %v1769_v56 = vpop.f32.mrf.mxu3 }
 0x35e   : > { %3150 = vrcp.f32 %v1826_v48  ;;  %v1780_v59 = vpop.f32.mrf.mxu0  ;;  %v1793_v60 = vpop.f32.mrf.mxu1  ;;  %vm1832_vm12 = vweird.f32 %v1826_v48  ;;  %v1836_v37 = vand.u32 2147483647, %v1826_v48  ;;  %v1838_v2 = vand.u32 2147483648, %v1826_v48 }
 0x35f   : > { %v1781_v49 = vadd.f32 %v1780_v59, %v4716_v41 }
 0x360   : > { %v1839_v13 = vor.u32 1.1754944e-38, %v1838_v2  ;;  %vm1837_vm2 = vcmp.eq.f32.partialorder %v1836_v37, 8.507059e+37 }
 0x361   : > { %v1794_v33 = vadd.f32 %v1793_v60, %v1781_v49 }
 0x362   : > { %v3149_v3 = vpop.eup %3148 }
 0x363   : > { %v1845_v4 = vadd.f32 1.0, %v3149_v3 }
 0x364   : > { %v3151_v8 = vpop.eup %3150 }
 0x365   : > { %v1828_v11 = vmul.f32 %v3151_v8, %v1826_v48  ;;  %3152 = vrcp.f32 %v1845_v4  ;;  %v1806_v21 = vpop.f32.mrf.mxu2  ;;  %v1819_v22 = vpop.f32.mrf.mxu3  ;;  %vm1833_vm13 = vweird.f32 %v3151_v8  ;;  %v1857_v16 = vand.u32 2147483648, %v1845_v4 }
 0x366   : > { %v1807_v26 = vadd.f32 %v1806_v21, %v4032_v42  ;;  %v1782_v27 = vpop.f32.mrf.mxu0  ;;  %v1795_v38 = vpop.f32.mrf.mxu1  ;;  %v1855_v50 = vand.u32 2147483647, %v1845_v4  ;;  %vm1851_vm15 = vweird.f32 %v1845_v4  ;;  %vm4275_vm0 = vmor %vm1832_vm12, %vm1833_vm13 }
 0x367   : > { %v1829_v39 = vsub.f32 1.0, %v1828_v11  ;;  %v1858_v62 = vor.u32 1.1754944e-38, %v1857_v16 }
 0x368   : > { %v1820_v40 = vadd.f32 %v1819_v22, %v1807_v26  ;;  %vm1856_vm3 = vcmp.eq.f32.partialorder %v1855_v50, 8.507059e+37 }
 0x369   : > { %v1830_v53 = vmul.f32 %v3151_v8, %v1829_v39  ;;  %v2820_v39 = vld [vmem:[%s3580_s26 + $0x70] sm:$0xff] }
 0x36a   : > { %v2817_v61 = vmul.f32 -1.442695, %v1820_v40 }
 0x36b   : > { %v3153_v58 = vpop.eup %3152  ;;  %v1831_v29 = vadd.f32 %v3151_v8, %v1830_v53 }
 0x36c   : > { %v1847_v0 = vmul.f32 %v3153_v58, %v1845_v4  ;;  %3154 = vpow2.f32 %v2817_v61  ;;  %vm1852_vm14 = vweird.f32 %v3153_v58 }
 0x36d   : > { %v1808_v15 = vpop.f32.mrf.mxu2  ;;  %v1821_v52 = vpop.f32.mrf.mxu3  ;;  %3156 = vtanh.f32 %v1794_v33  ;;  %v1835_v25 = vsel %vm4275_vm0, %v3151_v8, %v1831_v29  ;;  %vm1853_vm1 = vmor %vm1851_vm15, %vm1852_vm14 }
 0x36e   : > { %v1848_v7 = vsub.f32 1.0, %v1847_v0  ;;  %v1840_v10 = vsel %vm1837_vm2, %v1839_v13, %v1835_v25 }
 0x36f   : > { %v1903_v51 = vpop.f32.mrf.mxu0  ;;  %v1916_v45 = vpop.f32.mrf.mxu1 }
 0x370   : > { %v1849_v54 = vmul.f32 %v3153_v58, %v1848_v7  ;;  %v1946_v24 = vadd.f32 %v2818_v6, %v1903_v51  ;;  %v1947_v32 = vadd.f32 %v2819_v12, %v1916_v45 }
 0x372   : > { %v3155_v46 = vpop.eup %3154  ;;  %v1850_v63 = vadd.f32 %v3153_v58, %v1849_v54  ;;  %v2822_v28 = vmul.f32 -1.442695, %v1946_v24  ;;  %v2823_v31 = vmul.f32 -1.442695, %v1947_v32 }
 0x373   : > { %v1865_v20 = vadd.f32 1.0, %v3155_v46  ;;  %v3157_v35 = vpop.eup %3156 }
 0x374   : > { %v1854_v1 = vsel %vm1853_vm1, %v3153_v58, %v1850_v63  ;;  %3158 = vpow2.f32 %v2822_v28  ;;  %v1882_v47 = vmul.f32 %v3157_v35, %v1840_v10 }
 0x375   : > { %v1859_v14 = vsel %vm1856_vm3, %v1858_v62, %v1854_v1  ;;  %3160 = vrcp.f32 %v1865_v20  ;;  %v1877_v26 = vand.u32 2147483648, %v1865_v20  ;;  %v1875_v38 = vand.u32 2147483647, %v1865_v20 }
 0x376   : > { %v1881_v19 = vmul.f32 %v1859_v14, %v4719_v18  ;;  %3162 = vpow2.f32 %v2823_v31  ;;  %vm1871_vm5 = vweird.f32 %v1865_v20 }
 0x377   : > { %v1929_v23 = vpop.f32.mrf.mxu2  ;;  %v1942_v34 = vpop.f32.mrf.mxu3  ;;  %v1878_v58 = vor.u32 1.1754944e-38, %v1877_v26  ;;  %vm1876_vm7 = vcmp.eq.f32.partialorder %v1875_v38, 8.507059e+37 }
 0x378   : > { %v1949_v36 = vadd.f32 %v2821_v5, %v1942_v34  ;;  %v1905_v43 = vpop.f32.mrf.mxu0  ;;  %v1918_v44 = vpop.f32.mrf.mxu1  ;;  %v4283_v56 = vadd.f32 %v1882_v47, %v1881_v19  ;;  %v1948_v0 = vadd.f32 %v2820_v39, %v1929_v23 }
 0x37a   : > { %v2824_v48 = vmul.f32 -1.442695, %v1949_v36  ;;  %v3159_v55 = vpop.eup %3158 }
 0x37b   : > { %v3161_v59 = vpop.eup %3160  ;;  %v1953_v60 = vadd.f32 1.0, %v3159_v55 }
 0x37c   : > { %3164 = vpow2.f32 %v2824_v48  ;;  %v3163_v3 = vpop.eup %3162  ;;  %v1867_v4 = vmul.f32 %v3161_v59, %v1865_v20  ;;  %vm1872_vm4 = vweird.f32 %v3161_v59 }
 0x37d   : > { %3166 = vrcp.f32 %v1953_v60  ;;  %v1972_v8 = vadd.f32 1.0, %v3163_v3  ;;  %vm1873_vm6 = vmor %vm1871_vm5, %vm1872_vm4  ;;  %v1963_v37 = vand.u32 2147483647, %v1953_v60  ;;  %v1965_v2 = vand.u32 2147483648, %v1953_v60 }
 0x37e   : > { %3168 = vtanh.f32 %v4283_v56  ;;  %v1868_v11 = vsub.f32 1.0, %v1867_v4  ;;  %vm1959_vm9 = vweird.f32 %v1953_v60 }
 0x37f   : > { %v1931_v21 = vpop.f32.mrf.mxu2  ;;  %v1944_v22 = vpop.f32.mrf.mxu3  ;;  %3170 = vrcp.f32 %v1972_v8  ;;  %v1984_v54 = vand.u32 2147483648, %v1972_v8  ;;  %v1982_v46 = vand.u32 2147483647, %v1972_v8  ;;  %v1966_v25 = vor.u32 1.1754944e-38, %v1965_v2 }
 0x380   : > { %v1869_v27 = vmul.f32 %v3161_v59, %v1868_v11  ;;  %vm1978_vm12 = vweird.f32 %v1972_v8  ;;  %vm1964_vm13 = vcmp.eq.f32.partialorder %v1963_v37, 8.507059e+37 }
 0x381   : > { %v1985_v13 = vor.u32 1.1754944e-38, %v1984_v54  ;;  %vm1983_vm15 = vcmp.eq.f32.partialorder %v1982_v46, 8.507059e+37 }
 0x382   : > { %v3165_v40 = vpop.eup %3164  ;;  %v1870_v49 = vadd.f32 %v3161_v59, %v1869_v27 }
 0x383   : > { %v1992_v53 = vadd.f32 1.0, %v3165_v40  ;;  %v3167_v61 = vpop.eup %3166 }
 0x384   : > { %v3169_v33 = vpop.eup %3168  ;;  %v1874_v15 = vsel %vm1873_vm6, %v3161_v59, %v1870_v49  ;;  %v1955_v52 = vmul.f32 %v3167_v61, %v1953_v60  ;;  %vm1960_vm8 = vweird.f32 %v3167_v61 }
 0x385   : > { %3172 = vrcp.f32 %v1992_v53  ;;  %v3171_v6 = vpop.eup %3170  ;;  %v1879_v12 = vsel %vm1876_vm7, %v1878_v58, %v1874_v15  ;;  %vm1961_vm11 = vmor %vm1959_vm9, %vm1960_vm8  ;;  %v2004_v35 = vand.u32 2147483648, %v1992_v53  ;;  %vm1998_vm1 = vweird.f32 %v1992_v53 }
 0x386   : > { %v1885_v7 = vmul.f32 %v3169_v33, %v1879_v12  ;;  %v1956_v29 = vsub.f32 1.0, %v1955_v52  ;;  %v1974_v16 = vmul.f32 %v3171_v6, %v1972_v8  ;;  %3174 = vtanh.f32 %v1948_v0 }
 0x387   : > { %vm1979_vm10 = vweird.f32 %v3171_v6  ;;  %v2002_v36 = vand.u32 2147483647, %v1992_v53  ;;  %v2005_v44 = vor.u32 1.1754944e-38, %v2004_v35 }
 0x388   : > { %v1886_v50 = vpack.c.bf16 %v1885_v7, %v1885_v7  ;;  %v1975_v51 = vsub.f32 1.0, %v1974_v16  ;;  %v1957_v45 = vmul.f32 %v3167_v61, %v1956_v29  ;;  %vm1980_vm14 = vmor %vm1978_vm12, %vm1979_vm10 }
 0x389   : > { %vm2003_vm3 = vcmp.eq.f32.partialorder %v2002_v36, 8.507059e+37 }
 0x38a   : > { %1887 = vst [vmem:[#allocation2 + $0x4] sm:$0xf] %v1886_v50  ;;  %v1976_v32 = vmul.f32 %v3171_v6, %v1975_v51  ;;  %v1958_v57 = vadd.f32 %v3167_v61, %v1957_v45 }
 0x38b   : > { %v3173_v24 = vpop.eup %3172 }
 0x38c   : > { %v1994_v63 = vmul.f32 %v3173_v24, %v1992_v53  ;;  %v1962_v28 = vsel %vm1961_vm11, %v3167_v61, %v1958_v57  ;;  %v1977_v31 = vadd.f32 %v3171_v6, %v1976_v32  ;;  %v3175_v62 = vpop.eup %3174  ;;  %vm1999_vm0 = vweird.f32 %v3173_v24 }
 0x38d   : > { %v1967_v20 = vsel %vm1964_vm13, %v1966_v25, %v1962_v28  ;;  %vm2000_vm2 = vmor %vm1998_vm1, %vm1999_vm0 }
 0x38e   : > { %v1995_v1 = vsub.f32 1.0, %v1994_v63  ;;  %v1981_v5 = vsel %vm1980_vm14, %v3171_v6, %v1977_v31  ;;  %v2009_v10 = vmul.f32 %v3175_v62, %v1967_v20 }
 0x38f   : > { %v1986_v14 = vsel %vm1983_vm15, %v1985_v13, %v1981_v5 }
 0x390   : > { %v1996_v18 = vmul.f32 %v3173_v24, %v1995_v1  ;;  %v2008_v19 = vmul.f32 %v1986_v14, %v4170_v17 }
 0x392   : > { %v2010_v23 = vadd.f32 %v2009_v10, %v2008_v19  ;;  %v1997_v34 = vadd.f32 %v3173_v24, %v1996_v18 }
 0x394   : > { %3176 = vtanh.f32 %v2010_v23  ;;  %2192 = vst [vmem:[#allocation3] sm:$0xff] %v2010_v23  ;;  %v2001_v43 = vsel %vm2000_vm2, %v3173_v24, %v1997_v34 }
 0x395   : > { %v2006_v48 = vsel %vm2003_vm3, %v2005_v44, %v2001_v43 }
 0x39a   : > { %v3177_v47 = vpop.eup %3176 }
 0x39b   : > { %v2012_v55 = vmul.f32 %v3177_v47, %v2006_v48 }
 0x39d   : > { %v2013_v59 = vpack.c.bf16 %v2012_v55, %v2012_v55 }
 0x39f   : > { %2014 = vst [vmem:[#allocation2] sm:$0xf] %v2013_v59 }
 0x3a6   : > { %v2015_v60 = vld [vmem:[#allocation2] sm:$0xff] }
 0x3a7   : > { %v2017_v3 = vunpack.c.l.b16 %v2015_v60  ;;  %v2018_v17 = vunpack.c.h.b16 %v2015_v60 }
 0x3a9   : > { %v2019_v4 = vpack.c.b16 %v2017_v3, %v2017_v3  ;;  %v2020_v8 = vpack.c.b16 %v2018_v17, %v2018_v17 }
 0x3ab   : > { %2031 = vmatmul.bf16.vlgmr.msra.gmra.mxu0 %v2019_v4  ;;  %2044 = vmatmul.bf16.vlgmr.msra.gmra.mxu1 %v2020_v8 }
 0x3ac   : > { %2057 = vmatmul.bf16.vlgmr.msra.gmra.mxu2 %v2019_v4  ;;  %2070 = vmatmul.bf16.vlgmr.msra.gmra.mxu3 %v2020_v8 }
 0x3bb   : > { %2083 = vmatmul.bf16.vlgmr.msrb.gmra.mxu0 %v2019_v4  ;;  %2096 = vmatmul.bf16.vlgmr.msrb.gmra.mxu1 %v2020_v8 }
 0x3bc   : > { %2109 = vmatmul.bf16.vlgmr.msrb.gmra.mxu2 %v2019_v4  ;;  %2122 = vmatmul.bf16.vlgmr.msrb.gmra.mxu3 %v2020_v8 }
 0x428   : > { %v2032_v11 = vpop.f32.mrf.mxu0  ;;  %v2045_v21 = vpop.f32.mrf.mxu1 }
 0x429   : > { %v2033_v22 = vadd.f32 %v2032_v11, %v4714_v9 }
 0x42b   : > { %v2046_v26 = vadd.f32 %v2045_v21, %v2033_v22 }
 0x42d   : > { %v2825_v27 = vmul.f32 -1.442695, %v2046_v26 }
 0x42f   : > { %3178 = vpow2.f32 %v2825_v27  ;;  %v2058_v38 = vpop.f32.mrf.mxu2  ;;  %v2071_v39 = vpop.f32.mrf.mxu3 }
 0x430   : > { %v2059_v40 = vadd.f32 %v2058_v38, %v4715_v30  ;;  %v2034_v49 = vpop.f32.mrf.mxu0  ;;  %v2047_v53 = vpop.f32.mrf.mxu1 }
 0x432   : > { %v2072_v61 = vadd.f32 %v2071_v39, %v2059_v40 }
 0x434   : > { %v2826_v58 = vmul.f32 -1.442695, %v2072_v61 }
 0x435   : > { %v3179_v0 = vpop.eup %3178 }
 0x436   : > { %v2130_v33 = vadd.f32 1.0, %v3179_v0  ;;  %3180 = vpow2.f32 %v2826_v58 }
 0x437   : > { %v2060_v15 = vpop.f32.mrf.mxu2  ;;  %v2073_v52 = vpop.f32.mrf.mxu3 }
 0x438   : > { %3182 = vrcp.f32 %v2130_v33  ;;  %v2084_v6 = vpop.f32.mrf.mxu0  ;;  %v2097_v12 = vpop.f32.mrf.mxu1  ;;  %v2142_v31 = vand.u32 2147483648, %v2130_v33  ;;  %vm2136_vm5 = vweird.f32 %v2130_v33 }
 0x439   : > { %v2085_v54 = vadd.f32 %v2084_v6, %v4716_v41 }
 0x43a   : > { %v2143_v14 = vor.u32 1.1754944e-38, %v2142_v31 }
 0x43b   : > { %v2098_v25 = vadd.f32 %v2097_v12, %v2085_v54 }
 0x43c   : > { %v3181_v9 = vpop.eup %3180 }
 0x43d   : > { %v2149_v7 = vadd.f32 1.0, %v3181_v9 }
 0x43e   : > { %v3183_v29 = vpop.eup %3182 }
 0x43f   : > { %v2132_v16 = vmul.f32 %v3183_v29, %v2130_v33  ;;  %3184 = vrcp.f32 %v2149_v7  ;;  %v2110_v37 = vpop.f32.mrf.mxu2  ;;  %v2123_v2 = vpop.f32.mrf.mxu3  ;;  %vm2137_vm4 = vweird.f32 %v3183_v29  ;;  %v2161_v1 = vand.u32 2147483648, %v2149_v7 }
 0x440   : > { %v2111_v30 = vadd.f32 %v2110_v37, %v4032_v42  ;;  %v2086_v50 = vpop.f32.mrf.mxu0  ;;  %v2099_v51 = vpop.f32.mrf.mxu1  ;;  %v2140_v42 = vand.u32 2147483647, %v2130_v33  ;;  %vm2138_vm6 = vmor %vm2136_vm5, %vm2137_vm4  ;;  %v2159_v10 = vand.u32 2147483647, %v2149_v7  ;;  %vm2155_vm8 = vweird.f32 %v2149_v7 }
 0x441   : > { %v2133_v45 = vsub.f32 1.0, %v2132_v16  ;;  %v2162_v23 = vor.u32 1.1754944e-38, %v2161_v1 }
 0x442   : > { %v2124_v24 = vadd.f32 %v2123_v2, %v2111_v30  ;;  %vm2141_vm9 = vcmp.eq.f32.partialorder %v2140_v42, 8.507059e+37  ;;  %vm2160_vm11 = vcmp.eq.f32.partialorder %v2159_v10, 8.507059e+37 }
 0x443   : > { %v2134_v32 = vmul.f32 %v3183_v29, %v2133_v45 }
 0x444   : > { %v2827_v57 = vmul.f32 -1.442695, %v2124_v24 }
 0x445   : > { %v3185_v46 = vpop.eup %3184  ;;  %v2135_v28 = vadd.f32 %v3183_v29, %v2134_v32 }
 0x446   : > { %v2151_v63 = vmul.f32 %v3185_v46, %v2149_v7  ;;  %3186 = vpow2.f32 %v2827_v57  ;;  %vm2156_vm7 = vweird.f32 %v3185_v46 }
 0x447   : > { %v2112_v62 = vpop.f32.mrf.mxu2  ;;  %v2125_v13 = vpop.f32.mrf.mxu3  ;;  %3188 = vtanh.f32 %v2098_v25  ;;  %v2139_v41 = vsel %vm2138_vm6, %v3183_v29, %v2135_v28  ;;  %vm2157_vm10 = vmor %vm2155_vm8, %vm2156_vm7 }
 0x448   : > { %v2152_v20 = vsub.f32 1.0, %v2151_v63  ;;  %v2144_v34 = vsel %vm2141_vm9, %v2143_v14, %v2139_v41 }
 0x44a   : > { %v2153_v5 = vmul.f32 %v3185_v46, %v2152_v20 }
 0x44c   : > { %v3187_v18 = vpop.eup %3186  ;;  %v2154_v19 = vadd.f32 %v3185_v46, %v2153_v5 }
 0x44d   : > { %v2169_v35 = vadd.f32 1.0, %v3187_v18  ;;  %v3189_v43 = vpop.eup %3188 }
 0x44e   : > { %v2158_v36 = vsel %vm2157_vm10, %v3185_v46, %v2154_v19  ;;  %v2186_v48 = vmul.f32 %v3189_v43, %v2144_v34 }
 0x44f   : > { %v2163_v44 = vsel %vm2160_vm11, %v2162_v23, %v2158_v36  ;;  %3190 = vrcp.f32 %v2169_v35  ;;  %v2181_v17 = vand.u32 2147483648, %v2169_v35  ;;  %v2179_v8 = vand.u32 2147483647, %v2169_v35 }
 0x450   : > { %v2185_v47 = vmul.f32 %v2163_v44, %v4283_v56  ;;  %vm2175_vm13 = vweird.f32 %v2169_v35 }
 0x451   : > { %v2182_v21 = vor.u32 1.1754944e-38, %v2181_v17  ;;  %vm2180_vm15 = vcmp.eq.f32.partialorder %v2179_v8, 8.507059e+37 }
 0x452   : > { %v2187_v55 = vadd.f32 %v2186_v48, %v2185_v47 }
 0x454   : > { %2193 = vst [vmem:[#allocation5] sm:$0xff] %v2187_v55  ;;  %3192 = vtanh.f32 %v2187_v55 }
 0x455   : > { %v3191_v59 = vpop.eup %3190 }
 0x456   : > { %v2171_v60 = vmul.f32 %v3191_v59, %v2169_v35  ;;  %vm2176_vm12 = vweird.f32 %v3191_v59 }
 0x457   : > { %vm2177_vm14 = vmor %vm2175_vm13, %vm2176_vm12 }
 0x458   : > { %v2172_v3 = vsub.f32 1.0, %v2171_v60 }
 0x45a   : > { %v2173_v4 = vmul.f32 %v3191_v59, %v2172_v3  ;;  %v3193_v26 = vpop.eup %3192 }
 0x45c   : > { %v2174_v11 = vadd.f32 %v3191_v59, %v2173_v4 }
 0x45e   : > { %v2178_v22 = vsel %vm2177_vm14, %v3191_v59, %v2174_v11 }
 0x45f   : > { %v2183_v27 = vsel %vm2180_vm15, %v2182_v21, %v2178_v22 }
 0x460   : > { %v2189_v56 = vmul.f32 %v3193_v26, %v2183_v27  ;;  %2198 = sbr.rel (%p2828_p1) target bundleno = 1291 (0x50b), region = 80 }
 0x462   : > { %v2190_v38 = vpack.c.bf16 %v2189_v56, %v2189_v56 }
 0x464   : > { %2191 = vst [vmem:[#allocation2 + $0x4] sm:$0xf] %v2190_v38 }
 0x465   : > { %v2970_v39 = vld [vmem:[#allocation14 + $0x38] sm:$0xff]  ;;  %v2969_v40 = vld [vmem:[#allocation14 + $0x30] sm:$0xff]  ;;  %v2968_v49 = vld [vmem:[#allocation14 + $0x28] sm:$0xff] }
 0x466   : > { %2279 = vmatpush.bf16.msra.mxu0 %v2970_v39  ;;  %v2967_v53 = vld [vmem:[#allocation14 + $0x20] sm:$0xff]  ;;  %v2966_v58 = vld [vmem:[#allocation14 + $0x18] sm:$0xff]  ;;  %v2965_v15 = vld [vmem:[#allocation14 + $0x10] sm:$0xff] }
 0x467   : > { %v3194_v61 = vld [vmem:[%s4324_s4] ss:$0 sm:$0xff]  ;;  %v2964_v6 = vld [vmem:[#allocation14 + $0x8] sm:$0xff] }
 0x468   : > { %v2203_v0 = vmul.f32 %v3194_v61, %v2189_v56  ;;  %v3195_v33 = vld [vmem:[%s4325_s5] ss:$0 sm:$0xff] }
 0x469   : > { %v2963_v9 = vld [vmem:[#allocation14] sm:$0xff] }
 0x46a   : > { %2280 = vmatpush.bf16.msra.mxu0 %v2969_v40  ;;  %v2208_v52 = vadd.f32 %v3195_v33, %v2203_v0  ;;  %v3196_v29 = vld [vmem:[%s4327_s7] ss:$0 sm:$0xff] }
 0x46c   : > { %v2209_v12 = vmax.f32 %v2208_v52, 0.0 }
 0x46e   : > { %2281 = vmatpush.bf16.msra.mxu0 %v2968_v49  ;;  %v2210_v7 = vpack.c.bf16 %v2209_v12, %v2209_v12 }
 0x472   : > { %2282 = vmatpush.bf16.msra.mxu0 %v2967_v53 }
 0x476   : > { %2283 = vmatpush.bf16.msra.mxu0 %v2966_v58 }
 0x47a   : > { %2284 = vmatpush.bf16.msra.mxu0 %v2965_v15 }
 0x47e   : > { %2285 = vmatpush.bf16.msra.mxu0 %v2964_v6 }
 0x482   : > { %2286 = vmatpush.bf16.msra.mxu0 %v2963_v9 }
 0x485   : > { %2287 = vmatmul.bf16.vlgmr.msra.gmra.mxu0 %v2210_v7 }
 0x502   : > { %v2288_v16 = vpop.f32.mrf.mxu0 }
 0x503   : > { %v2289_v37 = vadd.f32 %v3196_v29, %v2288_v16 }
 0x505   : > { %2292 = vst [vmem:[#allocation15] sm:$0xff] %v2289_v37 }
 0x50a   : > { %v2290_v2 = vpop.f32.mrf.mxu0 }
 0x50b PF: > { %p3019_p4 = scmp.eq.s32.totalorder %s3500_s9, 1  ;;  %s3435_s23 = smov [#allocation15]  }
 0x50c   : > { %s2299_s25 = sshll.u32 %s3435_s23, 4  ;;  %s2301_s12 = sshll.u32 %s4328_s8, 4  ;;  %s2300_s25 = int_to_ptr.vmem [resolvable:$true] %s2299_s25  ;;  %s2302_s12 = int_to_ptr.hbm [resolvable:$true] %s2301_s12 }
 0x50d   : > { %2990 = dma.vmem_to_hbm [thread:$0]  (%p3019_p4), %s2300_s25, 128, %s2302_s12, [#allocation8]  }
 0x50e   : > { %3404 = dma.done.wait (%p3019_p4), [#allocation8], 128  }
 0x50f   : > { %3406 = vsyncadd (%p3019_p4), [#allocation8], 4294967168 }
 0x510 PF: > { %p21_p5 = scmp.ge.s32.totalorder %s3546_s24, 4   ;;  %s4720_s27 = smov %s3413_s28 }
 0x511   : > { %s4721_s28 = smov %s3417_s29  ;;  %s4722_s29 = smov %s3555_s11 }
 0x512   : > { %s4723_s30 = smov %s3546_s24  ;;  %23 = sbr.rel (!%p21_p5) target bundleno = 6 (0x6), region = 116 }
 0x517   :  { %2315 = vsyncpa [#allocation7], 1 }
 0x518   :  { %2317 = vsyncpa [#allocation7 + $0x1], 1 }
 0x519   :  { %2318 = vsyncpa [#allocation10], 1 }
 0x51a   :  { %2319 = vsyncpa [#allocation13], 1 }
 0x51b   :  { %2320 = vsyncpa [#allocation8], 1 }
 0x51c   :  { %2322 = vsyncpa [#allocation8 + $0x1], 1 }

</bundles_post_ra>
